<compile_context>
chip_gen: v7x
topology: tpu7x:2x2x1
jax: 0.10.0
libtpu: 0.0.40
codegen_flags: <defaults>
</compile_context>

<pallas_src>
import functools

import jax
import jax.numpy as jnp
from jax.experimental import pallas as pl
from jax.experimental.pallas import tpu as pltpu


def _round_up(x, m):
    return (x + m - 1) // m * m


def _next_pow2(x):
    return 1 << max(0, (x - 1).bit_length())


def _resolve_tiles(n, row_tile, k_tile):
    """Clamp the (power-of-two) tiles to the graph size and pick n_pad."""
    np2 = _next_pow2(n)
    row_tile = min(row_tile, max(8, np2))      # multiple of 8 (sublane)
    k_tile = min(k_tile, max(128, np2))        # multiple of 128 (lane)
    n_pad = _round_up(n, max(row_tile, k_tile))  # both tiles divide n_pad
    return row_tile, k_tile, n_pad


def _sage_aggr_kernel(adj_ref, sup_ref, self_ref, out_ref, acc_ref, *, apply_relu):
    """Grid step (i, k):  acc += A[i, k] @ support[k]; finalize adds self term."""
    k = pl.program_id(1)

    @pl.when(k == 0)
    def _():
        acc_ref[...] = jnp.zeros_like(acc_ref)

    # support is VMEM-resident as [n_k, k_tile, f_pad]; pick the k-th chunk.
    acc_ref[...] += jnp.dot(
        adj_ref[...], sup_ref[k], preferred_element_type=jnp.float32
    )

    @pl.when(k == pl.num_programs(1) - 1)
    def _():
        res = acc_ref[...] + self_ref[...].astype(jnp.float32)
        if apply_relu:
            res = jnp.maximum(res, 0.0)
        out_ref[...] = res.astype(out_ref.dtype)


def _sage_conv_padded(x_p, adj_p, w_neigh, w_self, bias, *, apply_relu,
                      row_tile, k_tile, compute_dtype):
    """One SAGEConv layer on padded inputs.

    x_p:   [n_pad, f_in_p]  node features (padded rows / extra feature cols are 0).
    adj_p: [n_pad, n_pad]   row-normalized adjacency, padded (+ cast) once outside.
    Returns the padded output [n_pad, f_out_pad]; valid block is [:n, :f_out].
    """
    n_pad = adj_p.shape[0]
    f_in_w, f_out = w_neigh.shape
    f_in_x = x_p.shape[1]

    # Zero-pad the (tiny) weights so padded feature columns of x_p are inert.
    if f_in_x != f_in_w:
        w_neigh = jnp.zeros((f_in_x, f_out), w_neigh.dtype).at[:f_in_w].set(w_neigh)
        w_self = jnp.zeros((f_in_x, f_out), w_self.dtype).at[:f_in_w].set(w_self)

    # Hoisted small projections (done ONCE per layer, not per grid step).
    support = jnp.dot(x_p, w_neigh, preferred_element_type=jnp.float32)          # [n_pad, f_out]
    pre_self = jnp.dot(x_p, w_self, preferred_element_type=jnp.float32) + bias   # [n_pad, f_out]

    # Lane-dense output: pad feature dim to a multiple of 128.
    f_pad = _round_up(max(f_out, 128), 128)
    sup_dtype = jnp.float32 if compute_dtype is None else compute_dtype
    sup_p = jnp.zeros((n_pad, f_pad), sup_dtype).at[:, :f_out].set(
        support.astype(sup_dtype))
    self_p = jnp.zeros((n_pad, f_pad), jnp.float32).at[:, :f_out].set(pre_self)

    # Reshape so the kernel can index the k-th chunk of the resident support.
    n_k = n_pad // k_tile
    sup_p = sup_p.reshape(n_k, k_tile, f_pad)

    grid = (n_pad // row_tile, n_k)
    out_dtype = x_p.dtype

    flops = 2 * n_pad * n_pad * f_pad
    bytes_accessed = (
        adj_p.size * adj_p.dtype.itemsize            # A streamed once
        + sup_p.size * sup_p.dtype.itemsize          # support resident: read once
        + self_p.size * self_p.dtype.itemsize        # self/bias term
        + n_pad * f_pad * jnp.dtype(out_dtype).itemsize  # output write
    )

    out = pl.pallas_call(
        functools.partial(_sage_aggr_kernel, apply_relu=apply_relu),
        out_shape=jax.ShapeDtypeStruct((n_pad, f_pad), out_dtype),
        grid_spec=pltpu.PrefetchScalarGridSpec(
            num_scalar_prefetch=0,
            grid=grid,
            in_specs=[
                # Stream A_mean in (row_tile, k_tile) blocks -- the dominant HBM read.
                pl.BlockSpec((row_tile, k_tile), lambda i, k: (i, k)),
                # Whole support slab VMEM-resident (constant block index -> one DMA).
                pl.BlockSpec((n_k, k_tile, f_pad), lambda i, k: (0, 0, 0)),
                # Self term / bias tile, reused across all k of a row tile.
                pl.BlockSpec((row_tile, f_pad), lambda i, k: (i, 0)),
            ],
            out_specs=pl.BlockSpec((row_tile, f_pad), lambda i, k: (i, 0)),
            scratch_shapes=[pltpu.VMEM((row_tile, f_pad), jnp.float32)],
        ),
        compiler_params=pltpu.CompilerParams(
            # Row tiles independent (megacore / v7x 2-TC sharding); K is a reduction.
            dimension_semantics=("parallel", "arbitrary"),
            # Comfortable on v7x's 64 MiB VMEM, extra headroom on v5e/v6e.
            vmem_limit_bytes=48 * 1024 * 1024,
        ),
        cost_estimate=pl.CostEstimate(
            flops=int(flops), transcendentals=0, bytes_accessed=int(bytes_accessed)
        ),
    )(adj_p, sup_p, self_p)

    return out


@functools.partial(jax.jit, static_argnames=("row_tile", "k_tile", "compute_dtype"))
def sage_forward(x, adj_mean, params, *, row_tile=256, k_tile=512,
                 compute_dtype=jnp.bfloat16):
    """SAGE.forward: conv1 -> ReLU (fused into conv1's kernel) -> conv2."""
    n, f_in = x.shape
    f_out_final = params["w2_neigh"].shape[1]
    row_tile, k_tile, n_pad = _resolve_tiles(n, row_tile, k_tile)

    # Pad (+ cast) the N x N adjacency ONCE; shared by both layers.
    adj_dtype = jnp.float32 if compute_dtype is None else compute_dtype
    adj_p = jnp.zeros((n_pad, n_pad), adj_dtype).at[:n, :n].set(
        adj_mean.astype(adj_dtype))

    # Pad node rows of x once (padded rows are zero).
    x_p = jnp.zeros((n_pad, f_in), x.dtype).at[:n].set(x)

    h_p = _sage_conv_padded(
        x_p, adj_p, params["w1_neigh"], params["w1_self"], params["b1"],
        apply_relu=True, row_tile=row_tile, k_tile=k_tile,
        compute_dtype=compute_dtype,
    )
    # Layer-1 output stays in padded (n_pad, 128) form and feeds layer 2 directly.
    out_p = _sage_conv_padded(
        h_p, adj_p, params["w2_neigh"], params["w2_self"], params["b2"],
        apply_relu=False, row_tile=row_tile, k_tile=k_tile,
        compute_dtype=compute_dtype,
    )
    return out_p[:n, :f_out_final]


def edge_index_to_mean_adj(edge_index, num_nodes):
    """Dense row-normalized (mean-aggregation) adjacency from edge_index [2, E]."""
    # TODO(synk): irregular edge_index scatter has no clean tiled Pallas mapping;
    # built once with an XLA scatter in the wrapper.
    src, dst = edge_index[0], edge_index[1]
    a = jnp.zeros((num_nodes, num_nodes), jnp.float32).at[dst, src].add(1.0)
    deg = a.sum(axis=1, keepdims=True)
    return a / jnp.maximum(deg, 1.0)


def init_sage_params(key, input_dim, hidden_dim, output_dim):
    k1, k2, k3, k4, k5, k6 = jax.random.split(key, 6)

    def glorot(k, shape):
        bound = (6.0 / (shape[0] + shape[1])) ** 0.5
        return jax.random.uniform(k, shape, jnp.float32, -bound, bound)

    return {
        "w1_neigh": glorot(k1, (input_dim, hidden_dim)),
        "w1_self": glorot(k2, (input_dim, hidden_dim)),
        "b1": jax.random.uniform(k5, (hidden_dim,), jnp.float32, -0.1, 0.1),
        "w2_neigh": glorot(k3, (hidden_dim, output_dim)),
        "w2_self": glorot(k4, (hidden_dim, output_dim)),
        "b2": jax.random.uniform(k6, (output_dim,), jnp.float32, -0.1, 0.1),
    }


if __name__ == "__main__":
    key = jax.random.PRNGKey(0)
    k_x, k_e1, k_e2, k_p = jax.random.split(key, 4)

    # Small shapes consistent with the module (Cora-like but shrunk).
    # num_nodes=600 -> n_pad=1024, grid=(4, 2): exercises both the parallel row
    # axis and the multi-step K reduction with the default 256/512 tiles.
    num_nodes = 600
    input_dim = 96
    hidden_dim = 16
    output_dim = 7
    num_edges = 4096

    x = jax.random.normal(k_x, (num_nodes, input_dim), jnp.float32)
    src = jax.random.randint(k_e1, (num_edges,), 0, num_nodes)
    dst = jax.random.randint(k_e2, (num_edges,), 0, num_nodes)
    edge_index = jnp.stack([src, dst])

    adj_mean = edge_index_to_mean_adj(edge_index, num_nodes)
    params = init_sage_params(k_p, input_dim, hidden_dim, output_dim)

    # Exact f32 path and default bf16 (fast) path.
    out_f32 = jax.block_until_ready(
        sage_forward(x, adj_mean, params, compute_dtype=None))
    out_bf16 = jax.block_until_ready(sage_forward(x, adj_mean, params))

    # Plain-JAX reference with the SAGEConv ordering: lin_l(mean aggr) + lin_r(x).
    def ref_conv(x_, w_neigh, w_self, b):
        return (adj_mean @ x_) @ w_neigh + b + x_ @ w_self

    h_ref = jnp.maximum(
        ref_conv(x, params["w1_neigh"], params["w1_self"], params["b1"]), 0.0
    )
    ref = ref_conv(h_ref, params["w2_neigh"], params["w2_self"], params["b2"])

    assert out_f32.shape == (num_nodes, output_dim)
    assert out_bf16.shape == (num_nodes, output_dim)
    assert jnp.allclose(out_f32, ref, atol=1e-3, rtol=1e-3), "f32 path mismatch"
    assert jnp.allclose(out_bf16, ref, atol=1e-1, rtol=5e-2), "bf16 path mismatch"

    print("KERNEL_OK")
</pallas_src>

<mosaic_0001>
module attributes {stable_mosaic.version = 11 : i64} {
  func.func @_sage_aggr_kernel(%arg0: i32, %arg1: i32, %arg2: memref<256x512xf32, #tpu.memory_space<vmem>>, %arg3: memref<2x512x128xf32, #tpu.memory_space<vmem>>, %arg4: memref<256x128xf32, #tpu.memory_space<vmem>>, %arg5: memref<256x128xf32, #tpu.memory_space<vmem>>, %arg6: memref<256x128xf32, #tpu.memory_space<vmem>>) attributes {dimension_semantics = [#tpu.dimension_semantics<parallel>, #tpu.dimension_semantics<arbitrary>], iteration_bounds = array<i64: 4, 2>, scalar_prefetch = 0 : i64, scratch_operands = 1 : i64, tpu.core_type = #tpu.core_type<tc>, window_params = [{transform_indices = @transform_0, window_bounds = array<i64: 256, 512>}, {pipeline_mode = #tpu.pipeline_mode<synchronous>, transform_indices = @transform_1, window_bounds = array<i64: 2, 512, 128>}, {transform_indices = @transform_2, window_bounds = array<i64: 256, 128>}, {transform_indices = @transform_3, window_bounds = array<i64: 256, 128>}]} {
    %c0_i32 = arith.constant 0 : i32
    %0 = arith.cmpi eq, %arg1, %c0_i32 : i32
    %1 = arith.extui %0 : i1 to i32
    %c0_i32_0 = arith.constant 0 : i32
    %2 = arith.cmpi ne, %1, %c0_i32_0 : i32
    scf.if %2 {
      %cst_9 = arith.constant 0.000000e+00 : f32
      %14 = vector.broadcast %cst_9 : f32 to vector<256x128xf32>
      %c0_10 = arith.constant 0 : index
      %c0_11 = arith.constant 0 : index
      %15 = vector.load %arg6[%c0_10, %c0_11] : memref<256x128xf32, #tpu.memory_space<vmem>>, vector<256x128xf32>
      tpu.vector_store %arg6[%c0_10, %c0_11], %14 {strides = array<i32>} : memref<256x128xf32, #tpu.memory_space<vmem>>, vector<256x128xf32>,
    } else {
    }
    %c0 = arith.constant 0 : index
    %c0_1 = arith.constant 0 : index
    %3 = vector.load %arg6[%c0, %c0_1] : memref<256x128xf32, #tpu.memory_space<vmem>>, vector<256x128xf32>
    %c0_2 = arith.constant 0 : index
    %c0_3 = arith.constant 0 : index
    %4 = vector.load %arg2[%c0_2, %c0_3] : memref<256x512xf32, #tpu.memory_space<vmem>>, vector<256x512xf32>
    %5 = arith.index_cast %arg1 : i32 to index
    %c0_4 = arith.constant 0 : index
    %c0_5 = arith.constant 0 : index
    %6 = vector.load %arg3[%5, %c0_4, %c0_5] : memref<2x512x128xf32, #tpu.memory_space<vmem>>, vector<1x512x128xf32>
    %7 = vector.shape_cast %6 : vector<1x512x128xf32> to vector<512x128xf32>
    %cst = arith.constant dense<0.000000e+00> : vector<256x128xf32>
    %8 = tpu.matmul %4, %7, %cst {dimension_numbers = #tpu.dot_dimension_numbers<[1], [0], [0], [1], [0, 0, 1, 1], [], []>} : vector<256x512xf32>, vector<512x128xf32>, vector<256x128xf32> -> vector<256x128xf32>
    %9 = arith.addf %3, %8 : vector<256x128xf32>
    %c0_6 = arith.constant 0 : index
    %c0_7 = arith.constant 0 : index
    %10 = vector.load %arg6[%c0_6, %c0_7] : memref<256x128xf32, #tpu.memory_space<vmem>>, vector<256x128xf32>
    tpu.vector_store %arg6[%c0_6, %c0_7], %9 {strides = array<i32>} : memref<256x128xf32, #tpu.memory_space<vmem>>, vector<256x128xf32>,
    %c1_i32 = arith.constant 1 : i32
    %11 = arith.cmpi eq, %arg1, %c1_i32 : i32
    %12 = arith.extui %11 : i1 to i32
    %c0_i32_8 = arith.constant 0 : i32
    %13 = arith.cmpi ne, %12, %c0_i32_8 : i32
    scf.if %13 {
      %c0_9 = arith.constant 0 : index
      %c0_10 = arith.constant 0 : index
      %14 = vector.load %arg6[%c0_9, %c0_10] : memref<256x128xf32, #tpu.memory_space<vmem>>, vector<256x128xf32>
      %c0_11 = arith.constant 0 : index
      %c0_12 = arith.constant 0 : index
      %15 = vector.load %arg4[%c0_11, %c0_12] : memref<256x128xf32, #tpu.memory_space<vmem>>, vector<256x128xf32>
      %16 = arith.addf %14, %15 : vector<256x128xf32>
      %cst_13 = arith.constant 0.000000e+00 : f32
      %17 = vector.broadcast %cst_13 : f32 to vector<256x128xf32>
      %18 = arith.maximumf %16, %17 : vector<256x128xf32>
      %c0_14 = arith.constant 0 : index
      %c0_15 = arith.constant 0 : index
      %19 = vector.load %arg5[%c0_14, %c0_15] : memref<256x128xf32, #tpu.memory_space<vmem>>, vector<256x128xf32>
      tpu.vector_store %arg5[%c0_14, %c0_15], %18 {strides = array<i32>} : memref<256x128xf32, #tpu.memory_space<vmem>>, vector<256x128xf32>,
    } else {
    }
    return
  }
  func.func @transform_0(%arg0: i32, %arg1: i32) -> (i32, i32) {
    %c0_i32 = arith.constant 0 : i32
    return %arg0, %arg1 : i32, i32
  }
  func.func @transform_1(%arg0: i32, %arg1: i32) -> (i32, i32, i32) {
    %c0_i32 = arith.constant 0 : i32
    %c0_i32_0 = arith.constant 0 : i32
    %c0_i32_1 = arith.constant 0 : i32
    %c0_i32_2 = arith.constant 0 : i32
    return %c0_i32, %c0_i32_0, %c0_i32_1 : i32, i32, i32
  }
  func.func @transform_2(%arg0: i32, %arg1: i32) -> (i32, i32) {
    %c0_i32 = arith.constant 0 : i32
    %c0_i32_0 = arith.constant 0 : i32
    return %arg0, %c0_i32 : i32, i32
  }
  func.func @transform_3(%arg0: i32, %arg1: i32) -> (i32, i32) {
    %c0_i32 = arith.constant 0 : i32
    %c0_i32_0 = arith.constant 0 : i32
    return %arg0, %c0_i32 : i32, i32
  }
}

module attributes {stable_mosaic.version = 11 : i64} {
  func.func @_sage_aggr_kernel(%arg0: i32, %arg1: i32, %arg2: memref<256x512xf32, #tpu.memory_space<vmem>>, %arg3: memref<2x512x128xf32, #tpu.memory_space<vmem>>, %arg4: memref<256x128xf32, #tpu.memory_space<vmem>>, %arg5: memref<256x128xf32, #tpu.memory_space<vmem>>, %arg6: memref<256x128xf32, #tpu.memory_space<vmem>>) attributes {dimension_semantics = [#tpu.dimension_semantics<parallel>, #tpu.dimension_semantics<arbitrary>], iteration_bounds = array<i64: 4, 2>, scalar_prefetch = 0 : i64, scratch_operands = 1 : i64, tpu.core_type = #tpu.core_type<tc>, window_params = [{transform_indices = @transform_0, window_bounds = array<i64: 256, 512>}, {pipeline_mode = #tpu.pipeline_mode<synchronous>, transform_indices = @transform_1, window_bounds = array<i64: 2, 512, 128>}, {transform_indices = @transform_2, window_bounds = array<i64: 256, 128>}, {transform_indices = @transform_3, window_bounds = array<i64: 256, 128>}]} {
    %c0_i32 = arith.constant 0 : i32
    %0 = arith.cmpi eq, %arg1, %c0_i32 : i32
    %1 = arith.extui %0 : i1 to i32
    %c0_i32_0 = arith.constant 0 : i32
    %2 = arith.cmpi ne, %1, %c0_i32_0 : i32
    scf.if %2 {
      %cst_9 = arith.constant 0.000000e+00 : f32
      %14 = vector.broadcast %cst_9 : f32 to vector<256x128xf32>
      %c0_10 = arith.constant 0 : index
      %c0_11 = arith.constant 0 : index
      %15 = vector.load %arg6[%c0_10, %c0_11] : memref<256x128xf32, #tpu.memory_space<vmem>>, vector<256x128xf32>
      tpu.vector_store %arg6[%c0_10, %c0_11], %14 {strides = array<i32>} : memref<256x128xf32, #tpu.memory_space<vmem>>, vector<256x128xf32>,
    } else {
    }
    %c0 = arith.constant 0 : index
    %c0_1 = arith.constant 0 : index
    %3 = vector.load %arg6[%c0, %c0_1] : memref<256x128xf32, #tpu.memory_space<vmem>>, vector<256x128xf32>
    %c0_2 = arith.constant 0 : index
    %c0_3 = arith.constant 0 : index
    %4 = vector.load %arg2[%c0_2, %c0_3] : memref<256x512xf32, #tpu.memory_space<vmem>>, vector<256x512xf32>
    %5 = arith.index_cast %arg1 : i32 to index
    %c0_4 = arith.constant 0 : index
    %c0_5 = arith.constant 0 : index
    %6 = vector.load %arg3[%5, %c0_4, %c0_5] : memref<2x512x128xf32, #tpu.memory_space<vmem>>, vector<1x512x128xf32>
    %7 = vector.shape_cast %6 : vector<1x512x128xf32> to vector<512x128xf32>
    %cst = arith.constant dense<0.000000e+00> : vector<256x128xf32>
    %8 = tpu.matmul %4, %7, %cst {dimension_numbers = #tpu.dot_dimension_numbers<[1], [0], [0], [1], [0, 0, 1, 1], [], []>} : vector<256x512xf32>, vector<512x128xf32>, vector<256x128xf32> -> vector<256x128xf32>
    %9 = arith.addf %3, %8 : vector<256x128xf32>
    %c0_6 = arith.constant 0 : index
    %c0_7 = arith.constant 0 : index
    %10 = vector.load %arg6[%c0_6, %c0_7] : memref<256x128xf32, #tpu.memory_space<vmem>>, vector<256x128xf32>
    tpu.vector_store %arg6[%c0_6, %c0_7], %9 {strides = array<i32>} : memref<256x128xf32, #tpu.memory_space<vmem>>, vector<256x128xf32>,
    %c1_i32 = arith.constant 1 : i32
    %11 = arith.cmpi eq, %arg1, %c1_i32 : i32
    %12 = arith.extui %11 : i1 to i32
    %c0_i32_8 = arith.constant 0 : i32
    %13 = arith.cmpi ne, %12, %c0_i32_8 : i32
    scf.if %13 {
      %c0_9 = arith.constant 0 : index
      %c0_10 = arith.constant 0 : index
      %14 = vector.load %arg6[%c0_9, %c0_10] : memref<256x128xf32, #tpu.memory_space<vmem>>, vector<256x128xf32>
      %c0_11 = arith.constant 0 : index
      %c0_12 = arith.constant 0 : index
      %15 = vector.load %arg4[%c0_11, %c0_12] : memref<256x128xf32, #tpu.memory_space<vmem>>, vector<256x128xf32>
      %16 = arith.addf %14, %15 : vector<256x128xf32>
      %c0_13 = arith.constant 0 : index
      %c0_14 = arith.constant 0 : index
      %17 = vector.load %arg5[%c0_13, %c0_14] : memref<256x128xf32, #tpu.memory_space<vmem>>, vector<256x128xf32>
      tpu.vector_store %arg5[%c0_13, %c0_14], %16 {strides = array<i32>} : memref<256x128xf32, #tpu.memory_space<vmem>>, vector<256x128xf32>,
    } else {
    }
    return
  }
  func.func @transform_0(%arg0: i32, %arg1: i32) -> (i32, i32) {
    %c0_i32 = arith.constant 0 : i32
    return %arg0, %arg1 : i32, i32
  }
  func.func @transform_1(%arg0: i32, %arg1: i32) -> (i32, i32, i32) {
    %c0_i32 = arith.constant 0 : i32
    %c0_i32_0 = arith.constant 0 : i32
    %c0_i32_1 = arith.constant 0 : i32
    %c0_i32_2 = arith.constant 0 : i32
    return %c0_i32, %c0_i32_0, %c0_i32_1 : i32, i32, i32
  }
  func.func @transform_2(%arg0: i32, %arg1: i32) -> (i32, i32) {
    %c0_i32 = arith.constant 0 : i32
    %c0_i32_0 = arith.constant 0 : i32
    return %arg0, %c0_i32 : i32, i32
  }
  func.func @transform_3(%arg0: i32, %arg1: i32) -> (i32, i32) {
    %c0_i32 = arith.constant 0 : i32
    %c0_i32_0 = arith.constant 0 : i32
    return %arg0, %c0_i32 : i32, i32
  }
}

</mosaic_0001>

<bundles_post_ra>
// kernel: sage_forward.2
= control target key start
LH: loop header
LB: loop body
LE: loop exit
PB: predicated region body
PF: predicated region fallthrough
CT: control target
= control target key end

     0   :  { %s1771_s12 = smov 0   ;;  %s1773_s13 = smov 0   ;;  %s2424_s0 = inlined_call_operand.vmem [shape: f32[1024,1024], index: 0, kind: input, shape index: {}]   ;;  %s2425_s1 = inlined_call_operand.vmem [shape: f32[2,512,128], index: 1, kind: input, shape index: {}]   ;;  %s2426_s2 = inlined_call_operand.vmem [shape: f32[1024,128], index: 2, kind: input, shape index: {}]   ;;  %s2427_s3 = inlined_call_operand.vmem [shape: f32[1024,128], index: 3, kind: output, shape index: {}]  }
   0x1   :  { %s1775_s14 = smov 0   ;;  %s1777_s15 = smov 0  }
   0x2   :  { %s1779_s16 = smov 0   ;;  %s1781_s17 = smov 0  }
   0x3   :  { %s1783_s18 = smov 0  }
   0x4 LB: > { %s22_s19 = sadd.s32 1, %s1739_s16  ;;  %s25_s20 = sadd.s32 1, %s1743_s17  ;;  %s1747_s18 = sphi %s1783_s18, %s13_s18   ;;  %s1743_s17 = sphi %s1781_s17, %s2433_s17   ;;  %s1739_s16 = sphi %s1779_s16, %s2432_s16   ;;  %s1735_s15 = sphi %s1777_s15, %s2431_s15   ;;  %s1731_s14 = sphi %s1775_s14, %s2430_s14   ;;  %s1727_s13 = sphi %s1773_s13, %s2429_s13   ;;  %s1723_s12 = sphi %s1771_s12, %s2428_s12  }
   0x5   : > { %p23_p0 = scmp.ge.s32.totalorder %s22_s19, 2  ;;  %p41_p1 = scmp.ne.s32.totalorder %s1727_s13, %s1723_s12 }
   0x6   : > { %p42_p2 = scmp.eq.s32.totalorder %s1747_s18, 0  ;;  %s34_s24 = sadd.s32 1, %s1727_s13 }
   0x7   : > { %s2435_s19 = smov (%p23_p0, %s22_s19), 0  ;;  %s2437_s20 = smov (!%p23_p0, %s25_s20), %s1743_s17 }
   0x8   : > { %p43_p3 = por %p42_p2, %p41_p1  ;;  %p27_p4 = scmp.ge.s32.totalorder %s2437_s20, 4 }
   0x9   : > { %s30_s21 = ssub.s32 %s1739_s16, %s2435_s19  ;;  %p1521_p6 = scmp.ge.s32.totalorder %s1747_s18, 8 }
   0xa   : > { %s2439_s20 = smov (%p27_p4, %s2437_s20), 0 }
   0xb   : > { %s29_s22 = ssub.s32 %s1743_s17, %s2439_s20  ;;  %143 = sbr.rel (%p1521_p6) target bundleno = 89 (0x59), region = 20 }
   0xc   : > { %s31_s23 = sor.u32 %s30_s21, %s29_s22 }
   0xd   : > { %p32_p5 = scmp.eq.s32.totalorder %s31_s23, 0 }
   0xf   : > { %s1822_s25 = scalar_select %p32_p5, %s1727_s13, %s34_s24  }
  0x12   : > { %146 = sbr.rel (!%p43_p3) target bundleno = 89 (0x59), region = 24  ;;  %s148_s26 = sand.u32 (%p43_p3), 1, %s1727_s13  }
  0x13   : > { %s1524_s27 = sshll.u32 (%p43_p3), %s1739_s16, 2  ;;  %s1522_s28 = sshll.u32 (%p43_p3), %s148_s26, 10 }
  0x14   : > { %s1538_s29 = sshll.u32 (%p43_p3), %s1743_s17, 8  ;;  %s1836_s8 = scalar_lea.vmem (%p43_p3), [#allocation3], %s1522_s28 }
  0x15   : > { %s154_s30 = sadd.s32 (%p43_p3), %s1538_s29, %s1524_s27 }
  0x16   : > { %s1526_s4 = sshll.u32 (%p43_p3), %s154_s30, 3 }
  0x17   : > { %s1831_s7 = scalar_lea.vmem (%p43_p3), %s2424_s0, %s1526_s4 }
  0x18   : > { %v169_v0 = vld [vmem:[%s1831_s7] sm:$0xff] (%p43_p3)  ;;  %v171_v1 = vld [vmem:[%s1831_s7 + $0x8] sm:$0xff] (%p43_p3)  ;;  %v173_v2 = vld [vmem:[%s1831_s7 + $0x10] sm:$0xff] (%p43_p3) }
  0x19   : > { %170 = vst [vmem:[%s1836_s8] sm:$0xff] %v169_v0  ;;  %172 = vst [vmem:[%s1836_s8 + $0x8] sm:$0xff] %v171_v1  ;;  %v175_v3 = vld [vmem:[%s1831_s7 + $0x18] sm:$0xff]  ;;  %v177_v4 = vld [vmem:[%s1831_s7 + $0x40] sm:$0xff] }
  0x1a   : > { %174 = vst [vmem:[%s1836_s8 + $0x10] sm:$0xff] %v173_v2  ;;  %v179_v5 = vld [vmem:[%s1831_s7 + $0x48] sm:$0xff]  ;;  %176 = vst [vmem:[%s1836_s8 + $0x18] sm:$0xff] %v175_v3  ;;  %v181_v6 = vld [vmem:[%s1831_s7 + $0x50] sm:$0xff] }
  0x1b   : > { %178 = vst [vmem:[%s1836_s8 + $0x20] sm:$0xff] %v177_v4  ;;  %180 = vst [vmem:[%s1836_s8 + $0x28] sm:$0xff] %v179_v5  ;;  %v183_v7 = vld [vmem:[%s1831_s7 + $0x58] sm:$0xff]  ;;  %v185_v8 = vld [vmem:[%s1831_s7 + $0x80] sm:$0xff] }
  0x1c   : > { %182 = vst [vmem:[%s1836_s8 + $0x30] sm:$0xff] %v181_v6  ;;  %184 = vst [vmem:[%s1836_s8 + $0x38] sm:$0xff] %v183_v7  ;;  %v187_v9 = vld [vmem:[%s1831_s7 + $0x88] sm:$0xff]  ;;  %v189_v10 = vld [vmem:[%s1831_s7 + $0x90] sm:$0xff] }
  0x1d   : > { %186 = vst [vmem:[%s1836_s8 + $0x40] sm:$0xff] %v185_v8  ;;  %v191_v11 = vld [vmem:[%s1831_s7 + $0x98] sm:$0xff]  ;;  %188 = vst [vmem:[%s1836_s8 + $0x48] sm:$0xff] %v187_v9  ;;  %v193_v12 = vld [vmem:[%s1831_s7 + $0xc0] sm:$0xff] }
  0x1e   : > { %190 = vst [vmem:[%s1836_s8 + $0x50] sm:$0xff] %v189_v10  ;;  %192 = vst [vmem:[%s1836_s8 + $0x58] sm:$0xff] %v191_v11  ;;  %v195_v13 = vld [vmem:[%s1831_s7 + $0xc8] sm:$0xff]  ;;  %v197_v14 = vld [vmem:[%s1831_s7 + $0xd0] sm:$0xff] }
  0x1f   : > { %194 = vst [vmem:[%s1836_s8 + $0x60] sm:$0xff] %v193_v12  ;;  %196 = vst [vmem:[%s1836_s8 + $0x68] sm:$0xff] %v195_v13  ;;  %v199_v15 = vld [vmem:[%s1831_s7 + $0xd8] sm:$0xff]  ;;  %v201_v16 = vld [vmem:[%s1831_s7 + $0x100] sm:$0xff] }
  0x20   : > { %198 = vst [vmem:[%s1836_s8 + $0x70] sm:$0xff] %v197_v14  ;;  %v203_v17 = vld [vmem:[%s1831_s7 + $0x108] sm:$0xff]  ;;  %200 = vst [vmem:[%s1836_s8 + $0x78] sm:$0xff] %v199_v15  ;;  %v205_v18 = vld [vmem:[%s1831_s7 + $0x110] sm:$0xff] }
  0x21   : > { %202 = vst [vmem:[%s1836_s8 + $0x80] sm:$0xff] %v201_v16  ;;  %204 = vst [vmem:[%s1836_s8 + $0x88] sm:$0xff] %v203_v17  ;;  %v207_v19 = vld [vmem:[%s1831_s7 + $0x118] sm:$0xff]  ;;  %v209_v20 = vld [vmem:[%s1831_s7 + $0x140] sm:$0xff] }
  0x22   : > { %206 = vst [vmem:[%s1836_s8 + $0x90] sm:$0xff] %v205_v18  ;;  %208 = vst [vmem:[%s1836_s8 + $0x98] sm:$0xff] %v207_v19  ;;  %v211_v21 = vld [vmem:[%s1831_s7 + $0x148] sm:$0xff]  ;;  %v213_v22 = vld [vmem:[%s1831_s7 + $0x150] sm:$0xff] }
  0x23   : > { %210 = vst [vmem:[%s1836_s8 + $0xa0] sm:$0xff] %v209_v20  ;;  %v215_v23 = vld [vmem:[%s1831_s7 + $0x158] sm:$0xff]  ;;  %212 = vst [vmem:[%s1836_s8 + $0xa8] sm:$0xff] %v211_v21  ;;  %v217_v24 = vld [vmem:[%s1831_s7 + $0x180] sm:$0xff] }
  0x24   : > { %214 = vst [vmem:[%s1836_s8 + $0xb0] sm:$0xff] %v213_v22  ;;  %216 = vst [vmem:[%s1836_s8 + $0xb8] sm:$0xff] %v215_v23  ;;  %v219_v25 = vld [vmem:[%s1831_s7 + $0x188] sm:$0xff]  ;;  %v221_v26 = vld [vmem:[%s1831_s7 + $0x190] sm:$0xff] }
  0x25   : > { %218 = vst [vmem:[%s1836_s8 + $0xc0] sm:$0xff] %v217_v24  ;;  %220 = vst [vmem:[%s1836_s8 + $0xc8] sm:$0xff] %v219_v25  ;;  %v223_v27 = vld [vmem:[%s1831_s7 + $0x198] sm:$0xff]  ;;  %v225_v28 = vld [vmem:[%s1831_s7 + $0x1c0] sm:$0xff] }
  0x26   : > { %222 = vst [vmem:[%s1836_s8 + $0xd0] sm:$0xff] %v221_v26  ;;  %v227_v29 = vld [vmem:[%s1831_s7 + $0x1c8] sm:$0xff]  ;;  %224 = vst [vmem:[%s1836_s8 + $0xd8] sm:$0xff] %v223_v27  ;;  %v229_v30 = vld [vmem:[%s1831_s7 + $0x1d0] sm:$0xff] }
  0x27   : > { %226 = vst [vmem:[%s1836_s8 + $0xe0] sm:$0xff] %v225_v28  ;;  %228 = vst [vmem:[%s1836_s8 + $0xe8] sm:$0xff] %v227_v29  ;;  %v231_v31 = vld [vmem:[%s1831_s7 + $0x1d8] sm:$0xff]  ;;  %v233_v32 = vld [vmem:[%s1831_s7 + $0x200] sm:$0xff] }
  0x28   : > { %230 = vst [vmem:[%s1836_s8 + $0xf0] sm:$0xff] %v229_v30  ;;  %232 = vst [vmem:[%s1836_s8 + $0xf8] sm:$0xff] %v231_v31  ;;  %v235_v33 = vld [vmem:[%s1831_s7 + $0x208] sm:$0xff]  ;;  %v237_v34 = vld [vmem:[%s1831_s7 + $0x210] sm:$0xff] }
  0x29   : > { %234 = vst [vmem:[%s1836_s8 + $0x100] sm:$0xff] %v233_v32  ;;  %v239_v35 = vld [vmem:[%s1831_s7 + $0x218] sm:$0xff]  ;;  %236 = vst [vmem:[%s1836_s8 + $0x108] sm:$0xff] %v235_v33  ;;  %v241_v36 = vld [vmem:[%s1831_s7 + $0x240] sm:$0xff] }
  0x2a   : > { %238 = vst [vmem:[%s1836_s8 + $0x110] sm:$0xff] %v237_v34  ;;  %240 = vst [vmem:[%s1836_s8 + $0x118] sm:$0xff] %v239_v35  ;;  %v243_v37 = vld [vmem:[%s1831_s7 + $0x248] sm:$0xff]  ;;  %v245_v38 = vld [vmem:[%s1831_s7 + $0x250] sm:$0xff] }
  0x2b   : > { %242 = vst [vmem:[%s1836_s8 + $0x120] sm:$0xff] %v241_v36  ;;  %244 = vst [vmem:[%s1836_s8 + $0x128] sm:$0xff] %v243_v37  ;;  %v247_v39 = vld [vmem:[%s1831_s7 + $0x258] sm:$0xff]  ;;  %v249_v40 = vld [vmem:[%s1831_s7 + $0x280] sm:$0xff] }
  0x2c   : > { %246 = vst [vmem:[%s1836_s8 + $0x130] sm:$0xff] %v245_v38  ;;  %v251_v41 = vld [vmem:[%s1831_s7 + $0x288] sm:$0xff]  ;;  %248 = vst [vmem:[%s1836_s8 + $0x138] sm:$0xff] %v247_v39  ;;  %v253_v42 = vld [vmem:[%s1831_s7 + $0x290] sm:$0xff] }
  0x2d   : > { %250 = vst [vmem:[%s1836_s8 + $0x140] sm:$0xff] %v249_v40  ;;  %252 = vst [vmem:[%s1836_s8 + $0x148] sm:$0xff] %v251_v41  ;;  %v255_v43 = vld [vmem:[%s1831_s7 + $0x298] sm:$0xff]  ;;  %v257_v44 = vld [vmem:[%s1831_s7 + $0x2c0] sm:$0xff] }
  0x2e   : > { %254 = vst [vmem:[%s1836_s8 + $0x150] sm:$0xff] %v253_v42  ;;  %256 = vst [vmem:[%s1836_s8 + $0x158] sm:$0xff] %v255_v43  ;;  %v259_v45 = vld [vmem:[%s1831_s7 + $0x2c8] sm:$0xff]  ;;  %v261_v46 = vld [vmem:[%s1831_s7 + $0x2d0] sm:$0xff] }
  0x2f   : > { %258 = vst [vmem:[%s1836_s8 + $0x160] sm:$0xff] %v257_v44  ;;  %v263_v47 = vld [vmem:[%s1831_s7 + $0x2d8] sm:$0xff]  ;;  %260 = vst [vmem:[%s1836_s8 + $0x168] sm:$0xff] %v259_v45  ;;  %v265_v48 = vld [vmem:[%s1831_s7 + $0x300] sm:$0xff] }
  0x30   : > { %262 = vst [vmem:[%s1836_s8 + $0x170] sm:$0xff] %v261_v46  ;;  %264 = vst [vmem:[%s1836_s8 + $0x178] sm:$0xff] %v263_v47  ;;  %v267_v49 = vld [vmem:[%s1831_s7 + $0x308] sm:$0xff]  ;;  %v269_v50 = vld [vmem:[%s1831_s7 + $0x310] sm:$0xff] }
  0x31   : > { %266 = vst [vmem:[%s1836_s8 + $0x180] sm:$0xff] %v265_v48  ;;  %268 = vst [vmem:[%s1836_s8 + $0x188] sm:$0xff] %v267_v49  ;;  %v271_v51 = vld [vmem:[%s1831_s7 + $0x318] sm:$0xff]  ;;  %v273_v52 = vld [vmem:[%s1831_s7 + $0x340] sm:$0xff] }
  0x32   : > { %270 = vst [vmem:[%s1836_s8 + $0x190] sm:$0xff] %v269_v50  ;;  %v275_v53 = vld [vmem:[%s1831_s7 + $0x348] sm:$0xff]  ;;  %272 = vst [vmem:[%s1836_s8 + $0x198] sm:$0xff] %v271_v51  ;;  %v277_v54 = vld [vmem:[%s1831_s7 + $0x350] sm:$0xff] }
  0x33   : > { %274 = vst [vmem:[%s1836_s8 + $0x1a0] sm:$0xff] %v273_v52  ;;  %276 = vst [vmem:[%s1836_s8 + $0x1a8] sm:$0xff] %v275_v53  ;;  %v279_v55 = vld [vmem:[%s1831_s7 + $0x358] sm:$0xff]  ;;  %v281_v56 = vld [vmem:[%s1831_s7 + $0x380] sm:$0xff] }
  0x34   : > { %278 = vst [vmem:[%s1836_s8 + $0x1b0] sm:$0xff] %v277_v54  ;;  %280 = vst [vmem:[%s1836_s8 + $0x1b8] sm:$0xff] %v279_v55  ;;  %v283_v57 = vld [vmem:[%s1831_s7 + $0x388] sm:$0xff]  ;;  %v285_v58 = vld [vmem:[%s1831_s7 + $0x390] sm:$0xff] }
  0x35   : > { %282 = vst [vmem:[%s1836_s8 + $0x1c0] sm:$0xff] %v281_v56  ;;  %v287_v59 = vld [vmem:[%s1831_s7 + $0x398] sm:$0xff]  ;;  %284 = vst [vmem:[%s1836_s8 + $0x1c8] sm:$0xff] %v283_v57  ;;  %v289_v60 = vld [vmem:[%s1831_s7 + $0x3c0] sm:$0xff] }
  0x36   : > { %286 = vst [vmem:[%s1836_s8 + $0x1d0] sm:$0xff] %v285_v58  ;;  %288 = vst [vmem:[%s1836_s8 + $0x1d8] sm:$0xff] %v287_v59  ;;  %v291_v61 = vld [vmem:[%s1831_s7 + $0x3c8] sm:$0xff]  ;;  %v293_v62 = vld [vmem:[%s1831_s7 + $0x3d0] sm:$0xff] }
  0x37   : > { %290 = vst [vmem:[%s1836_s8 + $0x1e0] sm:$0xff] %v289_v60  ;;  %292 = vst [vmem:[%s1836_s8 + $0x1e8] sm:$0xff] %v291_v61  ;;  %v295_v63 = vld [vmem:[%s1831_s7 + $0x3d8] sm:$0xff]  ;;  %v297_v0 = vld [vmem:[%s1831_s7 + $0x400] sm:$0xff] }
  0x38   : > { %294 = vst [vmem:[%s1836_s8 + $0x1f0] sm:$0xff] %v293_v62  ;;  %v299_v1 = vld [vmem:[%s1831_s7 + $0x408] sm:$0xff]  ;;  %296 = vst [vmem:[%s1836_s8 + $0x1f8] sm:$0xff] %v295_v63  ;;  %v301_v2 = vld [vmem:[%s1831_s7 + $0x410] sm:$0xff] }
  0x39   : > { %298 = vst [vmem:[%s1836_s8 + $0x200] sm:$0xff] %v297_v0  ;;  %300 = vst [vmem:[%s1836_s8 + $0x208] sm:$0xff] %v299_v1  ;;  %v303_v3 = vld [vmem:[%s1831_s7 + $0x418] sm:$0xff]  ;;  %v305_v4 = vld [vmem:[%s1831_s7 + $0x440] sm:$0xff] }
  0x3a   : > { %302 = vst [vmem:[%s1836_s8 + $0x210] sm:$0xff] %v301_v2  ;;  %304 = vst [vmem:[%s1836_s8 + $0x218] sm:$0xff] %v303_v3  ;;  %v307_v5 = vld [vmem:[%s1831_s7 + $0x448] sm:$0xff]  ;;  %v309_v6 = vld [vmem:[%s1831_s7 + $0x450] sm:$0xff] }
  0x3b   : > { %306 = vst [vmem:[%s1836_s8 + $0x220] sm:$0xff] %v305_v4  ;;  %v311_v7 = vld [vmem:[%s1831_s7 + $0x458] sm:$0xff]  ;;  %308 = vst [vmem:[%s1836_s8 + $0x228] sm:$0xff] %v307_v5  ;;  %v313_v8 = vld [vmem:[%s1831_s7 + $0x480] sm:$0xff] }
  0x3c   : > { %310 = vst [vmem:[%s1836_s8 + $0x230] sm:$0xff] %v309_v6  ;;  %312 = vst [vmem:[%s1836_s8 + $0x238] sm:$0xff] %v311_v7  ;;  %v315_v9 = vld [vmem:[%s1831_s7 + $0x488] sm:$0xff]  ;;  %v317_v10 = vld [vmem:[%s1831_s7 + $0x490] sm:$0xff] }
  0x3d   : > { %314 = vst [vmem:[%s1836_s8 + $0x240] sm:$0xff] %v313_v8  ;;  %316 = vst [vmem:[%s1836_s8 + $0x248] sm:$0xff] %v315_v9  ;;  %v319_v11 = vld [vmem:[%s1831_s7 + $0x498] sm:$0xff]  ;;  %v321_v12 = vld [vmem:[%s1831_s7 + $0x4c0] sm:$0xff] }
  0x3e   : > { %318 = vst [vmem:[%s1836_s8 + $0x250] sm:$0xff] %v317_v10  ;;  %v323_v13 = vld [vmem:[%s1831_s7 + $0x4c8] sm:$0xff]  ;;  %320 = vst [vmem:[%s1836_s8 + $0x258] sm:$0xff] %v319_v11  ;;  %v325_v14 = vld [vmem:[%s1831_s7 + $0x4d0] sm:$0xff] }
  0x3f   : > { %322 = vst [vmem:[%s1836_s8 + $0x260] sm:$0xff] %v321_v12  ;;  %324 = vst [vmem:[%s1836_s8 + $0x268] sm:$0xff] %v323_v13  ;;  %v327_v15 = vld [vmem:[%s1831_s7 + $0x4d8] sm:$0xff]  ;;  %v329_v16 = vld [vmem:[%s1831_s7 + $0x500] sm:$0xff] }
  0x40   : > { %326 = vst [vmem:[%s1836_s8 + $0x270] sm:$0xff] %v325_v14  ;;  %328 = vst [vmem:[%s1836_s8 + $0x278] sm:$0xff] %v327_v15  ;;  %v331_v17 = vld [vmem:[%s1831_s7 + $0x508] sm:$0xff]  ;;  %v333_v18 = vld [vmem:[%s1831_s7 + $0x510] sm:$0xff] }
  0x41   : > { %330 = vst [vmem:[%s1836_s8 + $0x280] sm:$0xff] %v329_v16  ;;  %v335_v19 = vld [vmem:[%s1831_s7 + $0x518] sm:$0xff]  ;;  %332 = vst [vmem:[%s1836_s8 + $0x288] sm:$0xff] %v331_v17  ;;  %v337_v20 = vld [vmem:[%s1831_s7 + $0x540] sm:$0xff] }
  0x42   : > { %334 = vst [vmem:[%s1836_s8 + $0x290] sm:$0xff] %v333_v18  ;;  %336 = vst [vmem:[%s1836_s8 + $0x298] sm:$0xff] %v335_v19  ;;  %v339_v21 = vld [vmem:[%s1831_s7 + $0x548] sm:$0xff]  ;;  %v341_v22 = vld [vmem:[%s1831_s7 + $0x550] sm:$0xff] }
  0x43   : > { %338 = vst [vmem:[%s1836_s8 + $0x2a0] sm:$0xff] %v337_v20  ;;  %340 = vst [vmem:[%s1836_s8 + $0x2a8] sm:$0xff] %v339_v21  ;;  %v343_v23 = vld [vmem:[%s1831_s7 + $0x558] sm:$0xff]  ;;  %v345_v24 = vld [vmem:[%s1831_s7 + $0x580] sm:$0xff] }
  0x44   : > { %342 = vst [vmem:[%s1836_s8 + $0x2b0] sm:$0xff] %v341_v22  ;;  %v347_v25 = vld [vmem:[%s1831_s7 + $0x588] sm:$0xff]  ;;  %344 = vst [vmem:[%s1836_s8 + $0x2b8] sm:$0xff] %v343_v23  ;;  %v349_v26 = vld [vmem:[%s1831_s7 + $0x590] sm:$0xff] }
  0x45   : > { %346 = vst [vmem:[%s1836_s8 + $0x2c0] sm:$0xff] %v345_v24  ;;  %348 = vst [vmem:[%s1836_s8 + $0x2c8] sm:$0xff] %v347_v25  ;;  %v351_v27 = vld [vmem:[%s1831_s7 + $0x598] sm:$0xff]  ;;  %v353_v28 = vld [vmem:[%s1831_s7 + $0x5c0] sm:$0xff] }
  0x46   : > { %350 = vst [vmem:[%s1836_s8 + $0x2d0] sm:$0xff] %v349_v26  ;;  %352 = vst [vmem:[%s1836_s8 + $0x2d8] sm:$0xff] %v351_v27  ;;  %v355_v29 = vld [vmem:[%s1831_s7 + $0x5c8] sm:$0xff]  ;;  %v357_v30 = vld [vmem:[%s1831_s7 + $0x5d0] sm:$0xff] }
  0x47   : > { %354 = vst [vmem:[%s1836_s8 + $0x2e0] sm:$0xff] %v353_v28  ;;  %v359_v31 = vld [vmem:[%s1831_s7 + $0x5d8] sm:$0xff]  ;;  %356 = vst [vmem:[%s1836_s8 + $0x2e8] sm:$0xff] %v355_v29  ;;  %v361_v32 = vld [vmem:[%s1831_s7 + $0x600] sm:$0xff] }
  0x48   : > { %358 = vst [vmem:[%s1836_s8 + $0x2f0] sm:$0xff] %v357_v30  ;;  %360 = vst [vmem:[%s1836_s8 + $0x2f8] sm:$0xff] %v359_v31  ;;  %v363_v33 = vld [vmem:[%s1831_s7 + $0x608] sm:$0xff]  ;;  %v365_v34 = vld [vmem:[%s1831_s7 + $0x610] sm:$0xff] }
  0x49   : > { %362 = vst [vmem:[%s1836_s8 + $0x300] sm:$0xff] %v361_v32  ;;  %364 = vst [vmem:[%s1836_s8 + $0x308] sm:$0xff] %v363_v33  ;;  %v367_v35 = vld [vmem:[%s1831_s7 + $0x618] sm:$0xff]  ;;  %v369_v36 = vld [vmem:[%s1831_s7 + $0x640] sm:$0xff] }
  0x4a   : > { %366 = vst [vmem:[%s1836_s8 + $0x310] sm:$0xff] %v365_v34  ;;  %v371_v37 = vld [vmem:[%s1831_s7 + $0x648] sm:$0xff]  ;;  %368 = vst [vmem:[%s1836_s8 + $0x318] sm:$0xff] %v367_v35  ;;  %v373_v38 = vld [vmem:[%s1831_s7 + $0x650] sm:$0xff] }
  0x4b   : > { %370 = vst [vmem:[%s1836_s8 + $0x320] sm:$0xff] %v369_v36  ;;  %372 = vst [vmem:[%s1836_s8 + $0x328] sm:$0xff] %v371_v37  ;;  %v375_v39 = vld [vmem:[%s1831_s7 + $0x658] sm:$0xff]  ;;  %v377_v40 = vld [vmem:[%s1831_s7 + $0x680] sm:$0xff] }
  0x4c   : > { %374 = vst [vmem:[%s1836_s8 + $0x330] sm:$0xff] %v373_v38  ;;  %376 = vst [vmem:[%s1836_s8 + $0x338] sm:$0xff] %v375_v39  ;;  %v379_v41 = vld [vmem:[%s1831_s7 + $0x688] sm:$0xff]  ;;  %v381_v42 = vld [vmem:[%s1831_s7 + $0x690] sm:$0xff] }
  0x4d   : > { %378 = vst [vmem:[%s1836_s8 + $0x340] sm:$0xff] %v377_v40  ;;  %v383_v43 = vld [vmem:[%s1831_s7 + $0x698] sm:$0xff]  ;;  %380 = vst [vmem:[%s1836_s8 + $0x348] sm:$0xff] %v379_v41  ;;  %v385_v44 = vld [vmem:[%s1831_s7 + $0x6c0] sm:$0xff] }
  0x4e   : > { %382 = vst [vmem:[%s1836_s8 + $0x350] sm:$0xff] %v381_v42  ;;  %384 = vst [vmem:[%s1836_s8 + $0x358] sm:$0xff] %v383_v43  ;;  %v387_v45 = vld [vmem:[%s1831_s7 + $0x6c8] sm:$0xff]  ;;  %v389_v46 = vld [vmem:[%s1831_s7 + $0x6d0] sm:$0xff] }
  0x4f   : > { %386 = vst [vmem:[%s1836_s8 + $0x360] sm:$0xff] %v385_v44  ;;  %388 = vst [vmem:[%s1836_s8 + $0x368] sm:$0xff] %v387_v45  ;;  %v391_v47 = vld [vmem:[%s1831_s7 + $0x6d8] sm:$0xff]  ;;  %v393_v48 = vld [vmem:[%s1831_s7 + $0x700] sm:$0xff] }
  0x50   : > { %390 = vst [vmem:[%s1836_s8 + $0x370] sm:$0xff] %v389_v46  ;;  %v395_v49 = vld [vmem:[%s1831_s7 + $0x708] sm:$0xff]  ;;  %392 = vst [vmem:[%s1836_s8 + $0x378] sm:$0xff] %v391_v47  ;;  %v397_v50 = vld [vmem:[%s1831_s7 + $0x710] sm:$0xff] }
  0x51   : > { %394 = vst [vmem:[%s1836_s8 + $0x380] sm:$0xff] %v393_v48  ;;  %396 = vst [vmem:[%s1836_s8 + $0x388] sm:$0xff] %v395_v49  ;;  %v399_v51 = vld [vmem:[%s1831_s7 + $0x718] sm:$0xff]  ;;  %v401_v52 = vld [vmem:[%s1831_s7 + $0x740] sm:$0xff] }
  0x52   : > { %398 = vst [vmem:[%s1836_s8 + $0x390] sm:$0xff] %v397_v50  ;;  %400 = vst [vmem:[%s1836_s8 + $0x398] sm:$0xff] %v399_v51  ;;  %v403_v53 = vld [vmem:[%s1831_s7 + $0x748] sm:$0xff]  ;;  %v405_v54 = vld [vmem:[%s1831_s7 + $0x750] sm:$0xff] }
  0x53   : > { %402 = vst [vmem:[%s1836_s8 + $0x3a0] sm:$0xff] %v401_v52  ;;  %v407_v55 = vld [vmem:[%s1831_s7 + $0x758] sm:$0xff]  ;;  %404 = vst [vmem:[%s1836_s8 + $0x3a8] sm:$0xff] %v403_v53  ;;  %v409_v56 = vld [vmem:[%s1831_s7 + $0x780] sm:$0xff] }
  0x54   : > { %406 = vst [vmem:[%s1836_s8 + $0x3b0] sm:$0xff] %v405_v54  ;;  %408 = vst [vmem:[%s1836_s8 + $0x3b8] sm:$0xff] %v407_v55  ;;  %v411_v57 = vld [vmem:[%s1831_s7 + $0x788] sm:$0xff]  ;;  %v413_v58 = vld [vmem:[%s1831_s7 + $0x790] sm:$0xff] }
  0x55   : > { %410 = vst [vmem:[%s1836_s8 + $0x3c0] sm:$0xff] %v409_v56  ;;  %412 = vst [vmem:[%s1836_s8 + $0x3c8] sm:$0xff] %v411_v57  ;;  %v415_v59 = vld [vmem:[%s1831_s7 + $0x798] sm:$0xff]  ;;  %v417_v60 = vld [vmem:[%s1831_s7 + $0x7c0] sm:$0xff] }
  0x56   : > { %414 = vst [vmem:[%s1836_s8 + $0x3d0] sm:$0xff] %v413_v58  ;;  %v419_v61 = vld [vmem:[%s1831_s7 + $0x7c8] sm:$0xff]  ;;  %416 = vst [vmem:[%s1836_s8 + $0x3d8] sm:$0xff] %v415_v59  ;;  %v421_v62 = vld [vmem:[%s1831_s7 + $0x7d0] sm:$0xff] }
  0x57   : > { %418 = vst [vmem:[%s1836_s8 + $0x3e0] sm:$0xff] %v417_v60  ;;  %420 = vst [vmem:[%s1836_s8 + $0x3e8] sm:$0xff] %v419_v61  ;;  %v423_v63 = vld [vmem:[%s1831_s7 + $0x7d8] sm:$0xff] }
  0x58   : > { %422 = vst [vmem:[%s1836_s8 + $0x3f0] sm:$0xff] %v421_v62  ;;  %424 = vst [vmem:[%s1836_s8 + $0x3f8] sm:$0xff] %v423_v63 }
  0x59 PF: > { %p1527_p7 = scmp.ge.s32.totalorder %s1747_s18, 1  ;;  %p438_p8 = scmp.lt.s32.totalorder %s1747_s18, 9 }
  0x5b   : > { %p439_p9 = pnand %p1527_p7, %p438_p8 }
  0x5c   : > { %s445_s9 = sand.u32 (!%p439_p9), 1, %s1723_s12   ;;  %s1529_s10 = sshll.u32 (!%p439_p9), %s1735_s15, 5 }
  0x5d   : > { %442 = sbr.rel (%p439_p9) target bundleno = 540 (0x21c), region = 51  ;;  %s1528_s11 = sshll.u32 (!%p439_p9), %s445_s9, 10 }
  0x5e   : > { %p476_p10 = scmp.lt.s32.totalorder (!%p439_p9), %s1529_s10, 127  ;;  %s2105_s29 = scalar_lea.vmem (!%p439_p9), [#allocation3], %s1528_s11 }
  0x5f   : > { %p1533_p11 = scmp.ne.s32.totalorder (!%p439_p9), %s1731_s14, 0 }
  0x64   : > { %s2441_s10 = smov (!%p476_p10, %s1529_s10), 127  ;;  %490 = sbr.rel (%p1533_p11) target bundleno = 118 (0x76), region = 59 }
  0x65   : > { %s1530_s21 = sshll.u32 %s2441_s10, 3  ;;  %v1749_v0 = vmov (!%p1533_p11), 0.0  }
  0x66   : > { %s2098_s24 = scalar_lea.vmem %s2426_s2, %s1530_s21  ;;  %s2103_s28 = scalar_lea.vmem %s2427_s3, %s1530_s21  ;;  %491 = vst [vmem:[#allocation2] sm:$0xff] (!%p1533_p11), %v1749_v0  ;;  %492 = vst [vmem:[#allocation2 + $0x8] sm:$0xff] (!%p1533_p11), %v1749_v0 }
  0x67   : > { %493 = vst [vmem:[#allocation2 + $0x10] sm:$0xff] (!%p1533_p11), %v1749_v0  ;;  %494 = vst [vmem:[#allocation2 + $0x18] sm:$0xff] (!%p1533_p11), %v1749_v0 }
  0x68   : > { %495 = vst [vmem:[#allocation2 + $0x20] sm:$0xff] (!%p1533_p11), %v1749_v0  ;;  %496 = vst [vmem:[#allocation2 + $0x28] sm:$0xff] (!%p1533_p11), %v1749_v0 }
  0x69   : > { %497 = vst [vmem:[#allocation2 + $0x30] sm:$0xff] (!%p1533_p11), %v1749_v0  ;;  %498 = vst [vmem:[#allocation2 + $0x38] sm:$0xff] (!%p1533_p11), %v1749_v0 }
  0x6a   : > { %499 = vst [vmem:[#allocation2 + $0x40] sm:$0xff] (!%p1533_p11), %v1749_v0  ;;  %500 = vst [vmem:[#allocation2 + $0x48] sm:$0xff] (!%p1533_p11), %v1749_v0 }
  0x6b   : > { %501 = vst [vmem:[#allocation2 + $0x50] sm:$0xff] %v1749_v0  ;;  %502 = vst [vmem:[#allocation2 + $0x58] sm:$0xff] %v1749_v0 }
  0x6c   : > { %503 = vst [vmem:[#allocation2 + $0x60] sm:$0xff] %v1749_v0  ;;  %504 = vst [vmem:[#allocation2 + $0x68] sm:$0xff] %v1749_v0 }
  0x6d   : > { %505 = vst [vmem:[#allocation2 + $0x70] sm:$0xff] %v1749_v0  ;;  %506 = vst [vmem:[#allocation2 + $0x78] sm:$0xff] %v1749_v0 }
  0x6e   : > { %507 = vst [vmem:[#allocation2 + $0x80] sm:$0xff] %v1749_v0  ;;  %508 = vst [vmem:[#allocation2 + $0x88] sm:$0xff] %v1749_v0 }
  0x6f   : > { %509 = vst [vmem:[#allocation2 + $0x90] sm:$0xff] %v1749_v0  ;;  %510 = vst [vmem:[#allocation2 + $0x98] sm:$0xff] %v1749_v0 }
  0x70   : > { %511 = vst [vmem:[#allocation2 + $0xa0] sm:$0xff] %v1749_v0  ;;  %512 = vst [vmem:[#allocation2 + $0xa8] sm:$0xff] %v1749_v0 }
  0x71   : > { %513 = vst [vmem:[#allocation2 + $0xb0] sm:$0xff] %v1749_v0  ;;  %514 = vst [vmem:[#allocation2 + $0xb8] sm:$0xff] %v1749_v0 }
  0x72   : > { %515 = vst [vmem:[#allocation2 + $0xc0] sm:$0xff] %v1749_v0  ;;  %516 = vst [vmem:[#allocation2 + $0xc8] sm:$0xff] %v1749_v0 }
  0x73   : > { %517 = vst [vmem:[#allocation2 + $0xd0] sm:$0xff] %v1749_v0  ;;  %518 = vst [vmem:[#allocation2 + $0xd8] sm:$0xff] %v1749_v0 }
  0x74   : > { %519 = vst [vmem:[#allocation2 + $0xe0] sm:$0xff] %v1749_v0  ;;  %520 = vst [vmem:[#allocation2 + $0xe8] sm:$0xff] %v1749_v0 }
  0x75   : > { %521 = vst [vmem:[#allocation2 + $0xf0] sm:$0xff] %v1749_v0  ;;  %522 = vst [vmem:[#allocation2 + $0xf8] sm:$0xff] %v1749_v0 }
  0x76 PF: > { %s1534_s12 = sshll.u32 %s1731_s14, 9  ;;  %v556_v1 = vld [vmem:[%s2105_s29 + $0x8] sm:$0xff]  ;;  %v558_v2 = vld [vmem:[%s2105_s29 + $0x18] sm:$0xff]  ;;  %v1750_v3 = vmov 0.0|0.0   ;;  %p1535_p12 = scmp.ne.s32.totalorder %s1731_s14, 1 }
  0x77   : > { %1539 = vmatprep.subr.bf16.mxu0 %v1750_v3  ;;  %1587 = vmatprep.subr.bf16.mxu1 %v1750_v3  ;;  %s2116_s4 = scalar_lea.vmem %s2425_s1, %s1534_s12 }
  0x78   : > { %v685_v4 = vld [vmem:[%s2116_s4] sm:$0xff]  ;;  %v686_v5 = vld [vmem:[%s2116_s4 + $0x8] sm:$0xff]  ;;  %813 = vmatprep.mubr.f32.mxu0 %v556_v1  ;;  %1038 = vmatprep.mubr.f32.mxu1 %v558_v2  ;;  %v687_v9 = vld [vmem:[%s2116_s4 + $0x10] sm:$0xff] }
  0x79   : > { %v717_v6 = vld [vmem:[%s2116_s4 + $0x100] sm:$0xff]  ;;  %v1540_v7 = vpack.c.bf16 %v686_v5, %v685_v4  ;;  %v718_v8 = vld [vmem:[%s2116_s4 + $0x108] sm:$0xff]  ;;  %v688_v10 = vld [vmem:[%s2116_s4 + $0x18] sm:$0xff] }
  0x7a   : > { %v1588_v11 = vpack.c.bf16 %v718_v8, %v717_v6  ;;  %v719_v12 = vld [vmem:[%s2116_s4 + $0x110] sm:$0xff]  ;;  %v720_v13 = vld [vmem:[%s2116_s4 + $0x118] sm:$0xff]  ;;  %v1543_v14 = vpack.c.bf16 %v688_v10, %v687_v9  ;;  %v689_v16 = vld [vmem:[%s2116_s4 + $0x20] sm:$0xff] }
  0x7b   : > { %1541 = vmatpush1.bf16.msra.mxu0 %v1540_v7  ;;  %v1591_v15 = vpack.c.bf16 %v720_v13, %v719_v12  ;;  %v690_v17 = vld [vmem:[%s2116_s4 + $0x28] sm:$0xff]  ;;  %v721_v18 = vld [vmem:[%s2116_s4 + $0x120] sm:$0xff]  ;;  %v691_v22 = vld [vmem:[%s2116_s4 + $0x30] sm:$0xff] }
  0x7c   : > { %1589 = vmatpush1.bf16.msra.mxu1 %v1588_v11  ;;  %1542 = vmatprep.subr.bf16.mxu0 %v1750_v3  ;;  %v722_v19 = vld [vmem:[%s2116_s4 + $0x128] sm:$0xff]  ;;  %v1546_v20 = vpack.c.bf16 %v690_v17, %v689_v16  ;;  %v692_v23 = vld [vmem:[%s2116_s4 + $0x38] sm:$0xff]  ;;  %v723_v24 = vld [vmem:[%s2116_s4 + $0x130] sm:$0xff] }
  0x7d   : > { %1590 = vmatprep.subr.bf16.mxu1 %v1750_v3  ;;  %v1594_v21 = vpack.c.bf16 %v722_v19, %v721_v18  ;;  %v724_v25 = vld [vmem:[%s2116_s4 + $0x138] sm:$0xff]  ;;  %v1549_v26 = vpack.c.bf16 %v692_v23, %v691_v22  ;;  %v693_v28 = vld [vmem:[%s2116_s4 + $0x40] sm:$0xff]  ;;  %v694_v29 = vld [vmem:[%s2116_s4 + $0x48] sm:$0xff] }
  0x7e   : > { %v1597_v27 = vpack.c.bf16 %v724_v25, %v723_v24  ;;  %v725_v30 = vld [vmem:[%s2116_s4 + $0x140] sm:$0xff]  ;;  %v726_v31 = vld [vmem:[%s2116_s4 + $0x148] sm:$0xff]  ;;  %v1552_v32 = vpack.c.bf16 %v694_v29, %v693_v28  ;;  %v695_v34 = vld [vmem:[%s2116_s4 + $0x50] sm:$0xff] }
  0x7f   : > { %1544 = vmatpush1.bf16.msra.mxu0 %v1543_v14  ;;  %v1600_v33 = vpack.c.bf16 %v726_v31, %v725_v30  ;;  %v696_v35 = vld [vmem:[%s2116_s4 + $0x58] sm:$0xff]  ;;  %v727_v36 = vld [vmem:[%s2116_s4 + $0x150] sm:$0xff]  ;;  %v697_v40 = vld [vmem:[%s2116_s4 + $0x60] sm:$0xff] }
  0x80   : > { %1592 = vmatpush1.bf16.msra.mxu1 %v1591_v15  ;;  %1545 = vmatprep.subr.bf16.mxu0 %v1750_v3  ;;  %v728_v37 = vld [vmem:[%s2116_s4 + $0x158] sm:$0xff]  ;;  %v1555_v38 = vpack.c.bf16 %v696_v35, %v695_v34  ;;  %v698_v41 = vld [vmem:[%s2116_s4 + $0x68] sm:$0xff]  ;;  %v729_v42 = vld [vmem:[%s2116_s4 + $0x160] sm:$0xff] }
  0x81   : > { %1593 = vmatprep.subr.bf16.mxu1 %v1750_v3  ;;  %v1603_v39 = vpack.c.bf16 %v728_v37, %v727_v36  ;;  %v730_v43 = vld [vmem:[%s2116_s4 + $0x168] sm:$0xff]  ;;  %v1558_v44 = vpack.c.bf16 %v698_v41, %v697_v40  ;;  %v699_v46 = vld [vmem:[%s2116_s4 + $0x70] sm:$0xff]  ;;  %v700_v47 = vld [vmem:[%s2116_s4 + $0x78] sm:$0xff] }
  0x82   : > { %v1606_v45 = vpack.c.bf16 %v730_v43, %v729_v42  ;;  %v731_v48 = vld [vmem:[%s2116_s4 + $0x170] sm:$0xff]  ;;  %v732_v49 = vld [vmem:[%s2116_s4 + $0x178] sm:$0xff]  ;;  %v1561_v50 = vpack.c.bf16 %v700_v47, %v699_v46  ;;  %v701_v52 = vld [vmem:[%s2116_s4 + $0x80] sm:$0xff] }
  0x83   : > { %1547 = vmatpush1.bf16.msra.mxu0 %v1546_v20  ;;  %v1609_v51 = vpack.c.bf16 %v732_v49, %v731_v48  ;;  %v702_v53 = vld [vmem:[%s2116_s4 + $0x88] sm:$0xff]  ;;  %v733_v54 = vld [vmem:[%s2116_s4 + $0x180] sm:$0xff]  ;;  %v703_v58 = vld [vmem:[%s2116_s4 + $0x90] sm:$0xff] }
  0x84   : > { %1595 = vmatpush1.bf16.msra.mxu1 %v1594_v21  ;;  %1548 = vmatprep.subr.bf16.mxu0 %v1750_v3  ;;  %v734_v55 = vld [vmem:[%s2116_s4 + $0x188] sm:$0xff]  ;;  %v1564_v56 = vpack.c.bf16 %v702_v53, %v701_v52  ;;  %v704_v59 = vld [vmem:[%s2116_s4 + $0x98] sm:$0xff]  ;;  %v735_v60 = vld [vmem:[%s2116_s4 + $0x190] sm:$0xff] }
  0x85   : > { %1596 = vmatprep.subr.bf16.mxu1 %v1750_v3  ;;  %v1612_v57 = vpack.c.bf16 %v734_v55, %v733_v54  ;;  %v736_v61 = vld [vmem:[%s2116_s4 + $0x198] sm:$0xff]  ;;  %v1567_v62 = vpack.c.bf16 %v704_v59, %v703_v58  ;;  %v705_v0 = vld [vmem:[%s2116_s4 + $0xa0] sm:$0xff]  ;;  %v706_v1 = vld [vmem:[%s2116_s4 + $0xa8] sm:$0xff] }
  0x86   : > { %v1615_v63 = vpack.c.bf16 %v736_v61, %v735_v60  ;;  %v737_v2 = vld [vmem:[%s2116_s4 + $0x1a0] sm:$0xff]  ;;  %v738_v4 = vld [vmem:[%s2116_s4 + $0x1a8] sm:$0xff]  ;;  %v1570_v5 = vpack.c.bf16 %v706_v1, %v705_v0  ;;  %v707_v7 = vld [vmem:[%s2116_s4 + $0xb0] sm:$0xff] }
  0x87   : > { %1550 = vmatpush1.bf16.msra.mxu0 %v1549_v26  ;;  %v1618_v6 = vpack.c.bf16 %v738_v4, %v737_v2  ;;  %v708_v8 = vld [vmem:[%s2116_s4 + $0xb8] sm:$0xff]  ;;  %v739_v9 = vld [vmem:[%s2116_s4 + $0x1b0] sm:$0xff]  ;;  %v709_v13 = vld [vmem:[%s2116_s4 + $0xc0] sm:$0xff] }
  0x88   : > { %1598 = vmatpush1.bf16.msra.mxu1 %v1597_v27  ;;  %1551 = vmatprep.subr.bf16.mxu0 %v1750_v3  ;;  %v740_v10 = vld [vmem:[%s2116_s4 + $0x1b8] sm:$0xff]  ;;  %v1573_v11 = vpack.c.bf16 %v708_v8, %v707_v7  ;;  %v710_v14 = vld [vmem:[%s2116_s4 + $0xc8] sm:$0xff]  ;;  %v741_v15 = vld [vmem:[%s2116_s4 + $0x1c0] sm:$0xff] }
  0x89   : > { %1599 = vmatprep.subr.bf16.mxu1 %v1750_v3  ;;  %v1621_v12 = vpack.c.bf16 %v740_v10, %v739_v9  ;;  %v742_v16 = vld [vmem:[%s2116_s4 + $0x1c8] sm:$0xff]  ;;  %v1576_v17 = vpack.c.bf16 %v710_v14, %v709_v13  ;;  %v711_v19 = vld [vmem:[%s2116_s4 + $0xd0] sm:$0xff]  ;;  %v712_v20 = vld [vmem:[%s2116_s4 + $0xd8] sm:$0xff] }
  0x8a   : > { %v1624_v18 = vpack.c.bf16 %v742_v16, %v741_v15  ;;  %v743_v21 = vld [vmem:[%s2116_s4 + $0x1d0] sm:$0xff]  ;;  %v744_v22 = vld [vmem:[%s2116_s4 + $0x1d8] sm:$0xff]  ;;  %v1579_v23 = vpack.c.bf16 %v712_v20, %v711_v19  ;;  %v713_v25 = vld [vmem:[%s2116_s4 + $0xe0] sm:$0xff] }
  0x8b   : > { %1553 = vmatpush1.bf16.msra.mxu0 %v1552_v32  ;;  %v1627_v24 = vpack.c.bf16 %v744_v22, %v743_v21  ;;  %v714_v26 = vld [vmem:[%s2116_s4 + $0xe8] sm:$0xff]  ;;  %v745_v27 = vld [vmem:[%s2116_s4 + $0x1e0] sm:$0xff]  ;;  %v715_v31 = vld [vmem:[%s2116_s4 + $0xf0] sm:$0xff] }
  0x8c   : > { %1601 = vmatpush1.bf16.msra.mxu1 %v1600_v33  ;;  %1554 = vmatprep.subr.bf16.mxu0 %v1750_v3  ;;  %v746_v28 = vld [vmem:[%s2116_s4 + $0x1e8] sm:$0xff]  ;;  %v1582_v29 = vpack.c.bf16 %v714_v26, %v713_v25  ;;  %v716_v32 = vld [vmem:[%s2116_s4 + $0xf8] sm:$0xff]  ;;  %v747_v33 = vld [vmem:[%s2116_s4 + $0x1f0] sm:$0xff] }
  0x8d   : > { %1602 = vmatprep.subr.bf16.mxu1 %v1750_v3  ;;  %v1630_v30 = vpack.c.bf16 %v746_v28, %v745_v27  ;;  %v748_v34 = vld [vmem:[%s2116_s4 + $0x1f8] sm:$0xff]  ;;  %v1585_v35 = vpack.c.bf16 %v716_v32, %v715_v31  ;;  %v555_v37 = vld [vmem:[%s2105_s29] sm:$0xff]  ;;  %v561_v42 = vld [vmem:[%s2105_s29 + $0x30] sm:$0xff] }
  0x8e   : > { %v1633_v36 = vpack.c.bf16 %v748_v34, %v747_v33  ;;  %v562_v40 = vld [vmem:[%s2105_s29 + $0x38] sm:$0xff]  ;;  %v559_v41 = vld [vmem:[%s2105_s29 + $0x20] sm:$0xff]  ;;  %v564_v43 = vld [vmem:[%s2105_s29 + $0x48] sm:$0xff] }
  0x8f   : > { %1556 = vmatpush1.bf16.msra.mxu0 %v1555_v38  ;;  %v557_v38 = vld [vmem:[%s2105_s29 + $0x10] sm:$0xff]  ;;  %v568_v46 = vld [vmem:[%s2105_s29 + $0x68] sm:$0xff]  ;;  %v570_v47 = vld [vmem:[%s2105_s29 + $0x78] sm:$0xff] }
  0x90   : > { %1604 = vmatpush1.bf16.msra.mxu1 %v1603_v39  ;;  %1557 = vmatprep.subr.bf16.mxu0 %v1750_v3  ;;  %v560_v39 = vld [vmem:[%s2105_s29 + $0x28] sm:$0xff]  ;;  %v567_v48 = vld [vmem:[%s2105_s29 + $0x60] sm:$0xff]  ;;  %v569_v49 = vld [vmem:[%s2105_s29 + $0x70] sm:$0xff] }
  0x91   : > { %1605 = vmatprep.subr.bf16.mxu1 %v1750_v3  ;;  %v571_v52 = vld [vmem:[%s2105_s29 + $0x80] sm:$0xff]  ;;  %v573_v53 = vld [vmem:[%s2105_s29 + $0x90] sm:$0xff]  ;;  %v576_v54 = vld [vmem:[%s2105_s29 + $0xa8] sm:$0xff] }
  0x92   : > { %v578_v55 = vld [vmem:[%s2105_s29 + $0xb8] sm:$0xff]  ;;  %v580_v58 = vld [vmem:[%s2105_s29 + $0xc8] sm:$0xff]  ;;  %v579_v60 = vld [vmem:[%s2105_s29 + $0xc0] sm:$0xff] }
  0x93   : > { %1559 = vmatpush1.bf16.msra.mxu0 %v1558_v44  ;;  %v563_v44 = vld [vmem:[%s2105_s29 + $0x40] sm:$0xff]  ;;  %v582_v59 = vld [vmem:[%s2105_s29 + $0xd8] sm:$0xff]  ;;  %v581_v61 = vld [vmem:[%s2105_s29 + $0xd0] sm:$0xff] }
  0x94   : > { %1607 = vmatpush1.bf16.msra.mxu1 %v1606_v45  ;;  %1560 = vmatprep.subr.bf16.mxu0 %v1750_v3  ;;  %v565_v45 = vld [vmem:[%s2105_s29 + $0x50] sm:$0xff]  ;;  %v583_v0 = vld [vmem:[%s2105_s29 + $0xe0] sm:$0xff]  ;;  %v588_v2 = vld [vmem:[%s2105_s29 + $0x108] sm:$0xff] }
  0x95   : > { %1608 = vmatprep.subr.bf16.mxu1 %v1750_v3  ;;  %v585_v1 = vld [vmem:[%s2105_s29 + $0xf0] sm:$0xff]  ;;  %v590_v4 = vld [vmem:[%s2105_s29 + $0x118] sm:$0xff]  ;;  %v592_v7 = vld [vmem:[%s2105_s29 + $0x128] sm:$0xff] }
  0x96   : > { %v594_v8 = vld [vmem:[%s2105_s29 + $0x138] sm:$0xff]  ;;  %v591_v9 = vld [vmem:[%s2105_s29 + $0x120] sm:$0xff]  ;;  %v593_v10 = vld [vmem:[%s2105_s29 + $0x130] sm:$0xff] }
  0x97   : > { %1562 = vmatpush1.bf16.msra.mxu0 %v1561_v50  ;;  %v572_v50 = vld [vmem:[%s2105_s29 + $0x88] sm:$0xff]  ;;  %v595_v13 = vld [vmem:[%s2105_s29 + $0x140] sm:$0xff]  ;;  %v597_v14 = vld [vmem:[%s2105_s29 + $0x150] sm:$0xff] }
  0x98   : > { %1610 = vmatpush1.bf16.msra.mxu1 %v1609_v51  ;;  %1563 = vmatprep.subr.bf16.mxu0 %v1750_v3  ;;  %v574_v51 = vld [vmem:[%s2105_s29 + $0x98] sm:$0xff]  ;;  %v600_v15 = vld [vmem:[%s2105_s29 + $0x168] sm:$0xff]  ;;  %v603_v21 = vld [vmem:[%s2105_s29 + $0x180] sm:$0xff] }
  0x99   : > { %1611 = vmatprep.subr.bf16.mxu1 %v1750_v3  ;;  %v602_v16 = vld [vmem:[%s2105_s29 + $0x178] sm:$0xff]  ;;  %v604_v19 = vld [vmem:[%s2105_s29 + $0x188] sm:$0xff]  ;;  %v605_v22 = vld [vmem:[%s2105_s29 + $0x190] sm:$0xff] }
  0x9a   : > { %v606_v20 = vld [vmem:[%s2105_s29 + $0x198] sm:$0xff]  ;;  %v607_v25 = vld [vmem:[%s2105_s29 + $0x1a0] sm:$0xff]  ;;  %v609_v26 = vld [vmem:[%s2105_s29 + $0x1b0] sm:$0xff] }
  0x9b   : > { %1565 = vmatpush1.bf16.msra.mxu0 %v1564_v56  ;;  %v575_v56 = vld [vmem:[%s2105_s29 + $0xa0] sm:$0xff]  ;;  %v612_v27 = vld [vmem:[%s2105_s29 + $0x1c8] sm:$0xff]  ;;  %v614_v28 = vld [vmem:[%s2105_s29 + $0x1d8] sm:$0xff] }
  0x9c   : > { %1613 = vmatpush1.bf16.msra.mxu1 %v1612_v57  ;;  %1566 = vmatprep.subr.bf16.mxu0 %v1750_v3  ;;  %v577_v57 = vld [vmem:[%s2105_s29 + $0xb0] sm:$0xff]  ;;  %v616_v31 = vld [vmem:[%s2105_s29 + $0x1e8] sm:$0xff]  ;;  %v618_v32 = vld [vmem:[%s2105_s29 + $0x1f8] sm:$0xff] }
  0x9d   : > { %1614 = vmatprep.subr.bf16.mxu1 %v1750_v3  ;;  %v615_v33 = vld [vmem:[%s2105_s29 + $0x1e0] sm:$0xff]  ;;  %v617_v34 = vld [vmem:[%s2105_s29 + $0x1f0] sm:$0xff] }
  0x9f   : > { %1568 = vmatpush1.bf16.msra.mxu0 %v1567_v62  ;;  %v584_v62 = vld [vmem:[%s2105_s29 + $0xe8] sm:$0xff] }
  0xa0   : > { %1616 = vmatpush1.bf16.msra.mxu1 %v1615_v63  ;;  %1569 = vmatprep.subr.bf16.mxu0 %v1750_v3  ;;  %v586_v63 = vld [vmem:[%s2105_s29 + $0xf8] sm:$0xff] }
  0xa1   : > { %1617 = vmatprep.subr.bf16.mxu1 %v1750_v3 }
  0xa3   : > { %1571 = vmatpush1.bf16.msra.mxu0 %v1570_v5  ;;  %v587_v5 = vld [vmem:[%s2105_s29 + $0x100] sm:$0xff] }
  0xa4   : > { %1619 = vmatpush1.bf16.msra.mxu1 %v1618_v6  ;;  %1572 = vmatprep.subr.bf16.mxu0 %v1750_v3  ;;  %v589_v6 = vld [vmem:[%s2105_s29 + $0x110] sm:$0xff] }
  0xa5   : > { %1620 = vmatprep.subr.bf16.mxu1 %v1750_v3 }
  0xa7   : > { %1574 = vmatpush1.bf16.msra.mxu0 %v1573_v11  ;;  %v596_v11 = vld [vmem:[%s2105_s29 + $0x148] sm:$0xff] }
  0xa8   : > { %1622 = vmatpush1.bf16.msra.mxu1 %v1621_v12  ;;  %1575 = vmatprep.subr.bf16.mxu0 %v1750_v3  ;;  %v598_v12 = vld [vmem:[%s2105_s29 + $0x158] sm:$0xff] }
  0xa9   : > { %1623 = vmatprep.subr.bf16.mxu1 %v1750_v3 }
  0xab   : > { %1577 = vmatpush1.bf16.msra.mxu0 %v1576_v17  ;;  %v599_v17 = vld [vmem:[%s2105_s29 + $0x160] sm:$0xff] }
  0xac   : > { %1625 = vmatpush1.bf16.msra.mxu1 %v1624_v18  ;;  %1578 = vmatprep.subr.bf16.mxu0 %v1750_v3  ;;  %v601_v18 = vld [vmem:[%s2105_s29 + $0x170] sm:$0xff] }
  0xad   : > { %1626 = vmatprep.subr.bf16.mxu1 %v1750_v3 }
  0xaf   : > { %1580 = vmatpush1.bf16.msra.mxu0 %v1579_v23  ;;  %v608_v23 = vld [vmem:[%s2105_s29 + $0x1a8] sm:$0xff] }
  0xb0   : > { %1628 = vmatpush1.bf16.msra.mxu1 %v1627_v24  ;;  %1581 = vmatprep.subr.bf16.mxu0 %v1750_v3  ;;  %v610_v24 = vld [vmem:[%s2105_s29 + $0x1b8] sm:$0xff] }
  0xb1   : > { %1629 = vmatprep.subr.bf16.mxu1 %v1750_v3 }
  0xb3   : > { %1583 = vmatpush1.bf16.msra.mxu0 %v1582_v29  ;;  %v611_v29 = vld [vmem:[%s2105_s29 + $0x1c0] sm:$0xff] }
  0xb4   : > { %1631 = vmatpush1.bf16.msra.mxu1 %v1630_v30  ;;  %1584 = vmatprep.subr.bf16.mxu0 %v1750_v3  ;;  %v613_v30 = vld [vmem:[%s2105_s29 + $0x1d0] sm:$0xff] }
  0xb5   : > { %1632 = vmatprep.subr.bf16.mxu1 %v1750_v3  ;;  %v566_v3 = vld [vmem:[%s2105_s29 + $0x58] sm:$0xff] }
  0xb7   : > { %1586 = vmatpush1.bf16.msra.mxu0 %v1585_v35  ;;  %v620_v35 = vld [vmem:[%s2105_s29 + $0x208] sm:$0xff] }
  0xb8   : > { %1634 = vmatpush1.bf16.msra.mxu1 %v1633_v36  ;;  %v622_v36 = vld [vmem:[%s2105_s29 + $0x218] sm:$0xff] }
  0xba   : > { %814 = vmatmul.mubr.f32.vlgmr.msra.gmra.mrb[0].mxu0 %v555_v37  ;;  %v619_v37 = vld [vmem:[%s2105_s29 + $0x200] sm:$0xff] }
  0xbb   : > { %1039 = vmatmul.mubr.f32.vlgmr.msra.gmra.mrb[0].mxu1 %v557_v38  ;;  %818 = vmatprep.mubr.f32.mxu0 %v560_v39  ;;  %v621_v38 = vld [vmem:[%s2105_s29 + $0x210] sm:$0xff]  ;;  %v624_v39 = vld [vmem:[%s2105_s29 + $0x228] sm:$0xff] }
  0xbc   : > { %1043 = vmatprep.mubr.f32.mxu1 %v562_v40  ;;  %v626_v40 = vld [vmem:[%s2105_s29 + $0x238] sm:$0xff] }
  0xbe   : > { %819 = vmatmul.mubr.f32.gmra.mrb[2].mxu0 %v559_v41  ;;  %v623_v41 = vld [vmem:[%s2105_s29 + $0x220] sm:$0xff] }
  0xbf   : > { %1044 = vmatmul.mubr.f32.gmra.mrb[2].mxu1 %v561_v42  ;;  %823 = vmatprep.mubr.f32.mxu0 %v564_v43  ;;  %v625_v42 = vld [vmem:[%s2105_s29 + $0x230] sm:$0xff]  ;;  %v628_v43 = vld [vmem:[%s2105_s29 + $0x248] sm:$0xff] }
  0xc0   : > { %1048 = vmatprep.mubr.f32.mxu1 %v566_v3  ;;  %v630_v3 = vld [vmem:[%s2105_s29 + $0x258] sm:$0xff] }
  0xc2   : > { %824 = vmatmul.mubr.f32.gmra.mrb[4].mxu0 %v563_v44  ;;  %v627_v44 = vld [vmem:[%s2105_s29 + $0x240] sm:$0xff] }
  0xc3   : > { %1049 = vmatmul.mubr.f32.gmra.mrb[4].mxu1 %v565_v45  ;;  %828 = vmatprep.mubr.f32.mxu0 %v568_v46  ;;  %v629_v45 = vld [vmem:[%s2105_s29 + $0x250] sm:$0xff]  ;;  %v632_v46 = vld [vmem:[%s2105_s29 + $0x268] sm:$0xff] }
  0xc4   : > { %1053 = vmatprep.mubr.f32.mxu1 %v570_v47  ;;  %v634_v47 = vld [vmem:[%s2105_s29 + $0x278] sm:$0xff] }
  0xc6   : > { %829 = vmatmul.mubr.f32.gmra.mrb[6].mxu0 %v567_v48  ;;  %v631_v48 = vld [vmem:[%s2105_s29 + $0x260] sm:$0xff] }
  0xc7   : > { %1054 = vmatmul.mubr.f32.gmra.mrb[6].mxu1 %v569_v49  ;;  %833 = vmatprep.mubr.f32.mxu0 %v572_v50  ;;  %v633_v49 = vld [vmem:[%s2105_s29 + $0x270] sm:$0xff]  ;;  %v636_v50 = vld [vmem:[%s2105_s29 + $0x288] sm:$0xff] }
  0xc8   : > { %1058 = vmatprep.mubr.f32.mxu1 %v574_v51  ;;  %v638_v51 = vld [vmem:[%s2105_s29 + $0x298] sm:$0xff] }
  0xca   : > { %834 = vmatmul.mubr.f32.gmra.mrb[8].mxu0 %v571_v52  ;;  %v635_v52 = vld [vmem:[%s2105_s29 + $0x280] sm:$0xff] }
  0xcb   : > { %1059 = vmatmul.mubr.f32.gmra.mrb[8].mxu1 %v573_v53  ;;  %838 = vmatprep.mubr.f32.mxu0 %v576_v54  ;;  %v637_v53 = vld [vmem:[%s2105_s29 + $0x290] sm:$0xff]  ;;  %v640_v54 = vld [vmem:[%s2105_s29 + $0x2a8] sm:$0xff] }
  0xcc   : > { %1063 = vmatprep.mubr.f32.mxu1 %v578_v55  ;;  %v642_v55 = vld [vmem:[%s2105_s29 + $0x2b8] sm:$0xff] }
  0xce   : > { %839 = vmatmul.mubr.f32.gmra.mrb[10].mxu0 %v575_v56  ;;  %v639_v56 = vld [vmem:[%s2105_s29 + $0x2a0] sm:$0xff] }
  0xcf   : > { %1064 = vmatmul.mubr.f32.gmra.mrb[10].mxu1 %v577_v57  ;;  %843 = vmatprep.mubr.f32.mxu0 %v580_v58  ;;  %v641_v57 = vld [vmem:[%s2105_s29 + $0x2b0] sm:$0xff]  ;;  %v644_v58 = vld [vmem:[%s2105_s29 + $0x2c8] sm:$0xff] }
  0xd0   : > { %1068 = vmatprep.mubr.f32.mxu1 %v582_v59  ;;  %v646_v59 = vld [vmem:[%s2105_s29 + $0x2d8] sm:$0xff] }
  0xd2   : > { %844 = vmatmul.mubr.f32.gmra.mrb[12].mxu0 %v579_v60  ;;  %v643_v60 = vld [vmem:[%s2105_s29 + $0x2c0] sm:$0xff] }
  0xd3   : > { %1069 = vmatmul.mubr.f32.gmra.mrb[12].mxu1 %v581_v61  ;;  %848 = vmatprep.mubr.f32.mxu0 %v584_v62  ;;  %v645_v61 = vld [vmem:[%s2105_s29 + $0x2d0] sm:$0xff]  ;;  %v648_v62 = vld [vmem:[%s2105_s29 + $0x2e8] sm:$0xff] }
  0xd4   : > { %1073 = vmatprep.mubr.f32.mxu1 %v586_v63  ;;  %v650_v63 = vld [vmem:[%s2105_s29 + $0x2f8] sm:$0xff] }
  0xd6   : > { %849 = vmatmul.mubr.f32.gmra.mrb[14].mxu0 %v583_v0  ;;  %v647_v0 = vld [vmem:[%s2105_s29 + $0x2e0] sm:$0xff] }
  0xd7   : > { %1074 = vmatmul.mubr.f32.gmra.mrb[14].mxu1 %v585_v1  ;;  %853 = vmatprep.mubr.f32.mxu0 %v588_v2  ;;  %v649_v1 = vld [vmem:[%s2105_s29 + $0x2f0] sm:$0xff]  ;;  %v652_v2 = vld [vmem:[%s2105_s29 + $0x308] sm:$0xff] }
  0xd8   : > { %1078 = vmatprep.mubr.f32.mxu1 %v590_v4  ;;  %v654_v4 = vld [vmem:[%s2105_s29 + $0x318] sm:$0xff] }
  0xda   : > { %854 = vmatmul.mubr.f32.gmra.mrb[16].mxu0 %v587_v5  ;;  %v651_v5 = vld [vmem:[%s2105_s29 + $0x300] sm:$0xff] }
  0xdb   : > { %1079 = vmatmul.mubr.f32.gmra.mrb[16].mxu1 %v589_v6  ;;  %858 = vmatprep.mubr.f32.mxu0 %v592_v7  ;;  %v653_v6 = vld [vmem:[%s2105_s29 + $0x310] sm:$0xff]  ;;  %v656_v7 = vld [vmem:[%s2105_s29 + $0x328] sm:$0xff] }
  0xdc   : > { %1083 = vmatprep.mubr.f32.mxu1 %v594_v8  ;;  %v658_v8 = vld [vmem:[%s2105_s29 + $0x338] sm:$0xff] }
  0xde   : > { %859 = vmatmul.mubr.f32.gmra.mrb[18].mxu0 %v591_v9  ;;  %v655_v9 = vld [vmem:[%s2105_s29 + $0x320] sm:$0xff] }
  0xdf   : > { %1084 = vmatmul.mubr.f32.gmra.mrb[18].mxu1 %v593_v10  ;;  %863 = vmatprep.mubr.f32.mxu0 %v596_v11  ;;  %v657_v10 = vld [vmem:[%s2105_s29 + $0x330] sm:$0xff]  ;;  %v660_v11 = vld [vmem:[%s2105_s29 + $0x348] sm:$0xff] }
  0xe0   : > { %1088 = vmatprep.mubr.f32.mxu1 %v598_v12  ;;  %v662_v12 = vld [vmem:[%s2105_s29 + $0x358] sm:$0xff] }
  0xe2   : > { %864 = vmatmul.mubr.f32.gmra.mrb[20].mxu0 %v595_v13  ;;  %v659_v13 = vld [vmem:[%s2105_s29 + $0x340] sm:$0xff] }
  0xe3   : > { %1089 = vmatmul.mubr.f32.gmra.mrb[20].mxu1 %v597_v14  ;;  %868 = vmatprep.mubr.f32.mxu0 %v600_v15  ;;  %v661_v14 = vld [vmem:[%s2105_s29 + $0x350] sm:$0xff]  ;;  %v664_v15 = vld [vmem:[%s2105_s29 + $0x368] sm:$0xff] }
  0xe4   : > { %1093 = vmatprep.mubr.f32.mxu1 %v602_v16  ;;  %v666_v16 = vld [vmem:[%s2105_s29 + $0x378] sm:$0xff] }
  0xe6   : > { %869 = vmatmul.mubr.f32.gmra.mrb[22].mxu0 %v599_v17  ;;  %v663_v17 = vld [vmem:[%s2105_s29 + $0x360] sm:$0xff] }
  0xe7   : > { %1094 = vmatmul.mubr.f32.gmra.mrb[22].mxu1 %v601_v18  ;;  %873 = vmatprep.mubr.f32.mxu0 %v604_v19  ;;  %v665_v18 = vld [vmem:[%s2105_s29 + $0x370] sm:$0xff]  ;;  %v668_v19 = vld [vmem:[%s2105_s29 + $0x388] sm:$0xff] }
  0xe8   : > { %1098 = vmatprep.mubr.f32.mxu1 %v606_v20  ;;  %v670_v20 = vld [vmem:[%s2105_s29 + $0x398] sm:$0xff] }
  0xea   : > { %874 = vmatmul.mubr.f32.gmra.mrb[24].mxu0 %v603_v21  ;;  %v667_v21 = vld [vmem:[%s2105_s29 + $0x380] sm:$0xff] }
  0xeb   : > { %1099 = vmatmul.mubr.f32.gmra.mrb[24].mxu1 %v605_v22  ;;  %878 = vmatprep.mubr.f32.mxu0 %v608_v23  ;;  %v669_v22 = vld [vmem:[%s2105_s29 + $0x390] sm:$0xff]  ;;  %v672_v23 = vld [vmem:[%s2105_s29 + $0x3a8] sm:$0xff] }
  0xec   : > { %1103 = vmatprep.mubr.f32.mxu1 %v610_v24  ;;  %v674_v24 = vld [vmem:[%s2105_s29 + $0x3b8] sm:$0xff] }
  0xee   : > { %879 = vmatmul.mubr.f32.gmra.mrb[26].mxu0 %v607_v25  ;;  %v671_v25 = vld [vmem:[%s2105_s29 + $0x3a0] sm:$0xff] }
  0xef   : > { %1104 = vmatmul.mubr.f32.gmra.mrb[26].mxu1 %v609_v26  ;;  %883 = vmatprep.mubr.f32.mxu0 %v612_v27  ;;  %v673_v26 = vld [vmem:[%s2105_s29 + $0x3b0] sm:$0xff]  ;;  %v676_v27 = vld [vmem:[%s2105_s29 + $0x3c8] sm:$0xff] }
  0xf0   : > { %1108 = vmatprep.mubr.f32.mxu1 %v614_v28  ;;  %v678_v28 = vld [vmem:[%s2105_s29 + $0x3d8] sm:$0xff] }
  0xf2   : > { %884 = vmatmul.mubr.f32.gmra.mrb[28].mxu0 %v611_v29  ;;  %v675_v29 = vld [vmem:[%s2105_s29 + $0x3c0] sm:$0xff] }
  0xf3   : > { %1109 = vmatmul.mubr.f32.gmra.mrb[28].mxu1 %v613_v30  ;;  %888 = vmatprep.mubr.f32.mxu0 %v616_v31  ;;  %v677_v30 = vld [vmem:[%s2105_s29 + $0x3d0] sm:$0xff]  ;;  %v680_v31 = vld [vmem:[%s2105_s29 + $0x3e8] sm:$0xff] }
  0xf4   : > { %1113 = vmatprep.mubr.f32.mxu1 %v618_v32  ;;  %v682_v32 = vld [vmem:[%s2105_s29 + $0x3f8] sm:$0xff] }
  0xf6   : > { %889 = vmatmul.mubr.f32.gmra.mrb[30].mxu0 %v615_v33  ;;  %v679_v33 = vld [vmem:[%s2105_s29 + $0x3e0] sm:$0xff] }
  0xf7   : > { %1114 = vmatmul.mubr.f32.gmra.mrb[30].mxu1 %v617_v34  ;;  %893 = vmatprep.mubr.f32.mxu0 %v620_v35  ;;  %v681_v34 = vld [vmem:[%s2105_s29 + $0x3f0] sm:$0xff] }
  0xf8   : > { %1118 = vmatprep.mubr.f32.mxu1 %v622_v36  ;;  %v523_v36 = vld [vmem:[#allocation2] sm:$0xff] }
  0xfa   : > { %894 = vmatmul.mubr.f32.gmra.mrb[32].mxu0 %v619_v37 }
  0xfb   : > { %1119 = vmatmul.mubr.f32.gmra.mrb[32].mxu1 %v621_v38  ;;  %898 = vmatprep.mubr.f32.mxu0 %v624_v39 }
  0xfc   : > { %1123 = vmatprep.mubr.f32.mxu1 %v626_v40 }
  0xfe   : > { %899 = vmatmul.mubr.f32.gmra.mrb[34].mxu0 %v623_v41 }
  0xff   : > { %1124 = vmatmul.mubr.f32.gmra.mrb[34].mxu1 %v625_v42  ;;  %903 = vmatprep.mubr.f32.mxu0 %v628_v43  ;;  %v524_v43 = vld [vmem:[#allocation2 + $0x8] sm:$0xff] }
 0x100   : > { %1128 = vmatprep.mubr.f32.mxu1 %v630_v3 }
 0x102   : > { %904 = vmatmul.mubr.f32.gmra.mrb[36].mxu0 %v627_v44 }
 0x103   : > { %1129 = vmatmul.mubr.f32.gmra.mrb[36].mxu1 %v629_v45  ;;  %908 = vmatprep.mubr.f32.mxu0 %v632_v46 }
 0x104   : > { %1133 = vmatprep.mubr.f32.mxu1 %v634_v47 }
 0x106   : > { %909 = vmatmul.mubr.f32.gmra.mrb[38].mxu0 %v631_v48 }
 0x107   : > { %1134 = vmatmul.mubr.f32.gmra.mrb[38].mxu1 %v633_v49  ;;  %913 = vmatprep.mubr.f32.mxu0 %v636_v50  ;;  %v525_v49 = vld [vmem:[#allocation2 + $0x10] sm:$0xff] }
 0x108   : > { %1138 = vmatprep.mubr.f32.mxu1 %v638_v51 }
 0x10a   : > { %914 = vmatmul.mubr.f32.gmra.mrb[40].mxu0 %v635_v52 }
 0x10b   : > { %1139 = vmatmul.mubr.f32.gmra.mrb[40].mxu1 %v637_v53  ;;  %918 = vmatprep.mubr.f32.mxu0 %v640_v54 }
 0x10c   : > { %1143 = vmatprep.mubr.f32.mxu1 %v642_v55 }
 0x10e   : > { %919 = vmatmul.mubr.f32.gmra.mrb[42].mxu0 %v639_v56  ;;  %v526_v56 = vld [vmem:[#allocation2 + $0x18] sm:$0xff] }
 0x10f   : > { %1144 = vmatmul.mubr.f32.gmra.mrb[42].mxu1 %v641_v57  ;;  %923 = vmatprep.mubr.f32.mxu0 %v644_v58 }
 0x110   : > { %1148 = vmatprep.mubr.f32.mxu1 %v646_v59 }
 0x112   : > { %924 = vmatmul.mubr.f32.gmra.mrb[44].mxu0 %v643_v60 }
 0x113   : > { %1149 = vmatmul.mubr.f32.gmra.mrb[44].mxu1 %v645_v61  ;;  %928 = vmatprep.mubr.f32.mxu0 %v648_v62 }
 0x114   : > { %1153 = vmatprep.mubr.f32.mxu1 %v650_v63  ;;  %v527_v63 = vld [vmem:[#allocation2 + $0x20] sm:$0xff] }
 0x116   : > { %929 = vmatmul.mubr.f32.gmra.mrb[46].mxu0 %v647_v0 }
 0x117   : > { %1154 = vmatmul.mubr.f32.gmra.mrb[46].mxu1 %v649_v1  ;;  %933 = vmatprep.mubr.f32.mxu0 %v652_v2 }
 0x118   : > { %1158 = vmatprep.mubr.f32.mxu1 %v654_v4 }
 0x11a   : > { %934 = vmatmul.mubr.f32.gmra.mrb[48].mxu0 %v651_v5 }
 0x11b   : > { %1159 = vmatmul.mubr.f32.gmra.mrb[48].mxu1 %v653_v6  ;;  %938 = vmatprep.mubr.f32.mxu0 %v656_v7  ;;  %v528_v7 = vld [vmem:[#allocation2 + $0x28] sm:$0xff] }
 0x11c   : > { %1163 = vmatprep.mubr.f32.mxu1 %v658_v8 }
 0x11e   : > { %939 = vmatmul.mubr.f32.gmra.mrb[50].mxu0 %v655_v9 }
 0x11f   : > { %1164 = vmatmul.mubr.f32.gmra.mrb[50].mxu1 %v657_v10  ;;  %943 = vmatprep.mubr.f32.mxu0 %v660_v11 }
 0x120   : > { %1168 = vmatprep.mubr.f32.mxu1 %v662_v12 }
 0x122   : > { %944 = vmatmul.mubr.f32.gmra.mrb[52].mxu0 %v659_v13 }
 0x123   : > { %1169 = vmatmul.mubr.f32.gmra.mrb[52].mxu1 %v661_v14  ;;  %948 = vmatprep.mubr.f32.mxu0 %v664_v15  ;;  %v529_v14 = vld [vmem:[#allocation2 + $0x30] sm:$0xff] }
 0x124   : > { %1173 = vmatprep.mubr.f32.mxu1 %v666_v16 }
 0x126   : > { %949 = vmatmul.mubr.f32.gmra.mrb[54].mxu0 %v663_v17 }
 0x127   : > { %1174 = vmatmul.mubr.f32.gmra.mrb[54].mxu1 %v665_v18  ;;  %953 = vmatprep.mubr.f32.mxu0 %v668_v19 }
 0x128   : > { %1178 = vmatprep.mubr.f32.mxu1 %v670_v20 }
 0x12a   : > { %954 = vmatmul.mubr.f32.gmra.mrb[56].mxu0 %v667_v21  ;;  %v530_v21 = vld [vmem:[#allocation2 + $0x38] sm:$0xff] }
 0x12b   : > { %1179 = vmatmul.mubr.f32.gmra.mrb[56].mxu1 %v669_v22  ;;  %958 = vmatprep.mubr.f32.mxu0 %v672_v23 }
 0x12c   : > { %1183 = vmatprep.mubr.f32.mxu1 %v674_v24 }
 0x12e   : > { %959 = vmatmul.mubr.f32.gmra.mrb[58].mxu0 %v671_v25 }
 0x12f   : > { %1184 = vmatmul.mubr.f32.gmra.mrb[58].mxu1 %v673_v26  ;;  %963 = vmatprep.mubr.f32.mxu0 %v676_v27 }
 0x130   : > { %1188 = vmatprep.mubr.f32.mxu1 %v678_v28  ;;  %v531_v28 = vld [vmem:[#allocation2 + $0x40] sm:$0xff] }
 0x132   : > { %964 = vmatmul.mubr.f32.gmra.mrb[60].mxu0 %v675_v29 }
 0x133   : > { %1189 = vmatmul.mubr.f32.gmra.mrb[60].mxu1 %v677_v30  ;;  %968 = vmatprep.mubr.f32.mxu0 %v680_v31 }
 0x134   : > { %1193 = vmatprep.mubr.f32.mxu1 %v682_v32 }
 0x136   : > { %969 = vmatmul.mubr.f32.gmra.mrb[62].mxu0 %v679_v33 }
 0x137   : > { %1194 = vmatmul.mubr.f32.gmra.mrb[62].mxu1 %v681_v34 }
 0x18d   : > { %v815_v35 = vpop.f32.mrb[0].mxu0 }
 0x18e   : > { %v1040_v37 = vpop.f32.mrb[0].mxu1  ;;  %v817_v38 = vpop.f32.mrb[1].mxu0 }
 0x18f   : > { %v1041_v39 = vadd.f32 %v1040_v37, %v815_v35  ;;  %v1042_v40 = vpop.f32.mrb[1].mxu1  ;;  %v532_v35 = vld [vmem:[#allocation2 + $0x48] sm:$0xff] }
 0x191   : > { %v1199_v41 = vadd.f32 %v1041_v39, %v523_v36  ;;  %v820_v42 = vpop.f32.mrb[2].mxu0 }
 0x192   : > { %v1045_v3 = vpop.f32.mrb[2].mxu1  ;;  %v822_v44 = vpop.f32.mrb[3].mxu0 }
 0x193   : > { %1231 = vst [vmem:[#allocation2] sm:$0xff] %v1199_v41  ;;  %v1046_v45 = vadd.f32 %v1045_v3, %v820_v42  ;;  %v1047_v46 = vpop.f32.mrb[3].mxu1  ;;  %v533_v42 = vld [vmem:[#allocation2 + $0x50] sm:$0xff] }
 0x195   : > { %v1200_v47 = vadd.f32 %v1046_v45, %v524_v43  ;;  %v825_v48 = vpop.f32.mrb[4].mxu0 }
 0x196   : > { %v1050_v50 = vpop.f32.mrb[4].mxu1  ;;  %v827_v51 = vpop.f32.mrb[5].mxu0 }
 0x197   : > { %1232 = vst [vmem:[#allocation2 + $0x8] sm:$0xff] %v1200_v47  ;;  %v1051_v52 = vadd.f32 %v1050_v50, %v825_v48  ;;  %v1052_v53 = vpop.f32.mrb[5].mxu1  ;;  %v534_v48 = vld [vmem:[#allocation2 + $0x58] sm:$0xff] }
 0x199   : > { %v1201_v54 = vadd.f32 %v1051_v52, %v525_v49  ;;  %v830_v55 = vpop.f32.mrb[6].mxu0 }
 0x19a   : > { %v1055_v57 = vpop.f32.mrb[6].mxu1  ;;  %v832_v58 = vpop.f32.mrb[7].mxu0 }
 0x19b   : > { %1233 = vst [vmem:[#allocation2 + $0x10] sm:$0xff] %v1201_v54  ;;  %v1056_v59 = vadd.f32 %v1055_v57, %v830_v55  ;;  %v1057_v60 = vpop.f32.mrb[7].mxu1  ;;  %v535_v55 = vld [vmem:[#allocation2 + $0x60] sm:$0xff] }
 0x19d   : > { %v1202_v61 = vadd.f32 %v1056_v59, %v526_v56  ;;  %v835_v62 = vpop.f32.mrb[8].mxu0 }
 0x19e   : > { %v1060_v0 = vpop.f32.mrb[8].mxu1  ;;  %v837_v1 = vpop.f32.mrb[9].mxu0 }
 0x19f   : > { %1234 = vst [vmem:[#allocation2 + $0x18] sm:$0xff] %v1202_v61  ;;  %v1061_v2 = vadd.f32 %v1060_v0, %v835_v62  ;;  %v1062_v4 = vpop.f32.mrb[9].mxu1  ;;  %v536_v62 = vld [vmem:[#allocation2 + $0x68] sm:$0xff] }
 0x1a1   : > { %v1203_v5 = vadd.f32 %v1061_v2, %v527_v63  ;;  %v840_v6 = vpop.f32.mrb[10].mxu0 }
 0x1a2   : > { %v1065_v8 = vpop.f32.mrb[10].mxu1  ;;  %v842_v9 = vpop.f32.mrb[11].mxu0 }
 0x1a3   : > { %1235 = vst [vmem:[#allocation2 + $0x20] sm:$0xff] %v1203_v5  ;;  %v1066_v10 = vadd.f32 %v1065_v8, %v840_v6  ;;  %v1067_v11 = vpop.f32.mrb[11].mxu1  ;;  %v537_v6 = vld [vmem:[#allocation2 + $0x70] sm:$0xff] }
 0x1a5   : > { %v1204_v12 = vadd.f32 %v1066_v10, %v528_v7  ;;  %v845_v13 = vpop.f32.mrb[12].mxu0 }
 0x1a6   : > { %v1070_v15 = vpop.f32.mrb[12].mxu1  ;;  %v847_v16 = vpop.f32.mrb[13].mxu0 }
 0x1a7   : > { %1236 = vst [vmem:[#allocation2 + $0x28] sm:$0xff] %v1204_v12  ;;  %v1071_v17 = vadd.f32 %v1070_v15, %v845_v13  ;;  %v1072_v18 = vpop.f32.mrb[13].mxu1  ;;  %v538_v13 = vld [vmem:[#allocation2 + $0x78] sm:$0xff] }
 0x1a9   : > { %v1205_v19 = vadd.f32 %v1071_v17, %v529_v14  ;;  %v850_v20 = vpop.f32.mrb[14].mxu0 }
 0x1aa   : > { %v1075_v22 = vpop.f32.mrb[14].mxu1  ;;  %v852_v23 = vpop.f32.mrb[15].mxu0 }
 0x1ab   : > { %1237 = vst [vmem:[#allocation2 + $0x30] sm:$0xff] %v1205_v19  ;;  %v1076_v24 = vadd.f32 %v1075_v22, %v850_v20  ;;  %v1077_v25 = vpop.f32.mrb[15].mxu1  ;;  %v539_v20 = vld [vmem:[#allocation2 + $0x80] sm:$0xff] }
 0x1ad   : > { %v1206_v26 = vadd.f32 %v1076_v24, %v530_v21  ;;  %v855_v27 = vpop.f32.mrb[16].mxu0 }
 0x1ae   : > { %v1080_v29 = vpop.f32.mrb[16].mxu1  ;;  %v857_v30 = vpop.f32.mrb[17].mxu0 }
 0x1af   : > { %1238 = vst [vmem:[#allocation2 + $0x38] sm:$0xff] %v1206_v26  ;;  %v1081_v31 = vadd.f32 %v1080_v29, %v855_v27  ;;  %v1082_v32 = vpop.f32.mrb[17].mxu1  ;;  %v540_v27 = vld [vmem:[#allocation2 + $0x88] sm:$0xff] }
 0x1b1   : > { %v1207_v33 = vadd.f32 %v1081_v31, %v531_v28  ;;  %v860_v34 = vpop.f32.mrb[18].mxu0 }
 0x1b2   : > { %v1085_v36 = vpop.f32.mrb[18].mxu1  ;;  %v862_v37 = vpop.f32.mrb[19].mxu0 }
 0x1b3   : > { %1239 = vst [vmem:[#allocation2 + $0x40] sm:$0xff] %v1207_v33  ;;  %v1086_v38 = vadd.f32 %v1085_v36, %v860_v34  ;;  %v1087_v39 = vpop.f32.mrb[19].mxu1  ;;  %v541_v34 = vld [vmem:[#allocation2 + $0x90] sm:$0xff] }
 0x1b5   : > { %v1208_v40 = vadd.f32 %v1086_v38, %v532_v35  ;;  %v865_v41 = vpop.f32.mrb[20].mxu0 }
 0x1b6   : > { %v1090_v43 = vpop.f32.mrb[20].mxu1  ;;  %v867_v3 = vpop.f32.mrb[21].mxu0 }
 0x1b7   : > { %1240 = vst [vmem:[#allocation2 + $0x48] sm:$0xff] %v1208_v40  ;;  %v1091_v44 = vadd.f32 %v1090_v43, %v865_v41  ;;  %v1092_v45 = vpop.f32.mrb[21].mxu1  ;;  %v542_v41 = vld [vmem:[#allocation2 + $0x98] sm:$0xff] }
 0x1b9   : > { %v1209_v46 = vadd.f32 %v1091_v44, %v533_v42  ;;  %v870_v47 = vpop.f32.mrb[22].mxu0 }
 0x1ba   : > { %v1095_v49 = vpop.f32.mrb[22].mxu1  ;;  %v872_v50 = vpop.f32.mrb[23].mxu0 }
 0x1bb   : > { %1241 = vst [vmem:[#allocation2 + $0x50] sm:$0xff] %v1209_v46  ;;  %v1096_v51 = vadd.f32 %v1095_v49, %v870_v47  ;;  %v1097_v52 = vpop.f32.mrb[23].mxu1  ;;  %v543_v47 = vld [vmem:[#allocation2 + $0xa0] sm:$0xff] }
 0x1bd   : > { %v1210_v53 = vadd.f32 %v1096_v51, %v534_v48  ;;  %v875_v54 = vpop.f32.mrb[24].mxu0 }
 0x1be   : > { %v1100_v56 = vpop.f32.mrb[24].mxu1  ;;  %v877_v57 = vpop.f32.mrb[25].mxu0 }
 0x1bf   : > { %1242 = vst [vmem:[#allocation2 + $0x58] sm:$0xff] %v1210_v53  ;;  %v1101_v58 = vadd.f32 %v1100_v56, %v875_v54  ;;  %v1102_v59 = vpop.f32.mrb[25].mxu1  ;;  %v544_v54 = vld [vmem:[#allocation2 + $0xa8] sm:$0xff] }
 0x1c1   : > { %v1211_v60 = vadd.f32 %v1101_v58, %v535_v55  ;;  %v880_v61 = vpop.f32.mrb[26].mxu0 }
 0x1c2   : > { %v1105_v63 = vpop.f32.mrb[26].mxu1  ;;  %v882_v0 = vpop.f32.mrb[27].mxu0 }
 0x1c3   : > { %1243 = vst [vmem:[#allocation2 + $0x60] sm:$0xff] %v1211_v60  ;;  %v1106_v1 = vadd.f32 %v1105_v63, %v880_v61  ;;  %v1107_v2 = vpop.f32.mrb[27].mxu1  ;;  %v545_v61 = vld [vmem:[#allocation2 + $0xb0] sm:$0xff] }
 0x1c5   : > { %v1212_v4 = vadd.f32 %v1106_v1, %v536_v62  ;;  %v885_v5 = vpop.f32.mrb[28].mxu0 }
 0x1c6   : > { %v1110_v7 = vpop.f32.mrb[28].mxu1  ;;  %v887_v8 = vpop.f32.mrb[29].mxu0 }
 0x1c7   : > { %1244 = vst [vmem:[#allocation2 + $0x68] sm:$0xff] %v1212_v4  ;;  %v1111_v9 = vadd.f32 %v1110_v7, %v885_v5  ;;  %v1112_v10 = vpop.f32.mrb[29].mxu1  ;;  %v546_v5 = vld [vmem:[#allocation2 + $0xb8] sm:$0xff] }
 0x1c9   : > { %v1213_v11 = vadd.f32 %v1111_v9, %v537_v6  ;;  %v890_v12 = vpop.f32.mrb[30].mxu0 }
 0x1ca   : > { %v1115_v14 = vpop.f32.mrb[30].mxu1  ;;  %v892_v15 = vpop.f32.mrb[31].mxu0 }
 0x1cb   : > { %1245 = vst [vmem:[#allocation2 + $0x70] sm:$0xff] %v1213_v11  ;;  %v1116_v16 = vadd.f32 %v1115_v14, %v890_v12  ;;  %v1117_v17 = vpop.f32.mrb[31].mxu1  ;;  %v547_v12 = vld [vmem:[#allocation2 + $0xc0] sm:$0xff] }
 0x1cd   : > { %v1214_v18 = vadd.f32 %v1116_v16, %v538_v13  ;;  %v895_v19 = vpop.f32.mrb[32].mxu0 }
 0x1ce   : > { %v1120_v21 = vpop.f32.mrb[32].mxu1  ;;  %v897_v22 = vpop.f32.mrb[33].mxu0 }
 0x1cf   : > { %1246 = vst [vmem:[#allocation2 + $0x78] sm:$0xff] %v1214_v18  ;;  %v1121_v23 = vadd.f32 %v1120_v21, %v895_v19  ;;  %v1122_v24 = vpop.f32.mrb[33].mxu1  ;;  %v548_v19 = vld [vmem:[#allocation2 + $0xc8] sm:$0xff] }
 0x1d1   : > { %v1215_v25 = vadd.f32 %v1121_v23, %v539_v20  ;;  %v900_v26 = vpop.f32.mrb[34].mxu0 }
 0x1d2   : > { %v1125_v28 = vpop.f32.mrb[34].mxu1  ;;  %v902_v29 = vpop.f32.mrb[35].mxu0 }
 0x1d3   : > { %1247 = vst [vmem:[#allocation2 + $0x80] sm:$0xff] %v1215_v25  ;;  %v1126_v30 = vadd.f32 %v1125_v28, %v900_v26  ;;  %v1127_v31 = vpop.f32.mrb[35].mxu1  ;;  %v549_v26 = vld [vmem:[#allocation2 + $0xd0] sm:$0xff] }
 0x1d5   : > { %v1216_v32 = vadd.f32 %v1126_v30, %v540_v27  ;;  %v905_v33 = vpop.f32.mrb[36].mxu0 }
 0x1d6   : > { %v1130_v35 = vpop.f32.mrb[36].mxu1  ;;  %v907_v36 = vpop.f32.mrb[37].mxu0 }
 0x1d7   : > { %1248 = vst [vmem:[#allocation2 + $0x88] sm:$0xff] %v1216_v32  ;;  %v1131_v37 = vadd.f32 %v1130_v35, %v905_v33  ;;  %v1132_v38 = vpop.f32.mrb[37].mxu1  ;;  %v550_v33 = vld [vmem:[#allocation2 + $0xd8] sm:$0xff] }
 0x1d9   : > { %v1217_v39 = vadd.f32 %v1131_v37, %v541_v34  ;;  %v910_v40 = vpop.f32.mrb[38].mxu0 }
 0x1da   : > { %v1135_v42 = vpop.f32.mrb[38].mxu1  ;;  %v912_v43 = vpop.f32.mrb[39].mxu0 }
 0x1db   : > { %1249 = vst [vmem:[#allocation2 + $0x90] sm:$0xff] %v1217_v39  ;;  %v1136_v3 = vadd.f32 %v1135_v42, %v910_v40  ;;  %v1137_v44 = vpop.f32.mrb[39].mxu1  ;;  %v551_v40 = vld [vmem:[#allocation2 + $0xe0] sm:$0xff] }
 0x1dd   : > { %v1218_v45 = vadd.f32 %v1136_v3, %v542_v41  ;;  %v915_v46 = vpop.f32.mrb[40].mxu0 }
 0x1de   : > { %v1140_v48 = vpop.f32.mrb[40].mxu1  ;;  %v917_v49 = vpop.f32.mrb[41].mxu0 }
 0x1df   : > { %1250 = vst [vmem:[#allocation2 + $0x98] sm:$0xff] %v1218_v45  ;;  %v1141_v50 = vadd.f32 %v1140_v48, %v915_v46  ;;  %v1142_v51 = vpop.f32.mrb[41].mxu1  ;;  %v552_v46 = vld [vmem:[#allocation2 + $0xe8] sm:$0xff] }
 0x1e1   : > { %v1219_v52 = vadd.f32 %v1141_v50, %v543_v47  ;;  %v920_v53 = vpop.f32.mrb[42].mxu0 }
 0x1e2   : > { %v1145_v55 = vpop.f32.mrb[42].mxu1  ;;  %v922_v56 = vpop.f32.mrb[43].mxu0 }
 0x1e3   : > { %1251 = vst [vmem:[#allocation2 + $0xa0] sm:$0xff] %v1219_v52  ;;  %v1146_v57 = vadd.f32 %v1145_v55, %v920_v53  ;;  %v1147_v58 = vpop.f32.mrb[43].mxu1  ;;  %v553_v53 = vld [vmem:[#allocation2 + $0xf0] sm:$0xff] }
 0x1e5   : > { %v1220_v59 = vadd.f32 %v1146_v57, %v544_v54  ;;  %v925_v60 = vpop.f32.mrb[44].mxu0 }
 0x1e6   : > { %v1150_v62 = vpop.f32.mrb[44].mxu1  ;;  %v927_v63 = vpop.f32.mrb[45].mxu0 }
 0x1e7   : > { %1252 = vst [vmem:[#allocation2 + $0xa8] sm:$0xff] %v1220_v59  ;;  %v1151_v0 = vadd.f32 %v1150_v62, %v925_v60  ;;  %v1152_v1 = vpop.f32.mrb[45].mxu1  ;;  %v554_v60 = vld [vmem:[#allocation2 + $0xf8] sm:$0xff] }
 0x1e9   : > { %v1221_v2 = vadd.f32 %v1151_v0, %v545_v61  ;;  %v930_v4 = vpop.f32.mrb[46].mxu0 }
 0x1ea   : > { %v1155_v6 = vpop.f32.mrb[46].mxu1  ;;  %v932_v7 = vpop.f32.mrb[47].mxu0 }
 0x1eb   : > { %1253 = vst [vmem:[#allocation2 + $0xb0] sm:$0xff] %v1221_v2  ;;  %v1156_v8 = vadd.f32 %v1155_v6, %v930_v4  ;;  %v1157_v9 = vpop.f32.mrb[47].mxu1  ;;  %v1267_v2 = vld [vmem:[#allocation2] sm:$0xff] (!%p1535_p12)  ;;  %v1300_v7 = vld [vmem:[%s2098_s24 + $0x8] sm:$0xff] (!%p1535_p12) }
 0x1ec   : > { %v1299_v4 = vld [vmem:[%s2098_s24] sm:$0xff] (!%p1535_p12)  ;;  %v1301_v9 = vld [vmem:[%s2098_s24 + $0x10] sm:$0xff] (!%p1535_p12) }
 0x1ed   : > { %v1222_v10 = vadd.f32 %v1156_v8, %v546_v5  ;;  %v935_v11 = vpop.f32.mrb[48].mxu0  ;;  %v1268_v5 = vld [vmem:[#allocation2 + $0x8] sm:$0xff] (!%p1535_p12)  ;;  %v1331_v6 = vadd.f32 (!%p1535_p12), %v1299_v4, %v1267_v2  ;;  %v1269_v8 = vld [vmem:[#allocation2 + $0x10] sm:$0xff] (!%p1535_p12) }
 0x1ee   : > { %v1160_v13 = vpop.f32.mrb[48].mxu1  ;;  %v937_v14 = vpop.f32.mrb[49].mxu0  ;;  %v1316_v2 = vld [vmem:[%s2098_s24 + $0x88] sm:$0xff] (!%p1535_p12) }
 0x1ef   : > { %1254 = vst [vmem:[#allocation2 + $0xb8] sm:$0xff] %v1222_v10  ;;  %v1161_v15 = vadd.f32 %v1160_v13, %v935_v11  ;;  %v1162_v16 = vpop.f32.mrb[49].mxu1  ;;  %v1332_v10 = vadd.f32 (!%p1535_p12), %v1300_v7, %v1268_v5  ;;  %v1333_v11 = vadd.f32 (!%p1535_p12), %v1301_v9, %v1269_v8  ;;  %v1302_v13 = vld [vmem:[%s2098_s24 + $0x18] sm:$0xff] (!%p1535_p12)  ;;  %v1271_v14 = vld [vmem:[#allocation2 + $0x20] sm:$0xff] (!%p1535_p12)  ;;  %v1285_v8 = vld [vmem:[#allocation2 + $0x90] sm:$0xff] (!%p1535_p12) }
 0x1f0   : > { %v1317_v9 = vld [vmem:[%s2098_s24 + $0x90] sm:$0xff] (!%p1535_p12) }
 0x1f1   : > { %v1223_v17 = vadd.f32 %v1161_v15, %v547_v12  ;;  %v940_v18 = vpop.f32.mrb[50].mxu0  ;;  %v1270_v12 = vld [vmem:[#allocation2 + $0x18] sm:$0xff] (!%p1535_p12)  ;;  %v1363_v15 = vmax.f32 (!%p1535_p12), %v1331_v6, 0.0 }
 0x1f2   : > { %v1165_v20 = vpop.f32.mrb[50].mxu1  ;;  %v942_v21 = vpop.f32.mrb[51].mxu0  ;;  %v1334_v16 = vadd.f32 (!%p1535_p12), %v1302_v13, %v1270_v12  ;;  %v1349_v12 = vadd.f32 (!%p1535_p12), %v1317_v9, %v1285_v8  ;;  %v1318_v13 = vld [vmem:[%s2098_s24 + $0x98] sm:$0xff] (!%p1535_p12) }
 0x1f3   : > { %1255 = vst [vmem:[#allocation2 + $0xc0] sm:$0xff] %v1223_v17  ;;  %v1166_v22 = vadd.f32 %v1165_v20, %v940_v18  ;;  %v1167_v23 = vpop.f32.mrb[51].mxu1  ;;  %v1303_v17 = vld [vmem:[%s2098_s24 + $0x20] sm:$0xff] (!%p1535_p12)  ;;  %v1272_v18 = vld [vmem:[#allocation2 + $0x28] sm:$0xff] (!%p1535_p12)  ;;  %v1364_v20 = vmax.f32 (!%p1535_p12), %v1332_v10, 0.0  ;;  %v1365_v21 = vmax.f32 (!%p1535_p12), %v1333_v11, 0.0  ;;  %1395 = vst [vmem:[%s2103_s28] sm:$0xff] (!%p1535_p12), %v1363_v15 }
 0x1f4   : > { %v1286_v10 = vld [vmem:[#allocation2 + $0x98] sm:$0xff] (!%p1535_p12)  ;;  %v1319_v15 = vld [vmem:[%s2098_s24 + $0xa0] sm:$0xff] (!%p1535_p12) }
 0x1f5   : > { %v1224_v24 = vadd.f32 %v1166_v22, %v548_v19  ;;  %v945_v25 = vpop.f32.mrb[52].mxu0  ;;  %v1304_v19 = vld [vmem:[%s2098_s24 + $0x28] sm:$0xff] (!%p1535_p12)  ;;  %v1335_v22 = vadd.f32 (!%p1535_p12), %v1303_v17, %v1271_v14  ;;  %1396 = vst [vmem:[%s2103_s28 + $0x8] sm:$0xff] (!%p1535_p12), %v1364_v20  ;;  %1397 = vst [vmem:[%s2103_s28 + $0x10] sm:$0xff] (!%p1535_p12), %v1365_v21  ;;  %v1287_v14 = vld [vmem:[#allocation2 + $0xa0] sm:$0xff] (!%p1535_p12) }
 0x1f6   : > { %v1170_v27 = vpop.f32.mrb[52].mxu1  ;;  %v947_v28 = vpop.f32.mrb[53].mxu0  ;;  %v1336_v23 = vadd.f32 (!%p1535_p12), %v1304_v19, %v1272_v18  ;;  %v1350_v18 = vadd.f32 (!%p1535_p12), %v1318_v13, %v1286_v10  ;;  %v1351_v19 = vadd.f32 (!%p1535_p12), %v1319_v15, %v1287_v14  ;;  %v1288_v20 = vld [vmem:[#allocation2 + $0xa8] sm:$0xff] (!%p1535_p12) }
 0x1f7   : > { %1256 = vst [vmem:[#allocation2 + $0xc8] sm:$0xff] %v1224_v24  ;;  %v1171_v29 = vadd.f32 %v1170_v27, %v945_v25  ;;  %v1172_v30 = vpop.f32.mrb[53].mxu1  ;;  %v1273_v24 = vld [vmem:[#allocation2 + $0x30] sm:$0xff] (!%p1535_p12)  ;;  %v1366_v27 = vmax.f32 (!%p1535_p12), %v1334_v16, 0.0  ;;  %v1320_v21 = vld [vmem:[%s2098_s24 + $0xa8] sm:$0xff] (!%p1535_p12) }
 0x1f8   : > { %v1305_v25 = vld [vmem:[%s2098_s24 + $0x30] sm:$0xff] (!%p1535_p12)  ;;  %v1275_v30 = vld [vmem:[#allocation2 + $0x40] sm:$0xff] (!%p1535_p12) }
 0x1f9   : > { %v1225_v31 = vadd.f32 %v1171_v29, %v549_v26  ;;  %v950_v32 = vpop.f32.mrb[54].mxu0  ;;  %v1274_v26 = vld [vmem:[#allocation2 + $0x38] sm:$0xff] (!%p1535_p12)  ;;  %v1337_v28 = vadd.f32 (!%p1535_p12), %v1305_v25, %v1273_v24  ;;  %1398 = vst [vmem:[%s2103_s28 + $0x18] sm:$0xff] (!%p1535_p12), %v1366_v27  ;;  %v1352_v24 = vadd.f32 (!%p1535_p12), %v1320_v21, %v1288_v20  ;;  %v1321_v25 = vld [vmem:[%s2098_s24 + $0xb0] sm:$0xff] (!%p1535_p12) }
 0x1fa   : > { %v1175_v34 = vpop.f32.mrb[54].mxu1  ;;  %v952_v35 = vpop.f32.mrb[55].mxu0  ;;  %v1306_v29 = vld [vmem:[%s2098_s24 + $0x38] sm:$0xff] (!%p1535_p12) }
 0x1fb   : > { %1257 = vst [vmem:[#allocation2 + $0xd0] sm:$0xff] %v1225_v31  ;;  %v1176_v36 = vadd.f32 %v1175_v34, %v950_v32  ;;  %v1177_v37 = vpop.f32.mrb[55].mxu1  ;;  %v1307_v31 = vld [vmem:[%s2098_s24 + $0x40] sm:$0xff] (!%p1535_p12)  ;;  %v1367_v32 = vmax.f32 (!%p1535_p12), %v1335_v22, 0.0  ;;  %v1338_v34 = vadd.f32 (!%p1535_p12), %v1306_v29, %v1274_v26  ;;  %v1289_v22 = vld [vmem:[#allocation2 + $0xb0] sm:$0xff] (!%p1535_p12)  ;;  %v1290_v26 = vld [vmem:[#allocation2 + $0xb8] sm:$0xff] (!%p1535_p12) }
 0x1fc   : > { %v1339_v35 = vadd.f32 (!%p1535_p12), %v1307_v31, %v1275_v30  ;;  %v1308_v37 = vld [vmem:[%s2098_s24 + $0x48] sm:$0xff] (!%p1535_p12)  ;;  %v1322_v27 = vld [vmem:[%s2098_s24 + $0xb8] sm:$0xff] (!%p1535_p12)  ;;  %v1383_v29 = vmax.f32 (!%p1535_p12), %v1351_v19, 0.0  ;;  %v1353_v30 = vadd.f32 (!%p1535_p12), %v1321_v25, %v1289_v22 }
 0x1fd   : > { %v1226_v38 = vadd.f32 %v1176_v36, %v550_v33  ;;  %v955_v39 = vpop.f32.mrb[56].mxu0  ;;  %v1368_v33 = vmax.f32 (!%p1535_p12), %v1336_v23, 0.0  ;;  %v1276_v36 = vld [vmem:[#allocation2 + $0x48] sm:$0xff] (!%p1535_p12)  ;;  %1399 = vst [vmem:[%s2103_s28 + $0x20] sm:$0xff] (!%p1535_p12), %v1367_v32  ;;  %v1381_v23 = vmax.f32 (!%p1535_p12), %v1349_v12, 0.0  ;;  %v1354_v31 = vadd.f32 (!%p1535_p12), %v1322_v27, %v1290_v26  ;;  %v1291_v32 = vld [vmem:[#allocation2 + $0xc0] sm:$0xff] (!%p1535_p12) }
 0x1fe   : > { %v1180_v41 = vpop.f32.mrb[56].mxu1  ;;  %v957_v42 = vpop.f32.mrb[57].mxu0  ;;  %1415 = vst [vmem:[%s2103_s28 + $0xa0] sm:$0xff] (!%p1535_p12), %v1383_v29 }
 0x1ff   : > { %1258 = vst [vmem:[#allocation2 + $0xd8] sm:$0xff] %v1226_v38  ;;  %v1181_v43 = vadd.f32 %v1180_v41, %v955_v39  ;;  %v1182_v3 = vpop.f32.mrb[57].mxu1  ;;  %v1277_v38 = vld [vmem:[#allocation2 + $0x50] sm:$0xff] (!%p1535_p12)  ;;  %v1369_v39 = vmax.f32 (!%p1535_p12), %v1337_v28, 0.0  ;;  %v1278_v42 = vld [vmem:[#allocation2 + $0x58] sm:$0xff] (!%p1535_p12)  ;;  %1400 = vst [vmem:[%s2103_s28 + $0x28] sm:$0xff] (!%p1535_p12), %v1368_v33 }
 0x200   : > { %v1309_v41 = vld [vmem:[%s2098_s24 + $0x50] sm:$0xff] (!%p1535_p12)  ;;  %v1370_v3 = vmax.f32 (!%p1535_p12), %v1338_v34, 0.0  ;;  %v1382_v28 = vmax.f32 (!%p1535_p12), %v1350_v18, 0.0  ;;  %v1323_v33 = vld [vmem:[%s2098_s24 + $0xc0] sm:$0xff] (!%p1535_p12)  ;;  %v1292_v34 = vld [vmem:[#allocation2 + $0xc8] sm:$0xff] (!%p1535_p12)  ;;  %1413 = vst [vmem:[%s2103_s28 + $0x90] sm:$0xff] (!%p1535_p12), %v1381_v23 }
 0x201   : > { %v1227_v44 = vadd.f32 %v1181_v43, %v551_v40  ;;  %v960_v45 = vpop.f32.mrb[58].mxu0  ;;  %v1340_v40 = vadd.f32 (!%p1535_p12), %v1308_v37, %v1276_v36  ;;  %v1310_v43 = vld [vmem:[%s2098_s24 + $0x58] sm:$0xff] (!%p1535_p12)  ;;  %1401 = vst [vmem:[%s2103_s28 + $0x30] sm:$0xff] (!%p1535_p12), %v1369_v39  ;;  %v1355_v36 = vadd.f32 (!%p1535_p12), %v1323_v33, %v1291_v32  ;;  %v1324_v37 = vld [vmem:[%s2098_s24 + $0xc8] sm:$0xff] (!%p1535_p12)  ;;  %v1325_v39 = vld [vmem:[%s2098_s24 + $0xd0] sm:$0xff] (!%p1535_p12) }
 0x202   : > { %v1185_v47 = vpop.f32.mrb[58].mxu1  ;;  %v962_v48 = vpop.f32.mrb[59].mxu0  ;;  %1402 = vst [vmem:[%s2103_s28 + $0x38] sm:$0xff] (!%p1535_p12), %v1370_v3  ;;  %1414 = vst [vmem:[%s2103_s28 + $0x98] sm:$0xff] (!%p1535_p12), %v1382_v28 }
 0x203   : > { %1259 = vst [vmem:[#allocation2 + $0xe0] sm:$0xff] %v1227_v44  ;;  %v1186_v49 = vadd.f32 %v1185_v47, %v960_v45  ;;  %v1187_v50 = vpop.f32.mrb[59].mxu1  ;;  %v1371_v44 = vmax.f32 (!%p1535_p12), %v1339_v35, 0.0  ;;  %v1341_v45 = vadd.f32 (!%p1535_p12), %v1309_v41, %v1277_v38  ;;  %v1279_v47 = vld [vmem:[#allocation2 + $0x60] sm:$0xff] (!%p1535_p12)  ;;  %v1384_v35 = vmax.f32 (!%p1535_p12), %v1352_v24, 0.0  ;;  %v1293_v38 = vld [vmem:[#allocation2 + $0xd0] sm:$0xff] (!%p1535_p12) }
 0x204   : > { %v1311_v48 = vld [vmem:[%s2098_s24 + $0x60] sm:$0xff] (!%p1535_p12)  ;;  %v1372_v50 = vmax.f32 (!%p1535_p12), %v1340_v40, 0.0  ;;  %v1385_v40 = vmax.f32 (!%p1535_p12), %v1353_v30, 0.0  ;;  %v1386_v41 = vmax.f32 (!%p1535_p12), %v1354_v31, 0.0 }
 0x205   : > { %v1228_v51 = vadd.f32 %v1186_v49, %v552_v46  ;;  %v965_v52 = vpop.f32.mrb[60].mxu0  ;;  %v1342_v46 = vadd.f32 (!%p1535_p12), %v1310_v43, %v1278_v42  ;;  %v1280_v49 = vld [vmem:[#allocation2 + $0x68] sm:$0xff] (!%p1535_p12)  ;;  %1403 = vst [vmem:[%s2103_s28 + $0x40] sm:$0xff] (!%p1535_p12), %v1371_v44  ;;  %v1356_v42 = vadd.f32 (!%p1535_p12), %v1324_v37, %v1292_v34  ;;  %v1357_v43 = vadd.f32 (!%p1535_p12), %v1325_v39, %v1293_v38  ;;  %v1326_v44 = vld [vmem:[%s2098_s24 + $0xd8] sm:$0xff] (!%p1535_p12) }
 0x206   : > { %v1190_v54 = vpop.f32.mrb[60].mxu1  ;;  %v967_v55 = vpop.f32.mrb[61].mxu0  ;;  %1404 = vst [vmem:[%s2103_s28 + $0x48] sm:$0xff] (!%p1535_p12), %v1372_v50  ;;  %v1294_v3 = vld [vmem:[#allocation2 + $0xd8] sm:$0xff] (!%p1535_p12)  ;;  %1416 = vst [vmem:[%s2103_s28 + $0xa8] sm:$0xff] (!%p1535_p12), %v1384_v35  ;;  %v1328_v50 = vld [vmem:[%s2098_s24 + $0xe8] sm:$0xff] (!%p1535_p12) }
 0x207   : > { %1260 = vst [vmem:[#allocation2 + $0xe8] sm:$0xff] %v1228_v51  ;;  %v1191_v56 = vadd.f32 %v1190_v54, %v965_v52  ;;  %v1192_v57 = vpop.f32.mrb[61].mxu1  ;;  %v1343_v51 = vadd.f32 (!%p1535_p12), %v1311_v48, %v1279_v47  ;;  %v1312_v52 = vld [vmem:[%s2098_s24 + $0x68] sm:$0xff] (!%p1535_p12)  ;;  %v1313_v54 = vld [vmem:[%s2098_s24 + $0x70] sm:$0xff] (!%p1535_p12)  ;;  %v1373_v55 = vmax.f32 (!%p1535_p12), %v1341_v45, 0.0  ;;  %v1358_v47 = vadd.f32 (!%p1535_p12), %v1326_v44, %v1294_v3  ;;  %v1327_v48 = vld [vmem:[%s2098_s24 + $0xe0] sm:$0xff] (!%p1535_p12) }
 0x208   : > { %v1344_v57 = vadd.f32 (!%p1535_p12), %v1312_v52, %v1280_v49  ;;  %1417 = vst [vmem:[%s2103_s28 + $0xb0] sm:$0xff] (!%p1535_p12), %v1385_v40  ;;  %1418 = vst [vmem:[%s2103_s28 + $0xb8] sm:$0xff] (!%p1535_p12), %v1386_v41  ;;  %v1389_v52 = vmax.f32 (!%p1535_p12), %v1357_v43, 0.0 }
 0x209   : > { %v1229_v58 = vadd.f32 %v1191_v56, %v553_v53  ;;  %v970_v59 = vpop.f32.mrb[62].mxu0  ;;  %1266 = sbr.rel (%p1535_p12) target bundleno = 540 (0x21c), region = 63  ;;  %v1281_v53 = vld [vmem:[#allocation2 + $0x70] sm:$0xff] (!%p1535_p12)  ;;  %v1374_v56 = vmax.f32 (!%p1535_p12), %v1342_v46, 0.0  ;;  %1405 = vst [vmem:[%s2103_s28 + $0x50] sm:$0xff] (!%p1535_p12), %v1373_v55  ;;  %v1387_v46 = vmax.f32 (!%p1535_p12), %v1355_v36, 0.0 }
 0x20a   : > { %v1195_v61 = vpop.f32.mrb[62].mxu1  ;;  %v972_v62 = vpop.f32.mrb[63].mxu0  ;;  %v1376_v4 = vmax.f32 (!%p1535_p12), %v1344_v57, 0.0  ;;  %v1295_v45 = vld [vmem:[#allocation2 + $0xe0] sm:$0xff] (!%p1535_p12)  ;;  %1421 = vst [vmem:[%s2103_s28 + $0xd0] sm:$0xff] (!%p1535_p12), %v1389_v52 }
 0x20b   : > { %1261 = vst [vmem:[#allocation2 + $0xf0] sm:$0xff] %v1229_v58  ;;  %v1196_v63 = vadd.f32 %v1195_v61, %v970_v59  ;;  %v1197_v0 = vpop.f32.mrb[63].mxu1  ;;  %v1345_v58 = vadd.f32 (!%p1535_p12), %v1313_v54, %v1281_v53  ;;  %v1282_v59 = vld [vmem:[#allocation2 + $0x78] sm:$0xff] (!%p1535_p12)  ;;  %v1283_v61 = vld [vmem:[#allocation2 + $0x80] sm:$0xff] (!%p1535_p12)  ;;  %v1375_v62 = vmax.f32 (!%p1535_p12), %v1343_v51, 0.0  ;;  %1406 = vst [vmem:[%s2103_s28 + $0x58] sm:$0xff] (!%p1535_p12), %v1374_v56  ;;  %v1359_v53 = vadd.f32 (!%p1535_p12), %v1327_v48, %v1295_v45 }
 0x20c   : > { %v1315_v0 = vld [vmem:[%s2098_s24 + $0x80] sm:$0xff] (!%p1535_p12)  ;;  %1408 = vst [vmem:[%s2103_s28 + $0x68] sm:$0xff] (!%p1535_p12), %v1376_v4  ;;  %v1388_v51 = vmax.f32 (!%p1535_p12), %v1356_v42, 0.0  ;;  %v1329_v56 = vld [vmem:[%s2098_s24 + $0xf0] sm:$0xff] (!%p1535_p12)  ;;  %1419 = vst [vmem:[%s2103_s28 + $0xc0] sm:$0xff] (!%p1535_p12), %v1387_v46 }
 0x20d   : > { %v1230_v1 = vadd.f32 %v1196_v63, %v554_v60  ;;  %v1314_v60 = vld [vmem:[%s2098_s24 + $0x78] sm:$0xff] (!%p1535_p12)  ;;  %v1377_v5 = vmax.f32 (!%p1535_p12), %v1345_v58, 0.0  ;;  %v1347_v6 = vadd.f32 (!%p1535_p12), %v1315_v0, %v1283_v61  ;;  %1407 = vst [vmem:[%s2103_s28 + $0x60] sm:$0xff] (!%p1535_p12), %v1375_v62  ;;  %v1390_v58 = vmax.f32 (!%p1535_p12), %v1358_v47, 0.0 }
 0x20e   : > { %v1346_v63 = vadd.f32 (!%p1535_p12), %v1314_v60, %v1282_v59  ;;  %v1296_v49 = vld [vmem:[#allocation2 + $0xe8] sm:$0xff] (!%p1535_p12)  ;;  %v1330_v60 = vld [vmem:[%s2098_s24 + $0xf8] sm:$0xff] (!%p1535_p12)  ;;  %1420 = vst [vmem:[%s2103_s28 + $0xc8] sm:$0xff] (!%p1535_p12), %v1388_v51  ;;  %v1391_v61 = vmax.f32 (!%p1535_p12), %v1359_v53, 0.0 }
 0x20f   : > { %1262 = vst [vmem:[#allocation2 + $0xf8] sm:$0xff] %v1230_v1  ;;  %v1284_v1 = vld [vmem:[#allocation2 + $0x88] sm:$0xff] (!%p1535_p12)  ;;  %1409 = vst [vmem:[%s2103_s28 + $0x70] sm:$0xff] (!%p1535_p12), %v1377_v5  ;;  %v1379_v16 = vmax.f32 (!%p1535_p12), %v1347_v6, 0.0  ;;  %v1360_v54 = vadd.f32 (!%p1535_p12), %v1328_v50, %v1296_v49 }
 0x210   : > { %v1348_v7 = vadd.f32 %v1316_v2, %v1284_v1  ;;  %v1378_v11 = vmax.f32 %v1346_v63, 0.0  ;;  %1422 = vst [vmem:[%s2103_s28 + $0xd8] sm:$0xff] %v1390_v58  ;;  %1423 = vst [vmem:[%s2103_s28 + $0xe0] sm:$0xff] %v1391_v61 }
 0x211   : > { %1411 = vst [vmem:[%s2103_s28 + $0x80] sm:$0xff] %v1379_v16  ;;  %v1392_v62 = vmax.f32 %v1360_v54, 0.0 }
 0x212   : > { %v1380_v17 = vmax.f32 %v1348_v7, 0.0  ;;  %1410 = vst [vmem:[%s2103_s28 + $0x78] sm:$0xff] %v1378_v11  ;;  %v1297_v55 = vld [vmem:[#allocation2 + $0xf0] sm:$0xff] }
 0x213   : > { %v1361_v59 = vadd.f32 %v1329_v56, %v1297_v55  ;;  %1424 = vst [vmem:[%s2103_s28 + $0xe8] sm:$0xff] %v1392_v62 }
 0x214   : > { %1412 = vst [vmem:[%s2103_s28 + $0x88] sm:$0xff] %v1380_v17 }
 0x215   : > { %v1393_v0 = vmax.f32 %v1361_v59, 0.0 }
 0x216   : > { %v1298_v57 = vld [vmem:[#allocation2 + $0xf8] sm:$0xff] }
 0x217   : > { %v1362_v63 = vadd.f32 %v1330_v60, %v1298_v57  ;;  %1425 = vst [vmem:[%s2103_s28 + $0xf0] sm:$0xff] %v1393_v0 }
 0x219   : > { %v1394_v1 = vmax.f32 %v1362_v63, 0.0 }
 0x21b   : > { %1426 = vst [vmem:[%s2103_s28 + $0xf8] sm:$0xff] %v1394_v1 }
 0x21c PF: > { %s13_s18 = sadd.s32 1, %s1747_s18   ;;  %s2428_s12 = smov %s1727_s13 }
 0x21d   : > { %p10_p13 = scmp.ge.s32.totalorder %s13_s18, 10   ;;  %s2429_s13 = smov %s1822_s25 }
 0x21e   : > { %s2430_s14 = smov %s1739_s16  ;;  %s2431_s15 = smov %s1743_s17 }
 0x21f   : > { %s2432_s16 = smov %s2435_s19  ;;  %s2433_s17 = smov %s2439_s20 }
 0x220   :  { %12 = sbr.rel (!%p10_p13) target bundleno = 4 (0x4), region = 102 }

// kernel: sage_forward.3
= control target key start
LH: loop header
LB: loop body
LE: loop exit
PB: predicated region body
PF: predicated region fallthrough
CT: control target
= control target key end

     0   :  { %s1739_s12 = smov 0   ;;  %s1741_s13 = smov 0   ;;  %s2392_s0 = inlined_call_operand.vmem [shape: f32[1024,1024], index: 0, kind: input, shape index: {}]   ;;  %s2393_s1 = inlined_call_operand.vmem [shape: f32[2,512,128], index: 1, kind: input, shape index: {}]   ;;  %s2394_s2 = inlined_call_operand.vmem [shape: f32[1024,128], index: 2, kind: input, shape index: {}]   ;;  %s2395_s3 = inlined_call_operand.vmem [shape: f32[1024,128], index: 3, kind: output, shape index: {}]  }
   0x1   :  { %s1743_s14 = smov 0   ;;  %s1745_s15 = smov 0  }
   0x2   :  { %s1747_s16 = smov 0   ;;  %s1749_s17 = smov 0  }
   0x3   :  { %s1751_s18 = smov 0  }
   0x4 LB: > { %s22_s19 = sadd.s32 1, %s1707_s16  ;;  %s25_s20 = sadd.s32 1, %s1711_s17  ;;  %s1715_s18 = sphi %s1751_s18, %s13_s18   ;;  %s1711_s17 = sphi %s1749_s17, %s2401_s17   ;;  %s1707_s16 = sphi %s1747_s16, %s2400_s16   ;;  %s1703_s15 = sphi %s1745_s15, %s2399_s15   ;;  %s1699_s14 = sphi %s1743_s14, %s2398_s14   ;;  %s1695_s13 = sphi %s1741_s13, %s2397_s13   ;;  %s1691_s12 = sphi %s1739_s12, %s2396_s12  }
   0x5   : > { %p23_p0 = scmp.ge.s32.totalorder %s22_s19, 2  ;;  %p41_p1 = scmp.ne.s32.totalorder %s1695_s13, %s1691_s12 }
   0x6   : > { %p42_p2 = scmp.eq.s32.totalorder %s1715_s18, 0  ;;  %s34_s24 = sadd.s32 1, %s1695_s13 }
   0x7   : > { %s2403_s19 = smov (%p23_p0, %s22_s19), 0  ;;  %s2405_s20 = smov (!%p23_p0, %s25_s20), %s1711_s17 }
   0x8   : > { %p43_p3 = por %p42_p2, %p41_p1  ;;  %p27_p4 = scmp.ge.s32.totalorder %s2405_s20, 4 }
   0x9   : > { %s30_s21 = ssub.s32 %s1707_s16, %s2403_s19  ;;  %p1489_p6 = scmp.ge.s32.totalorder %s1715_s18, 8 }
   0xa   : > { %s2407_s20 = smov (%p27_p4, %s2405_s20), 0 }
   0xb   : > { %s29_s22 = ssub.s32 %s1711_s17, %s2407_s20  ;;  %143 = sbr.rel (%p1489_p6) target bundleno = 89 (0x59), region = 20 }
   0xc   : > { %s31_s23 = sor.u32 %s30_s21, %s29_s22 }
   0xd   : > { %p32_p5 = scmp.eq.s32.totalorder %s31_s23, 0 }
   0xf   : > { %s1790_s25 = scalar_select %p32_p5, %s1695_s13, %s34_s24  }
  0x12   : > { %146 = sbr.rel (!%p43_p3) target bundleno = 89 (0x59), region = 24  ;;  %s148_s26 = sand.u32 (%p43_p3), 1, %s1695_s13  }
  0x13   : > { %s1492_s27 = sshll.u32 (%p43_p3), %s1707_s16, 2  ;;  %s1490_s28 = sshll.u32 (%p43_p3), %s148_s26, 10 }
  0x14   : > { %s1506_s29 = sshll.u32 (%p43_p3), %s1711_s17, 8  ;;  %s1804_s8 = scalar_lea.vmem (%p43_p3), [#allocation3], %s1490_s28 }
  0x15   : > { %s154_s30 = sadd.s32 (%p43_p3), %s1506_s29, %s1492_s27 }
  0x16   : > { %s1494_s4 = sshll.u32 (%p43_p3), %s154_s30, 3 }
  0x17   : > { %s1799_s7 = scalar_lea.vmem (%p43_p3), %s2392_s0, %s1494_s4 }
  0x18   : > { %v169_v0 = vld [vmem:[%s1799_s7] sm:$0xff] (%p43_p3)  ;;  %v171_v1 = vld [vmem:[%s1799_s7 + $0x8] sm:$0xff] (%p43_p3)  ;;  %v173_v2 = vld [vmem:[%s1799_s7 + $0x10] sm:$0xff] (%p43_p3) }
  0x19   : > { %170 = vst [vmem:[%s1804_s8] sm:$0xff] %v169_v0  ;;  %172 = vst [vmem:[%s1804_s8 + $0x8] sm:$0xff] %v171_v1  ;;  %v175_v3 = vld [vmem:[%s1799_s7 + $0x18] sm:$0xff]  ;;  %v177_v4 = vld [vmem:[%s1799_s7 + $0x40] sm:$0xff] }
  0x1a   : > { %174 = vst [vmem:[%s1804_s8 + $0x10] sm:$0xff] %v173_v2  ;;  %v179_v5 = vld [vmem:[%s1799_s7 + $0x48] sm:$0xff]  ;;  %176 = vst [vmem:[%s1804_s8 + $0x18] sm:$0xff] %v175_v3  ;;  %v181_v6 = vld [vmem:[%s1799_s7 + $0x50] sm:$0xff] }
  0x1b   : > { %178 = vst [vmem:[%s1804_s8 + $0x20] sm:$0xff] %v177_v4  ;;  %180 = vst [vmem:[%s1804_s8 + $0x28] sm:$0xff] %v179_v5  ;;  %v183_v7 = vld [vmem:[%s1799_s7 + $0x58] sm:$0xff]  ;;  %v185_v8 = vld [vmem:[%s1799_s7 + $0x80] sm:$0xff] }
  0x1c   : > { %182 = vst [vmem:[%s1804_s8 + $0x30] sm:$0xff] %v181_v6  ;;  %184 = vst [vmem:[%s1804_s8 + $0x38] sm:$0xff] %v183_v7  ;;  %v187_v9 = vld [vmem:[%s1799_s7 + $0x88] sm:$0xff]  ;;  %v189_v10 = vld [vmem:[%s1799_s7 + $0x90] sm:$0xff] }
  0x1d   : > { %186 = vst [vmem:[%s1804_s8 + $0x40] sm:$0xff] %v185_v8  ;;  %v191_v11 = vld [vmem:[%s1799_s7 + $0x98] sm:$0xff]  ;;  %188 = vst [vmem:[%s1804_s8 + $0x48] sm:$0xff] %v187_v9  ;;  %v193_v12 = vld [vmem:[%s1799_s7 + $0xc0] sm:$0xff] }
  0x1e   : > { %190 = vst [vmem:[%s1804_s8 + $0x50] sm:$0xff] %v189_v10  ;;  %192 = vst [vmem:[%s1804_s8 + $0x58] sm:$0xff] %v191_v11  ;;  %v195_v13 = vld [vmem:[%s1799_s7 + $0xc8] sm:$0xff]  ;;  %v197_v14 = vld [vmem:[%s1799_s7 + $0xd0] sm:$0xff] }
  0x1f   : > { %194 = vst [vmem:[%s1804_s8 + $0x60] sm:$0xff] %v193_v12  ;;  %196 = vst [vmem:[%s1804_s8 + $0x68] sm:$0xff] %v195_v13  ;;  %v199_v15 = vld [vmem:[%s1799_s7 + $0xd8] sm:$0xff]  ;;  %v201_v16 = vld [vmem:[%s1799_s7 + $0x100] sm:$0xff] }
  0x20   : > { %198 = vst [vmem:[%s1804_s8 + $0x70] sm:$0xff] %v197_v14  ;;  %v203_v17 = vld [vmem:[%s1799_s7 + $0x108] sm:$0xff]  ;;  %200 = vst [vmem:[%s1804_s8 + $0x78] sm:$0xff] %v199_v15  ;;  %v205_v18 = vld [vmem:[%s1799_s7 + $0x110] sm:$0xff] }
  0x21   : > { %202 = vst [vmem:[%s1804_s8 + $0x80] sm:$0xff] %v201_v16  ;;  %204 = vst [vmem:[%s1804_s8 + $0x88] sm:$0xff] %v203_v17  ;;  %v207_v19 = vld [vmem:[%s1799_s7 + $0x118] sm:$0xff]  ;;  %v209_v20 = vld [vmem:[%s1799_s7 + $0x140] sm:$0xff] }
  0x22   : > { %206 = vst [vmem:[%s1804_s8 + $0x90] sm:$0xff] %v205_v18  ;;  %208 = vst [vmem:[%s1804_s8 + $0x98] sm:$0xff] %v207_v19  ;;  %v211_v21 = vld [vmem:[%s1799_s7 + $0x148] sm:$0xff]  ;;  %v213_v22 = vld [vmem:[%s1799_s7 + $0x150] sm:$0xff] }
  0x23   : > { %210 = vst [vmem:[%s1804_s8 + $0xa0] sm:$0xff] %v209_v20  ;;  %v215_v23 = vld [vmem:[%s1799_s7 + $0x158] sm:$0xff]  ;;  %212 = vst [vmem:[%s1804_s8 + $0xa8] sm:$0xff] %v211_v21  ;;  %v217_v24 = vld [vmem:[%s1799_s7 + $0x180] sm:$0xff] }
  0x24   : > { %214 = vst [vmem:[%s1804_s8 + $0xb0] sm:$0xff] %v213_v22  ;;  %216 = vst [vmem:[%s1804_s8 + $0xb8] sm:$0xff] %v215_v23  ;;  %v219_v25 = vld [vmem:[%s1799_s7 + $0x188] sm:$0xff]  ;;  %v221_v26 = vld [vmem:[%s1799_s7 + $0x190] sm:$0xff] }
  0x25   : > { %218 = vst [vmem:[%s1804_s8 + $0xc0] sm:$0xff] %v217_v24  ;;  %220 = vst [vmem:[%s1804_s8 + $0xc8] sm:$0xff] %v219_v25  ;;  %v223_v27 = vld [vmem:[%s1799_s7 + $0x198] sm:$0xff]  ;;  %v225_v28 = vld [vmem:[%s1799_s7 + $0x1c0] sm:$0xff] }
  0x26   : > { %222 = vst [vmem:[%s1804_s8 + $0xd0] sm:$0xff] %v221_v26  ;;  %v227_v29 = vld [vmem:[%s1799_s7 + $0x1c8] sm:$0xff]  ;;  %224 = vst [vmem:[%s1804_s8 + $0xd8] sm:$0xff] %v223_v27  ;;  %v229_v30 = vld [vmem:[%s1799_s7 + $0x1d0] sm:$0xff] }
  0x27   : > { %226 = vst [vmem:[%s1804_s8 + $0xe0] sm:$0xff] %v225_v28  ;;  %228 = vst [vmem:[%s1804_s8 + $0xe8] sm:$0xff] %v227_v29  ;;  %v231_v31 = vld [vmem:[%s1799_s7 + $0x1d8] sm:$0xff]  ;;  %v233_v32 = vld [vmem:[%s1799_s7 + $0x200] sm:$0xff] }
  0x28   : > { %230 = vst [vmem:[%s1804_s8 + $0xf0] sm:$0xff] %v229_v30  ;;  %232 = vst [vmem:[%s1804_s8 + $0xf8] sm:$0xff] %v231_v31  ;;  %v235_v33 = vld [vmem:[%s1799_s7 + $0x208] sm:$0xff]  ;;  %v237_v34 = vld [vmem:[%s1799_s7 + $0x210] sm:$0xff] }
  0x29   : > { %234 = vst [vmem:[%s1804_s8 + $0x100] sm:$0xff] %v233_v32  ;;  %v239_v35 = vld [vmem:[%s1799_s7 + $0x218] sm:$0xff]  ;;  %236 = vst [vmem:[%s1804_s8 + $0x108] sm:$0xff] %v235_v33  ;;  %v241_v36 = vld [vmem:[%s1799_s7 + $0x240] sm:$0xff] }
  0x2a   : > { %238 = vst [vmem:[%s1804_s8 + $0x110] sm:$0xff] %v237_v34  ;;  %240 = vst [vmem:[%s1804_s8 + $0x118] sm:$0xff] %v239_v35  ;;  %v243_v37 = vld [vmem:[%s1799_s7 + $0x248] sm:$0xff]  ;;  %v245_v38 = vld [vmem:[%s1799_s7 + $0x250] sm:$0xff] }
  0x2b   : > { %242 = vst [vmem:[%s1804_s8 + $0x120] sm:$0xff] %v241_v36  ;;  %244 = vst [vmem:[%s1804_s8 + $0x128] sm:$0xff] %v243_v37  ;;  %v247_v39 = vld [vmem:[%s1799_s7 + $0x258] sm:$0xff]  ;;  %v249_v40 = vld [vmem:[%s1799_s7 + $0x280] sm:$0xff] }
  0x2c   : > { %246 = vst [vmem:[%s1804_s8 + $0x130] sm:$0xff] %v245_v38  ;;  %v251_v41 = vld [vmem:[%s1799_s7 + $0x288] sm:$0xff]  ;;  %248 = vst [vmem:[%s1804_s8 + $0x138] sm:$0xff] %v247_v39  ;;  %v253_v42 = vld [vmem:[%s1799_s7 + $0x290] sm:$0xff] }
  0x2d   : > { %250 = vst [vmem:[%s1804_s8 + $0x140] sm:$0xff] %v249_v40  ;;  %252 = vst [vmem:[%s1804_s8 + $0x148] sm:$0xff] %v251_v41  ;;  %v255_v43 = vld [vmem:[%s1799_s7 + $0x298] sm:$0xff]  ;;  %v257_v44 = vld [vmem:[%s1799_s7 + $0x2c0] sm:$0xff] }
  0x2e   : > { %254 = vst [vmem:[%s1804_s8 + $0x150] sm:$0xff] %v253_v42  ;;  %256 = vst [vmem:[%s1804_s8 + $0x158] sm:$0xff] %v255_v43  ;;  %v259_v45 = vld [vmem:[%s1799_s7 + $0x2c8] sm:$0xff]  ;;  %v261_v46 = vld [vmem:[%s1799_s7 + $0x2d0] sm:$0xff] }
  0x2f   : > { %258 = vst [vmem:[%s1804_s8 + $0x160] sm:$0xff] %v257_v44  ;;  %v263_v47 = vld [vmem:[%s1799_s7 + $0x2d8] sm:$0xff]  ;;  %260 = vst [vmem:[%s1804_s8 + $0x168] sm:$0xff] %v259_v45  ;;  %v265_v48 = vld [vmem:[%s1799_s7 + $0x300] sm:$0xff] }
  0x30   : > { %262 = vst [vmem:[%s1804_s8 + $0x170] sm:$0xff] %v261_v46  ;;  %264 = vst [vmem:[%s1804_s8 + $0x178] sm:$0xff] %v263_v47  ;;  %v267_v49 = vld [vmem:[%s1799_s7 + $0x308] sm:$0xff]  ;;  %v269_v50 = vld [vmem:[%s1799_s7 + $0x310] sm:$0xff] }
  0x31   : > { %266 = vst [vmem:[%s1804_s8 + $0x180] sm:$0xff] %v265_v48  ;;  %268 = vst [vmem:[%s1804_s8 + $0x188] sm:$0xff] %v267_v49  ;;  %v271_v51 = vld [vmem:[%s1799_s7 + $0x318] sm:$0xff]  ;;  %v273_v52 = vld [vmem:[%s1799_s7 + $0x340] sm:$0xff] }
  0x32   : > { %270 = vst [vmem:[%s1804_s8 + $0x190] sm:$0xff] %v269_v50  ;;  %v275_v53 = vld [vmem:[%s1799_s7 + $0x348] sm:$0xff]  ;;  %272 = vst [vmem:[%s1804_s8 + $0x198] sm:$0xff] %v271_v51  ;;  %v277_v54 = vld [vmem:[%s1799_s7 + $0x350] sm:$0xff] }
  0x33   : > { %274 = vst [vmem:[%s1804_s8 + $0x1a0] sm:$0xff] %v273_v52  ;;  %276 = vst [vmem:[%s1804_s8 + $0x1a8] sm:$0xff] %v275_v53  ;;  %v279_v55 = vld [vmem:[%s1799_s7 + $0x358] sm:$0xff]  ;;  %v281_v56 = vld [vmem:[%s1799_s7 + $0x380] sm:$0xff] }
  0x34   : > { %278 = vst [vmem:[%s1804_s8 + $0x1b0] sm:$0xff] %v277_v54  ;;  %280 = vst [vmem:[%s1804_s8 + $0x1b8] sm:$0xff] %v279_v55  ;;  %v283_v57 = vld [vmem:[%s1799_s7 + $0x388] sm:$0xff]  ;;  %v285_v58 = vld [vmem:[%s1799_s7 + $0x390] sm:$0xff] }
  0x35   : > { %282 = vst [vmem:[%s1804_s8 + $0x1c0] sm:$0xff] %v281_v56  ;;  %v287_v59 = vld [vmem:[%s1799_s7 + $0x398] sm:$0xff]  ;;  %284 = vst [vmem:[%s1804_s8 + $0x1c8] sm:$0xff] %v283_v57  ;;  %v289_v60 = vld [vmem:[%s1799_s7 + $0x3c0] sm:$0xff] }
  0x36   : > { %286 = vst [vmem:[%s1804_s8 + $0x1d0] sm:$0xff] %v285_v58  ;;  %288 = vst [vmem:[%s1804_s8 + $0x1d8] sm:$0xff] %v287_v59  ;;  %v291_v61 = vld [vmem:[%s1799_s7 + $0x3c8] sm:$0xff]  ;;  %v293_v62 = vld [vmem:[%s1799_s7 + $0x3d0] sm:$0xff] }
  0x37   : > { %290 = vst [vmem:[%s1804_s8 + $0x1e0] sm:$0xff] %v289_v60  ;;  %292 = vst [vmem:[%s1804_s8 + $0x1e8] sm:$0xff] %v291_v61  ;;  %v295_v63 = vld [vmem:[%s1799_s7 + $0x3d8] sm:$0xff]  ;;  %v297_v0 = vld [vmem:[%s1799_s7 + $0x400] sm:$0xff] }
  0x38   : > { %294 = vst [vmem:[%s1804_s8 + $0x1f0] sm:$0xff] %v293_v62  ;;  %v299_v1 = vld [vmem:[%s1799_s7 + $0x408] sm:$0xff]  ;;  %296 = vst [vmem:[%s1804_s8 + $0x1f8] sm:$0xff] %v295_v63  ;;  %v301_v2 = vld [vmem:[%s1799_s7 + $0x410] sm:$0xff] }
  0x39   : > { %298 = vst [vmem:[%s1804_s8 + $0x200] sm:$0xff] %v297_v0  ;;  %300 = vst [vmem:[%s1804_s8 + $0x208] sm:$0xff] %v299_v1  ;;  %v303_v3 = vld [vmem:[%s1799_s7 + $0x418] sm:$0xff]  ;;  %v305_v4 = vld [vmem:[%s1799_s7 + $0x440] sm:$0xff] }
  0x3a   : > { %302 = vst [vmem:[%s1804_s8 + $0x210] sm:$0xff] %v301_v2  ;;  %304 = vst [vmem:[%s1804_s8 + $0x218] sm:$0xff] %v303_v3  ;;  %v307_v5 = vld [vmem:[%s1799_s7 + $0x448] sm:$0xff]  ;;  %v309_v6 = vld [vmem:[%s1799_s7 + $0x450] sm:$0xff] }
  0x3b   : > { %306 = vst [vmem:[%s1804_s8 + $0x220] sm:$0xff] %v305_v4  ;;  %v311_v7 = vld [vmem:[%s1799_s7 + $0x458] sm:$0xff]  ;;  %308 = vst [vmem:[%s1804_s8 + $0x228] sm:$0xff] %v307_v5  ;;  %v313_v8 = vld [vmem:[%s1799_s7 + $0x480] sm:$0xff] }
  0x3c   : > { %310 = vst [vmem:[%s1804_s8 + $0x230] sm:$0xff] %v309_v6  ;;  %312 = vst [vmem:[%s1804_s8 + $0x238] sm:$0xff] %v311_v7  ;;  %v315_v9 = vld [vmem:[%s1799_s7 + $0x488] sm:$0xff]  ;;  %v317_v10 = vld [vmem:[%s1799_s7 + $0x490] sm:$0xff] }
  0x3d   : > { %314 = vst [vmem:[%s1804_s8 + $0x240] sm:$0xff] %v313_v8  ;;  %316 = vst [vmem:[%s1804_s8 + $0x248] sm:$0xff] %v315_v9  ;;  %v319_v11 = vld [vmem:[%s1799_s7 + $0x498] sm:$0xff]  ;;  %v321_v12 = vld [vmem:[%s1799_s7 + $0x4c0] sm:$0xff] }
  0x3e   : > { %318 = vst [vmem:[%s1804_s8 + $0x250] sm:$0xff] %v317_v10  ;;  %v323_v13 = vld [vmem:[%s1799_s7 + $0x4c8] sm:$0xff]  ;;  %320 = vst [vmem:[%s1804_s8 + $0x258] sm:$0xff] %v319_v11  ;;  %v325_v14 = vld [vmem:[%s1799_s7 + $0x4d0] sm:$0xff] }
  0x3f   : > { %322 = vst [vmem:[%s1804_s8 + $0x260] sm:$0xff] %v321_v12  ;;  %324 = vst [vmem:[%s1804_s8 + $0x268] sm:$0xff] %v323_v13  ;;  %v327_v15 = vld [vmem:[%s1799_s7 + $0x4d8] sm:$0xff]  ;;  %v329_v16 = vld [vmem:[%s1799_s7 + $0x500] sm:$0xff] }
  0x40   : > { %326 = vst [vmem:[%s1804_s8 + $0x270] sm:$0xff] %v325_v14  ;;  %328 = vst [vmem:[%s1804_s8 + $0x278] sm:$0xff] %v327_v15  ;;  %v331_v17 = vld [vmem:[%s1799_s7 + $0x508] sm:$0xff]  ;;  %v333_v18 = vld [vmem:[%s1799_s7 + $0x510] sm:$0xff] }
  0x41   : > { %330 = vst [vmem:[%s1804_s8 + $0x280] sm:$0xff] %v329_v16  ;;  %v335_v19 = vld [vmem:[%s1799_s7 + $0x518] sm:$0xff]  ;;  %332 = vst [vmem:[%s1804_s8 + $0x288] sm:$0xff] %v331_v17  ;;  %v337_v20 = vld [vmem:[%s1799_s7 + $0x540] sm:$0xff] }
  0x42   : > { %334 = vst [vmem:[%s1804_s8 + $0x290] sm:$0xff] %v333_v18  ;;  %336 = vst [vmem:[%s1804_s8 + $0x298] sm:$0xff] %v335_v19  ;;  %v339_v21 = vld [vmem:[%s1799_s7 + $0x548] sm:$0xff]  ;;  %v341_v22 = vld [vmem:[%s1799_s7 + $0x550] sm:$0xff] }
  0x43   : > { %338 = vst [vmem:[%s1804_s8 + $0x2a0] sm:$0xff] %v337_v20  ;;  %340 = vst [vmem:[%s1804_s8 + $0x2a8] sm:$0xff] %v339_v21  ;;  %v343_v23 = vld [vmem:[%s1799_s7 + $0x558] sm:$0xff]  ;;  %v345_v24 = vld [vmem:[%s1799_s7 + $0x580] sm:$0xff] }
  0x44   : > { %342 = vst [vmem:[%s1804_s8 + $0x2b0] sm:$0xff] %v341_v22  ;;  %v347_v25 = vld [vmem:[%s1799_s7 + $0x588] sm:$0xff]  ;;  %344 = vst [vmem:[%s1804_s8 + $0x2b8] sm:$0xff] %v343_v23  ;;  %v349_v26 = vld [vmem:[%s1799_s7 + $0x590] sm:$0xff] }
  0x45   : > { %346 = vst [vmem:[%s1804_s8 + $0x2c0] sm:$0xff] %v345_v24  ;;  %348 = vst [vmem:[%s1804_s8 + $0x2c8] sm:$0xff] %v347_v25  ;;  %v351_v27 = vld [vmem:[%s1799_s7 + $0x598] sm:$0xff]  ;;  %v353_v28 = vld [vmem:[%s1799_s7 + $0x5c0] sm:$0xff] }
  0x46   : > { %350 = vst [vmem:[%s1804_s8 + $0x2d0] sm:$0xff] %v349_v26  ;;  %352 = vst [vmem:[%s1804_s8 + $0x2d8] sm:$0xff] %v351_v27  ;;  %v355_v29 = vld [vmem:[%s1799_s7 + $0x5c8] sm:$0xff]  ;;  %v357_v30 = vld [vmem:[%s1799_s7 + $0x5d0] sm:$0xff] }
  0x47   : > { %354 = vst [vmem:[%s1804_s8 + $0x2e0] sm:$0xff] %v353_v28  ;;  %v359_v31 = vld [vmem:[%s1799_s7 + $0x5d8] sm:$0xff]  ;;  %356 = vst [vmem:[%s1804_s8 + $0x2e8] sm:$0xff] %v355_v29  ;;  %v361_v32 = vld [vmem:[%s1799_s7 + $0x600] sm:$0xff] }
  0x48   : > { %358 = vst [vmem:[%s1804_s8 + $0x2f0] sm:$0xff] %v357_v30  ;;  %360 = vst [vmem:[%s1804_s8 + $0x2f8] sm:$0xff] %v359_v31  ;;  %v363_v33 = vld [vmem:[%s1799_s7 + $0x608] sm:$0xff]  ;;  %v365_v34 = vld [vmem:[%s1799_s7 + $0x610] sm:$0xff] }
  0x49   : > { %362 = vst [vmem:[%s1804_s8 + $0x300] sm:$0xff] %v361_v32  ;;  %364 = vst [vmem:[%s1804_s8 + $0x308] sm:$0xff] %v363_v33  ;;  %v367_v35 = vld [vmem:[%s1799_s7 + $0x618] sm:$0xff]  ;;  %v369_v36 = vld [vmem:[%s1799_s7 + $0x640] sm:$0xff] }
  0x4a   : > { %366 = vst [vmem:[%s1804_s8 + $0x310] sm:$0xff] %v365_v34  ;;  %v371_v37 = vld [vmem:[%s1799_s7 + $0x648] sm:$0xff]  ;;  %368 = vst [vmem:[%s1804_s8 + $0x318] sm:$0xff] %v367_v35  ;;  %v373_v38 = vld [vmem:[%s1799_s7 + $0x650] sm:$0xff] }
  0x4b   : > { %370 = vst [vmem:[%s1804_s8 + $0x320] sm:$0xff] %v369_v36  ;;  %372 = vst [vmem:[%s1804_s8 + $0x328] sm:$0xff] %v371_v37  ;;  %v375_v39 = vld [vmem:[%s1799_s7 + $0x658] sm:$0xff]  ;;  %v377_v40 = vld [vmem:[%s1799_s7 + $0x680] sm:$0xff] }
  0x4c   : > { %374 = vst [vmem:[%s1804_s8 + $0x330] sm:$0xff] %v373_v38  ;;  %376 = vst [vmem:[%s1804_s8 + $0x338] sm:$0xff] %v375_v39  ;;  %v379_v41 = vld [vmem:[%s1799_s7 + $0x688] sm:$0xff]  ;;  %v381_v42 = vld [vmem:[%s1799_s7 + $0x690] sm:$0xff] }
  0x4d   : > { %378 = vst [vmem:[%s1804_s8 + $0x340] sm:$0xff] %v377_v40  ;;  %v383_v43 = vld [vmem:[%s1799_s7 + $0x698] sm:$0xff]  ;;  %380 = vst [vmem:[%s1804_s8 + $0x348] sm:$0xff] %v379_v41  ;;  %v385_v44 = vld [vmem:[%s1799_s7 + $0x6c0] sm:$0xff] }
  0x4e   : > { %382 = vst [vmem:[%s1804_s8 + $0x350] sm:$0xff] %v381_v42  ;;  %384 = vst [vmem:[%s1804_s8 + $0x358] sm:$0xff] %v383_v43  ;;  %v387_v45 = vld [vmem:[%s1799_s7 + $0x6c8] sm:$0xff]  ;;  %v389_v46 = vld [vmem:[%s1799_s7 + $0x6d0] sm:$0xff] }
  0x4f   : > { %386 = vst [vmem:[%s1804_s8 + $0x360] sm:$0xff] %v385_v44  ;;  %388 = vst [vmem:[%s1804_s8 + $0x368] sm:$0xff] %v387_v45  ;;  %v391_v47 = vld [vmem:[%s1799_s7 + $0x6d8] sm:$0xff]  ;;  %v393_v48 = vld [vmem:[%s1799_s7 + $0x700] sm:$0xff] }
  0x50   : > { %390 = vst [vmem:[%s1804_s8 + $0x370] sm:$0xff] %v389_v46  ;;  %v395_v49 = vld [vmem:[%s1799_s7 + $0x708] sm:$0xff]  ;;  %392 = vst [vmem:[%s1804_s8 + $0x378] sm:$0xff] %v391_v47  ;;  %v397_v50 = vld [vmem:[%s1799_s7 + $0x710] sm:$0xff] }
  0x51   : > { %394 = vst [vmem:[%s1804_s8 + $0x380] sm:$0xff] %v393_v48  ;;  %396 = vst [vmem:[%s1804_s8 + $0x388] sm:$0xff] %v395_v49  ;;  %v399_v51 = vld [vmem:[%s1799_s7 + $0x718] sm:$0xff]  ;;  %v401_v52 = vld [vmem:[%s1799_s7 + $0x740] sm:$0xff] }
  0x52   : > { %398 = vst [vmem:[%s1804_s8 + $0x390] sm:$0xff] %v397_v50  ;;  %400 = vst [vmem:[%s1804_s8 + $0x398] sm:$0xff] %v399_v51  ;;  %v403_v53 = vld [vmem:[%s1799_s7 + $0x748] sm:$0xff]  ;;  %v405_v54 = vld [vmem:[%s1799_s7 + $0x750] sm:$0xff] }
  0x53   : > { %402 = vst [vmem:[%s1804_s8 + $0x3a0] sm:$0xff] %v401_v52  ;;  %v407_v55 = vld [vmem:[%s1799_s7 + $0x758] sm:$0xff]  ;;  %404 = vst [vmem:[%s1804_s8 + $0x3a8] sm:$0xff] %v403_v53  ;;  %v409_v56 = vld [vmem:[%s1799_s7 + $0x780] sm:$0xff] }
  0x54   : > { %406 = vst [vmem:[%s1804_s8 + $0x3b0] sm:$0xff] %v405_v54  ;;  %408 = vst [vmem:[%s1804_s8 + $0x3b8] sm:$0xff] %v407_v55  ;;  %v411_v57 = vld [vmem:[%s1799_s7 + $0x788] sm:$0xff]  ;;  %v413_v58 = vld [vmem:[%s1799_s7 + $0x790] sm:$0xff] }
  0x55   : > { %410 = vst [vmem:[%s1804_s8 + $0x3c0] sm:$0xff] %v409_v56  ;;  %412 = vst [vmem:[%s1804_s8 + $0x3c8] sm:$0xff] %v411_v57  ;;  %v415_v59 = vld [vmem:[%s1799_s7 + $0x798] sm:$0xff]  ;;  %v417_v60 = vld [vmem:[%s1799_s7 + $0x7c0] sm:$0xff] }
  0x56   : > { %414 = vst [vmem:[%s1804_s8 + $0x3d0] sm:$0xff] %v413_v58  ;;  %v419_v61 = vld [vmem:[%s1799_s7 + $0x7c8] sm:$0xff]  ;;  %416 = vst [vmem:[%s1804_s8 + $0x3d8] sm:$0xff] %v415_v59  ;;  %v421_v62 = vld [vmem:[%s1799_s7 + $0x7d0] sm:$0xff] }
  0x57   : > { %418 = vst [vmem:[%s1804_s8 + $0x3e0] sm:$0xff] %v417_v60  ;;  %420 = vst [vmem:[%s1804_s8 + $0x3e8] sm:$0xff] %v419_v61  ;;  %v423_v63 = vld [vmem:[%s1799_s7 + $0x7d8] sm:$0xff] }
  0x58   : > { %422 = vst [vmem:[%s1804_s8 + $0x3f0] sm:$0xff] %v421_v62  ;;  %424 = vst [vmem:[%s1804_s8 + $0x3f8] sm:$0xff] %v423_v63 }
  0x59 PF: > { %p1495_p7 = scmp.ge.s32.totalorder %s1715_s18, 1  ;;  %p438_p8 = scmp.lt.s32.totalorder %s1715_s18, 9 }
  0x5b   : > { %p439_p9 = pnand %p1495_p7, %p438_p8 }
  0x5c   : > { %s445_s9 = sand.u32 (!%p439_p9), 1, %s1691_s12   ;;  %s1497_s10 = sshll.u32 (!%p439_p9), %s1703_s15, 5 }
  0x5d   : > { %442 = sbr.rel (%p439_p9) target bundleno = 538 (0x21a), region = 51  ;;  %s1496_s11 = sshll.u32 (!%p439_p9), %s445_s9, 10 }
  0x5e   : > { %p476_p10 = scmp.lt.s32.totalorder (!%p439_p9), %s1497_s10, 127  ;;  %s2073_s29 = scalar_lea.vmem (!%p439_p9), [#allocation3], %s1496_s11 }
  0x5f   : > { %p1501_p11 = scmp.ne.s32.totalorder (!%p439_p9), %s1699_s14, 0 }
  0x64   : > { %s2409_s10 = smov (!%p476_p10, %s1497_s10), 127  ;;  %490 = sbr.rel (%p1501_p11) target bundleno = 118 (0x76), region = 59 }
  0x65   : > { %s1498_s21 = sshll.u32 %s2409_s10, 3  ;;  %v1717_v0 = vmov (!%p1501_p11), 0.0  }
  0x66   : > { %s2066_s24 = scalar_lea.vmem %s2394_s2, %s1498_s21  ;;  %s2071_s28 = scalar_lea.vmem %s2395_s3, %s1498_s21  ;;  %491 = vst [vmem:[#allocation2] sm:$0xff] (!%p1501_p11), %v1717_v0  ;;  %492 = vst [vmem:[#allocation2 + $0x8] sm:$0xff] (!%p1501_p11), %v1717_v0 }
  0x67   : > { %493 = vst [vmem:[#allocation2 + $0x10] sm:$0xff] (!%p1501_p11), %v1717_v0  ;;  %494 = vst [vmem:[#allocation2 + $0x18] sm:$0xff] (!%p1501_p11), %v1717_v0 }
  0x68   : > { %495 = vst [vmem:[#allocation2 + $0x20] sm:$0xff] (!%p1501_p11), %v1717_v0  ;;  %496 = vst [vmem:[#allocation2 + $0x28] sm:$0xff] (!%p1501_p11), %v1717_v0 }
  0x69   : > { %497 = vst [vmem:[#allocation2 + $0x30] sm:$0xff] (!%p1501_p11), %v1717_v0  ;;  %498 = vst [vmem:[#allocation2 + $0x38] sm:$0xff] (!%p1501_p11), %v1717_v0 }
  0x6a   : > { %499 = vst [vmem:[#allocation2 + $0x40] sm:$0xff] (!%p1501_p11), %v1717_v0  ;;  %500 = vst [vmem:[#allocation2 + $0x48] sm:$0xff] (!%p1501_p11), %v1717_v0 }
  0x6b   : > { %501 = vst [vmem:[#allocation2 + $0x50] sm:$0xff] %v1717_v0  ;;  %502 = vst [vmem:[#allocation2 + $0x58] sm:$0xff] %v1717_v0 }
  0x6c   : > { %503 = vst [vmem:[#allocation2 + $0x60] sm:$0xff] %v1717_v0  ;;  %504 = vst [vmem:[#allocation2 + $0x68] sm:$0xff] %v1717_v0 }
  0x6d   : > { %505 = vst [vmem:[#allocation2 + $0x70] sm:$0xff] %v1717_v0  ;;  %506 = vst [vmem:[#allocation2 + $0x78] sm:$0xff] %v1717_v0 }
  0x6e   : > { %507 = vst [vmem:[#allocation2 + $0x80] sm:$0xff] %v1717_v0  ;;  %508 = vst [vmem:[#allocation2 + $0x88] sm:$0xff] %v1717_v0 }
  0x6f   : > { %509 = vst [vmem:[#allocation2 + $0x90] sm:$0xff] %v1717_v0  ;;  %510 = vst [vmem:[#allocation2 + $0x98] sm:$0xff] %v1717_v0 }
  0x70   : > { %511 = vst [vmem:[#allocation2 + $0xa0] sm:$0xff] %v1717_v0  ;;  %512 = vst [vmem:[#allocation2 + $0xa8] sm:$0xff] %v1717_v0 }
  0x71   : > { %513 = vst [vmem:[#allocation2 + $0xb0] sm:$0xff] %v1717_v0  ;;  %514 = vst [vmem:[#allocation2 + $0xb8] sm:$0xff] %v1717_v0 }
  0x72   : > { %515 = vst [vmem:[#allocation2 + $0xc0] sm:$0xff] %v1717_v0  ;;  %516 = vst [vmem:[#allocation2 + $0xc8] sm:$0xff] %v1717_v0 }
  0x73   : > { %517 = vst [vmem:[#allocation2 + $0xd0] sm:$0xff] %v1717_v0  ;;  %518 = vst [vmem:[#allocation2 + $0xd8] sm:$0xff] %v1717_v0 }
  0x74   : > { %519 = vst [vmem:[#allocation2 + $0xe0] sm:$0xff] %v1717_v0  ;;  %520 = vst [vmem:[#allocation2 + $0xe8] sm:$0xff] %v1717_v0 }
  0x75   : > { %521 = vst [vmem:[#allocation2 + $0xf0] sm:$0xff] %v1717_v0  ;;  %522 = vst [vmem:[#allocation2 + $0xf8] sm:$0xff] %v1717_v0 }
  0x76 PF: > { %s1502_s12 = sshll.u32 %s1699_s14, 9  ;;  %v556_v1 = vld [vmem:[%s2073_s29 + $0x8] sm:$0xff]  ;;  %v558_v2 = vld [vmem:[%s2073_s29 + $0x18] sm:$0xff]  ;;  %v1718_v3 = vmov 0.0|0.0   ;;  %p1503_p12 = scmp.ne.s32.totalorder %s1699_s14, 1 }
  0x77   : > { %1507 = vmatprep.subr.bf16.mxu0 %v1718_v3  ;;  %1555 = vmatprep.subr.bf16.mxu1 %v1718_v3  ;;  %s2084_s4 = scalar_lea.vmem %s2393_s1, %s1502_s12 }
  0x78   : > { %v685_v4 = vld [vmem:[%s2084_s4] sm:$0xff]  ;;  %v686_v5 = vld [vmem:[%s2084_s4 + $0x8] sm:$0xff]  ;;  %813 = vmatprep.mubr.f32.mxu0 %v556_v1  ;;  %1038 = vmatprep.mubr.f32.mxu1 %v558_v2  ;;  %v687_v9 = vld [vmem:[%s2084_s4 + $0x10] sm:$0xff] }
  0x79   : > { %v717_v6 = vld [vmem:[%s2084_s4 + $0x100] sm:$0xff]  ;;  %v1508_v7 = vpack.c.bf16 %v686_v5, %v685_v4  ;;  %v718_v8 = vld [vmem:[%s2084_s4 + $0x108] sm:$0xff]  ;;  %v688_v10 = vld [vmem:[%s2084_s4 + $0x18] sm:$0xff] }
  0x7a   : > { %v1556_v11 = vpack.c.bf16 %v718_v8, %v717_v6  ;;  %v719_v12 = vld [vmem:[%s2084_s4 + $0x110] sm:$0xff]  ;;  %v720_v13 = vld [vmem:[%s2084_s4 + $0x118] sm:$0xff]  ;;  %v1511_v14 = vpack.c.bf16 %v688_v10, %v687_v9  ;;  %v689_v16 = vld [vmem:[%s2084_s4 + $0x20] sm:$0xff] }
  0x7b   : > { %1509 = vmatpush1.bf16.msra.mxu0 %v1508_v7  ;;  %v1559_v15 = vpack.c.bf16 %v720_v13, %v719_v12  ;;  %v690_v17 = vld [vmem:[%s2084_s4 + $0x28] sm:$0xff]  ;;  %v721_v18 = vld [vmem:[%s2084_s4 + $0x120] sm:$0xff]  ;;  %v691_v22 = vld [vmem:[%s2084_s4 + $0x30] sm:$0xff] }
  0x7c   : > { %1557 = vmatpush1.bf16.msra.mxu1 %v1556_v11  ;;  %1510 = vmatprep.subr.bf16.mxu0 %v1718_v3  ;;  %v722_v19 = vld [vmem:[%s2084_s4 + $0x128] sm:$0xff]  ;;  %v1514_v20 = vpack.c.bf16 %v690_v17, %v689_v16  ;;  %v692_v23 = vld [vmem:[%s2084_s4 + $0x38] sm:$0xff]  ;;  %v723_v24 = vld [vmem:[%s2084_s4 + $0x130] sm:$0xff] }
  0x7d   : > { %1558 = vmatprep.subr.bf16.mxu1 %v1718_v3  ;;  %v1562_v21 = vpack.c.bf16 %v722_v19, %v721_v18  ;;  %v724_v25 = vld [vmem:[%s2084_s4 + $0x138] sm:$0xff]  ;;  %v1517_v26 = vpack.c.bf16 %v692_v23, %v691_v22  ;;  %v693_v28 = vld [vmem:[%s2084_s4 + $0x40] sm:$0xff]  ;;  %v694_v29 = vld [vmem:[%s2084_s4 + $0x48] sm:$0xff] }
  0x7e   : > { %v1565_v27 = vpack.c.bf16 %v724_v25, %v723_v24  ;;  %v725_v30 = vld [vmem:[%s2084_s4 + $0x140] sm:$0xff]  ;;  %v726_v31 = vld [vmem:[%s2084_s4 + $0x148] sm:$0xff]  ;;  %v1520_v32 = vpack.c.bf16 %v694_v29, %v693_v28  ;;  %v695_v34 = vld [vmem:[%s2084_s4 + $0x50] sm:$0xff] }
  0x7f   : > { %1512 = vmatpush1.bf16.msra.mxu0 %v1511_v14  ;;  %v1568_v33 = vpack.c.bf16 %v726_v31, %v725_v30  ;;  %v696_v35 = vld [vmem:[%s2084_s4 + $0x58] sm:$0xff]  ;;  %v727_v36 = vld [vmem:[%s2084_s4 + $0x150] sm:$0xff]  ;;  %v697_v40 = vld [vmem:[%s2084_s4 + $0x60] sm:$0xff] }
  0x80   : > { %1560 = vmatpush1.bf16.msra.mxu1 %v1559_v15  ;;  %1513 = vmatprep.subr.bf16.mxu0 %v1718_v3  ;;  %v728_v37 = vld [vmem:[%s2084_s4 + $0x158] sm:$0xff]  ;;  %v1523_v38 = vpack.c.bf16 %v696_v35, %v695_v34  ;;  %v698_v41 = vld [vmem:[%s2084_s4 + $0x68] sm:$0xff]  ;;  %v729_v42 = vld [vmem:[%s2084_s4 + $0x160] sm:$0xff] }
  0x81   : > { %1561 = vmatprep.subr.bf16.mxu1 %v1718_v3  ;;  %v1571_v39 = vpack.c.bf16 %v728_v37, %v727_v36  ;;  %v730_v43 = vld [vmem:[%s2084_s4 + $0x168] sm:$0xff]  ;;  %v1526_v44 = vpack.c.bf16 %v698_v41, %v697_v40  ;;  %v699_v46 = vld [vmem:[%s2084_s4 + $0x70] sm:$0xff]  ;;  %v700_v47 = vld [vmem:[%s2084_s4 + $0x78] sm:$0xff] }
  0x82   : > { %v1574_v45 = vpack.c.bf16 %v730_v43, %v729_v42  ;;  %v731_v48 = vld [vmem:[%s2084_s4 + $0x170] sm:$0xff]  ;;  %v732_v49 = vld [vmem:[%s2084_s4 + $0x178] sm:$0xff]  ;;  %v1529_v50 = vpack.c.bf16 %v700_v47, %v699_v46  ;;  %v701_v52 = vld [vmem:[%s2084_s4 + $0x80] sm:$0xff] }
  0x83   : > { %1515 = vmatpush1.bf16.msra.mxu0 %v1514_v20  ;;  %v1577_v51 = vpack.c.bf16 %v732_v49, %v731_v48  ;;  %v702_v53 = vld [vmem:[%s2084_s4 + $0x88] sm:$0xff]  ;;  %v733_v54 = vld [vmem:[%s2084_s4 + $0x180] sm:$0xff]  ;;  %v703_v58 = vld [vmem:[%s2084_s4 + $0x90] sm:$0xff] }
  0x84   : > { %1563 = vmatpush1.bf16.msra.mxu1 %v1562_v21  ;;  %1516 = vmatprep.subr.bf16.mxu0 %v1718_v3  ;;  %v734_v55 = vld [vmem:[%s2084_s4 + $0x188] sm:$0xff]  ;;  %v1532_v56 = vpack.c.bf16 %v702_v53, %v701_v52  ;;  %v704_v59 = vld [vmem:[%s2084_s4 + $0x98] sm:$0xff]  ;;  %v735_v60 = vld [vmem:[%s2084_s4 + $0x190] sm:$0xff] }
  0x85   : > { %1564 = vmatprep.subr.bf16.mxu1 %v1718_v3  ;;  %v1580_v57 = vpack.c.bf16 %v734_v55, %v733_v54  ;;  %v736_v61 = vld [vmem:[%s2084_s4 + $0x198] sm:$0xff]  ;;  %v1535_v62 = vpack.c.bf16 %v704_v59, %v703_v58  ;;  %v705_v0 = vld [vmem:[%s2084_s4 + $0xa0] sm:$0xff]  ;;  %v706_v1 = vld [vmem:[%s2084_s4 + $0xa8] sm:$0xff] }
  0x86   : > { %v1583_v63 = vpack.c.bf16 %v736_v61, %v735_v60  ;;  %v737_v2 = vld [vmem:[%s2084_s4 + $0x1a0] sm:$0xff]  ;;  %v738_v4 = vld [vmem:[%s2084_s4 + $0x1a8] sm:$0xff]  ;;  %v1538_v5 = vpack.c.bf16 %v706_v1, %v705_v0  ;;  %v707_v7 = vld [vmem:[%s2084_s4 + $0xb0] sm:$0xff] }
  0x87   : > { %1518 = vmatpush1.bf16.msra.mxu0 %v1517_v26  ;;  %v1586_v6 = vpack.c.bf16 %v738_v4, %v737_v2  ;;  %v708_v8 = vld [vmem:[%s2084_s4 + $0xb8] sm:$0xff]  ;;  %v739_v9 = vld [vmem:[%s2084_s4 + $0x1b0] sm:$0xff]  ;;  %v709_v13 = vld [vmem:[%s2084_s4 + $0xc0] sm:$0xff] }
  0x88   : > { %1566 = vmatpush1.bf16.msra.mxu1 %v1565_v27  ;;  %1519 = vmatprep.subr.bf16.mxu0 %v1718_v3  ;;  %v740_v10 = vld [vmem:[%s2084_s4 + $0x1b8] sm:$0xff]  ;;  %v1541_v11 = vpack.c.bf16 %v708_v8, %v707_v7  ;;  %v710_v14 = vld [vmem:[%s2084_s4 + $0xc8] sm:$0xff]  ;;  %v741_v15 = vld [vmem:[%s2084_s4 + $0x1c0] sm:$0xff] }
  0x89   : > { %1567 = vmatprep.subr.bf16.mxu1 %v1718_v3  ;;  %v1589_v12 = vpack.c.bf16 %v740_v10, %v739_v9  ;;  %v742_v16 = vld [vmem:[%s2084_s4 + $0x1c8] sm:$0xff]  ;;  %v1544_v17 = vpack.c.bf16 %v710_v14, %v709_v13  ;;  %v711_v19 = vld [vmem:[%s2084_s4 + $0xd0] sm:$0xff]  ;;  %v712_v20 = vld [vmem:[%s2084_s4 + $0xd8] sm:$0xff] }
  0x8a   : > { %v1592_v18 = vpack.c.bf16 %v742_v16, %v741_v15  ;;  %v743_v21 = vld [vmem:[%s2084_s4 + $0x1d0] sm:$0xff]  ;;  %v744_v22 = vld [vmem:[%s2084_s4 + $0x1d8] sm:$0xff]  ;;  %v1547_v23 = vpack.c.bf16 %v712_v20, %v711_v19  ;;  %v713_v25 = vld [vmem:[%s2084_s4 + $0xe0] sm:$0xff] }
  0x8b   : > { %1521 = vmatpush1.bf16.msra.mxu0 %v1520_v32  ;;  %v1595_v24 = vpack.c.bf16 %v744_v22, %v743_v21  ;;  %v714_v26 = vld [vmem:[%s2084_s4 + $0xe8] sm:$0xff]  ;;  %v745_v27 = vld [vmem:[%s2084_s4 + $0x1e0] sm:$0xff]  ;;  %v715_v31 = vld [vmem:[%s2084_s4 + $0xf0] sm:$0xff] }
  0x8c   : > { %1569 = vmatpush1.bf16.msra.mxu1 %v1568_v33  ;;  %1522 = vmatprep.subr.bf16.mxu0 %v1718_v3  ;;  %v746_v28 = vld [vmem:[%s2084_s4 + $0x1e8] sm:$0xff]  ;;  %v1550_v29 = vpack.c.bf16 %v714_v26, %v713_v25  ;;  %v716_v32 = vld [vmem:[%s2084_s4 + $0xf8] sm:$0xff]  ;;  %v747_v33 = vld [vmem:[%s2084_s4 + $0x1f0] sm:$0xff] }
  0x8d   : > { %1570 = vmatprep.subr.bf16.mxu1 %v1718_v3  ;;  %v1598_v30 = vpack.c.bf16 %v746_v28, %v745_v27  ;;  %v748_v34 = vld [vmem:[%s2084_s4 + $0x1f8] sm:$0xff]  ;;  %v1553_v35 = vpack.c.bf16 %v716_v32, %v715_v31  ;;  %v555_v37 = vld [vmem:[%s2073_s29] sm:$0xff]  ;;  %v561_v42 = vld [vmem:[%s2073_s29 + $0x30] sm:$0xff] }
  0x8e   : > { %v1601_v36 = vpack.c.bf16 %v748_v34, %v747_v33  ;;  %v562_v40 = vld [vmem:[%s2073_s29 + $0x38] sm:$0xff]  ;;  %v559_v41 = vld [vmem:[%s2073_s29 + $0x20] sm:$0xff]  ;;  %v564_v43 = vld [vmem:[%s2073_s29 + $0x48] sm:$0xff] }
  0x8f   : > { %1524 = vmatpush1.bf16.msra.mxu0 %v1523_v38  ;;  %v557_v38 = vld [vmem:[%s2073_s29 + $0x10] sm:$0xff]  ;;  %v568_v46 = vld [vmem:[%s2073_s29 + $0x68] sm:$0xff]  ;;  %v570_v47 = vld [vmem:[%s2073_s29 + $0x78] sm:$0xff] }
  0x90   : > { %1572 = vmatpush1.bf16.msra.mxu1 %v1571_v39  ;;  %1525 = vmatprep.subr.bf16.mxu0 %v1718_v3  ;;  %v560_v39 = vld [vmem:[%s2073_s29 + $0x28] sm:$0xff]  ;;  %v567_v48 = vld [vmem:[%s2073_s29 + $0x60] sm:$0xff]  ;;  %v569_v49 = vld [vmem:[%s2073_s29 + $0x70] sm:$0xff] }
  0x91   : > { %1573 = vmatprep.subr.bf16.mxu1 %v1718_v3  ;;  %v571_v52 = vld [vmem:[%s2073_s29 + $0x80] sm:$0xff]  ;;  %v573_v53 = vld [vmem:[%s2073_s29 + $0x90] sm:$0xff]  ;;  %v576_v54 = vld [vmem:[%s2073_s29 + $0xa8] sm:$0xff] }
  0x92   : > { %v578_v55 = vld [vmem:[%s2073_s29 + $0xb8] sm:$0xff]  ;;  %v580_v58 = vld [vmem:[%s2073_s29 + $0xc8] sm:$0xff]  ;;  %v579_v60 = vld [vmem:[%s2073_s29 + $0xc0] sm:$0xff] }
  0x93   : > { %1527 = vmatpush1.bf16.msra.mxu0 %v1526_v44  ;;  %v563_v44 = vld [vmem:[%s2073_s29 + $0x40] sm:$0xff]  ;;  %v582_v59 = vld [vmem:[%s2073_s29 + $0xd8] sm:$0xff]  ;;  %v581_v61 = vld [vmem:[%s2073_s29 + $0xd0] sm:$0xff] }
  0x94   : > { %1575 = vmatpush1.bf16.msra.mxu1 %v1574_v45  ;;  %1528 = vmatprep.subr.bf16.mxu0 %v1718_v3  ;;  %v565_v45 = vld [vmem:[%s2073_s29 + $0x50] sm:$0xff]  ;;  %v583_v0 = vld [vmem:[%s2073_s29 + $0xe0] sm:$0xff]  ;;  %v588_v2 = vld [vmem:[%s2073_s29 + $0x108] sm:$0xff] }
  0x95   : > { %1576 = vmatprep.subr.bf16.mxu1 %v1718_v3  ;;  %v585_v1 = vld [vmem:[%s2073_s29 + $0xf0] sm:$0xff]  ;;  %v590_v4 = vld [vmem:[%s2073_s29 + $0x118] sm:$0xff]  ;;  %v592_v7 = vld [vmem:[%s2073_s29 + $0x128] sm:$0xff] }
  0x96   : > { %v594_v8 = vld [vmem:[%s2073_s29 + $0x138] sm:$0xff]  ;;  %v591_v9 = vld [vmem:[%s2073_s29 + $0x120] sm:$0xff]  ;;  %v593_v10 = vld [vmem:[%s2073_s29 + $0x130] sm:$0xff] }
  0x97   : > { %1530 = vmatpush1.bf16.msra.mxu0 %v1529_v50  ;;  %v572_v50 = vld [vmem:[%s2073_s29 + $0x88] sm:$0xff]  ;;  %v595_v13 = vld [vmem:[%s2073_s29 + $0x140] sm:$0xff]  ;;  %v597_v14 = vld [vmem:[%s2073_s29 + $0x150] sm:$0xff] }
  0x98   : > { %1578 = vmatpush1.bf16.msra.mxu1 %v1577_v51  ;;  %1531 = vmatprep.subr.bf16.mxu0 %v1718_v3  ;;  %v574_v51 = vld [vmem:[%s2073_s29 + $0x98] sm:$0xff]  ;;  %v600_v15 = vld [vmem:[%s2073_s29 + $0x168] sm:$0xff]  ;;  %v603_v21 = vld [vmem:[%s2073_s29 + $0x180] sm:$0xff] }
  0x99   : > { %1579 = vmatprep.subr.bf16.mxu1 %v1718_v3  ;;  %v602_v16 = vld [vmem:[%s2073_s29 + $0x178] sm:$0xff]  ;;  %v604_v19 = vld [vmem:[%s2073_s29 + $0x188] sm:$0xff]  ;;  %v605_v22 = vld [vmem:[%s2073_s29 + $0x190] sm:$0xff] }
  0x9a   : > { %v606_v20 = vld [vmem:[%s2073_s29 + $0x198] sm:$0xff]  ;;  %v607_v25 = vld [vmem:[%s2073_s29 + $0x1a0] sm:$0xff]  ;;  %v609_v26 = vld [vmem:[%s2073_s29 + $0x1b0] sm:$0xff] }
  0x9b   : > { %1533 = vmatpush1.bf16.msra.mxu0 %v1532_v56  ;;  %v575_v56 = vld [vmem:[%s2073_s29 + $0xa0] sm:$0xff]  ;;  %v612_v27 = vld [vmem:[%s2073_s29 + $0x1c8] sm:$0xff]  ;;  %v614_v28 = vld [vmem:[%s2073_s29 + $0x1d8] sm:$0xff] }
  0x9c   : > { %1581 = vmatpush1.bf16.msra.mxu1 %v1580_v57  ;;  %1534 = vmatprep.subr.bf16.mxu0 %v1718_v3  ;;  %v577_v57 = vld [vmem:[%s2073_s29 + $0xb0] sm:$0xff]  ;;  %v616_v31 = vld [vmem:[%s2073_s29 + $0x1e8] sm:$0xff]  ;;  %v618_v32 = vld [vmem:[%s2073_s29 + $0x1f8] sm:$0xff] }
  0x9d   : > { %1582 = vmatprep.subr.bf16.mxu1 %v1718_v3  ;;  %v615_v33 = vld [vmem:[%s2073_s29 + $0x1e0] sm:$0xff]  ;;  %v617_v34 = vld [vmem:[%s2073_s29 + $0x1f0] sm:$0xff] }
  0x9f   : > { %1536 = vmatpush1.bf16.msra.mxu0 %v1535_v62  ;;  %v584_v62 = vld [vmem:[%s2073_s29 + $0xe8] sm:$0xff] }
  0xa0   : > { %1584 = vmatpush1.bf16.msra.mxu1 %v1583_v63  ;;  %1537 = vmatprep.subr.bf16.mxu0 %v1718_v3  ;;  %v586_v63 = vld [vmem:[%s2073_s29 + $0xf8] sm:$0xff] }
  0xa1   : > { %1585 = vmatprep.subr.bf16.mxu1 %v1718_v3 }
  0xa3   : > { %1539 = vmatpush1.bf16.msra.mxu0 %v1538_v5  ;;  %v587_v5 = vld [vmem:[%s2073_s29 + $0x100] sm:$0xff] }
  0xa4   : > { %1587 = vmatpush1.bf16.msra.mxu1 %v1586_v6  ;;  %1540 = vmatprep.subr.bf16.mxu0 %v1718_v3  ;;  %v589_v6 = vld [vmem:[%s2073_s29 + $0x110] sm:$0xff] }
  0xa5   : > { %1588 = vmatprep.subr.bf16.mxu1 %v1718_v3 }
  0xa7   : > { %1542 = vmatpush1.bf16.msra.mxu0 %v1541_v11  ;;  %v596_v11 = vld [vmem:[%s2073_s29 + $0x148] sm:$0xff] }
  0xa8   : > { %1590 = vmatpush1.bf16.msra.mxu1 %v1589_v12  ;;  %1543 = vmatprep.subr.bf16.mxu0 %v1718_v3  ;;  %v598_v12 = vld [vmem:[%s2073_s29 + $0x158] sm:$0xff] }
  0xa9   : > { %1591 = vmatprep.subr.bf16.mxu1 %v1718_v3 }
  0xab   : > { %1545 = vmatpush1.bf16.msra.mxu0 %v1544_v17  ;;  %v599_v17 = vld [vmem:[%s2073_s29 + $0x160] sm:$0xff] }
  0xac   : > { %1593 = vmatpush1.bf16.msra.mxu1 %v1592_v18  ;;  %1546 = vmatprep.subr.bf16.mxu0 %v1718_v3  ;;  %v601_v18 = vld [vmem:[%s2073_s29 + $0x170] sm:$0xff] }
  0xad   : > { %1594 = vmatprep.subr.bf16.mxu1 %v1718_v3 }
  0xaf   : > { %1548 = vmatpush1.bf16.msra.mxu0 %v1547_v23  ;;  %v608_v23 = vld [vmem:[%s2073_s29 + $0x1a8] sm:$0xff] }
  0xb0   : > { %1596 = vmatpush1.bf16.msra.mxu1 %v1595_v24  ;;  %1549 = vmatprep.subr.bf16.mxu0 %v1718_v3  ;;  %v610_v24 = vld [vmem:[%s2073_s29 + $0x1b8] sm:$0xff] }
  0xb1   : > { %1597 = vmatprep.subr.bf16.mxu1 %v1718_v3 }
  0xb3   : > { %1551 = vmatpush1.bf16.msra.mxu0 %v1550_v29  ;;  %v611_v29 = vld [vmem:[%s2073_s29 + $0x1c0] sm:$0xff] }
  0xb4   : > { %1599 = vmatpush1.bf16.msra.mxu1 %v1598_v30  ;;  %1552 = vmatprep.subr.bf16.mxu0 %v1718_v3  ;;  %v613_v30 = vld [vmem:[%s2073_s29 + $0x1d0] sm:$0xff] }
  0xb5   : > { %1600 = vmatprep.subr.bf16.mxu1 %v1718_v3  ;;  %v566_v3 = vld [vmem:[%s2073_s29 + $0x58] sm:$0xff] }
  0xb7   : > { %1554 = vmatpush1.bf16.msra.mxu0 %v1553_v35  ;;  %v620_v35 = vld [vmem:[%s2073_s29 + $0x208] sm:$0xff] }
  0xb8   : > { %1602 = vmatpush1.bf16.msra.mxu1 %v1601_v36  ;;  %v622_v36 = vld [vmem:[%s2073_s29 + $0x218] sm:$0xff] }
  0xba   : > { %814 = vmatmul.mubr.f32.vlgmr.msra.gmra.mrb[0].mxu0 %v555_v37  ;;  %v619_v37 = vld [vmem:[%s2073_s29 + $0x200] sm:$0xff] }
  0xbb   : > { %1039 = vmatmul.mubr.f32.vlgmr.msra.gmra.mrb[0].mxu1 %v557_v38  ;;  %818 = vmatprep.mubr.f32.mxu0 %v560_v39  ;;  %v621_v38 = vld [vmem:[%s2073_s29 + $0x210] sm:$0xff]  ;;  %v624_v39 = vld [vmem:[%s2073_s29 + $0x228] sm:$0xff] }
  0xbc   : > { %1043 = vmatprep.mubr.f32.mxu1 %v562_v40  ;;  %v626_v40 = vld [vmem:[%s2073_s29 + $0x238] sm:$0xff] }
  0xbe   : > { %819 = vmatmul.mubr.f32.gmra.mrb[2].mxu0 %v559_v41  ;;  %v623_v41 = vld [vmem:[%s2073_s29 + $0x220] sm:$0xff] }
  0xbf   : > { %1044 = vmatmul.mubr.f32.gmra.mrb[2].mxu1 %v561_v42  ;;  %823 = vmatprep.mubr.f32.mxu0 %v564_v43  ;;  %v625_v42 = vld [vmem:[%s2073_s29 + $0x230] sm:$0xff]  ;;  %v628_v43 = vld [vmem:[%s2073_s29 + $0x248] sm:$0xff] }
  0xc0   : > { %1048 = vmatprep.mubr.f32.mxu1 %v566_v3  ;;  %v630_v3 = vld [vmem:[%s2073_s29 + $0x258] sm:$0xff] }
  0xc2   : > { %824 = vmatmul.mubr.f32.gmra.mrb[4].mxu0 %v563_v44  ;;  %v627_v44 = vld [vmem:[%s2073_s29 + $0x240] sm:$0xff] }
  0xc3   : > { %1049 = vmatmul.mubr.f32.gmra.mrb[4].mxu1 %v565_v45  ;;  %828 = vmatprep.mubr.f32.mxu0 %v568_v46  ;;  %v629_v45 = vld [vmem:[%s2073_s29 + $0x250] sm:$0xff]  ;;  %v632_v46 = vld [vmem:[%s2073_s29 + $0x268] sm:$0xff] }
  0xc4   : > { %1053 = vmatprep.mubr.f32.mxu1 %v570_v47  ;;  %v634_v47 = vld [vmem:[%s2073_s29 + $0x278] sm:$0xff] }
  0xc6   : > { %829 = vmatmul.mubr.f32.gmra.mrb[6].mxu0 %v567_v48  ;;  %v631_v48 = vld [vmem:[%s2073_s29 + $0x260] sm:$0xff] }
  0xc7   : > { %1054 = vmatmul.mubr.f32.gmra.mrb[6].mxu1 %v569_v49  ;;  %833 = vmatprep.mubr.f32.mxu0 %v572_v50  ;;  %v633_v49 = vld [vmem:[%s2073_s29 + $0x270] sm:$0xff]  ;;  %v636_v50 = vld [vmem:[%s2073_s29 + $0x288] sm:$0xff] }
  0xc8   : > { %1058 = vmatprep.mubr.f32.mxu1 %v574_v51  ;;  %v638_v51 = vld [vmem:[%s2073_s29 + $0x298] sm:$0xff] }
  0xca   : > { %834 = vmatmul.mubr.f32.gmra.mrb[8].mxu0 %v571_v52  ;;  %v635_v52 = vld [vmem:[%s2073_s29 + $0x280] sm:$0xff] }
  0xcb   : > { %1059 = vmatmul.mubr.f32.gmra.mrb[8].mxu1 %v573_v53  ;;  %838 = vmatprep.mubr.f32.mxu0 %v576_v54  ;;  %v637_v53 = vld [vmem:[%s2073_s29 + $0x290] sm:$0xff]  ;;  %v640_v54 = vld [vmem:[%s2073_s29 + $0x2a8] sm:$0xff] }
  0xcc   : > { %1063 = vmatprep.mubr.f32.mxu1 %v578_v55  ;;  %v642_v55 = vld [vmem:[%s2073_s29 + $0x2b8] sm:$0xff] }
  0xce   : > { %839 = vmatmul.mubr.f32.gmra.mrb[10].mxu0 %v575_v56  ;;  %v639_v56 = vld [vmem:[%s2073_s29 + $0x2a0] sm:$0xff] }
  0xcf   : > { %1064 = vmatmul.mubr.f32.gmra.mrb[10].mxu1 %v577_v57  ;;  %843 = vmatprep.mubr.f32.mxu0 %v580_v58  ;;  %v641_v57 = vld [vmem:[%s2073_s29 + $0x2b0] sm:$0xff]  ;;  %v644_v58 = vld [vmem:[%s2073_s29 + $0x2c8] sm:$0xff] }
  0xd0   : > { %1068 = vmatprep.mubr.f32.mxu1 %v582_v59  ;;  %v646_v59 = vld [vmem:[%s2073_s29 + $0x2d8] sm:$0xff] }
  0xd2   : > { %844 = vmatmul.mubr.f32.gmra.mrb[12].mxu0 %v579_v60  ;;  %v643_v60 = vld [vmem:[%s2073_s29 + $0x2c0] sm:$0xff] }
  0xd3   : > { %1069 = vmatmul.mubr.f32.gmra.mrb[12].mxu1 %v581_v61  ;;  %848 = vmatprep.mubr.f32.mxu0 %v584_v62  ;;  %v645_v61 = vld [vmem:[%s2073_s29 + $0x2d0] sm:$0xff]  ;;  %v648_v62 = vld [vmem:[%s2073_s29 + $0x2e8] sm:$0xff] }
  0xd4   : > { %1073 = vmatprep.mubr.f32.mxu1 %v586_v63  ;;  %v650_v63 = vld [vmem:[%s2073_s29 + $0x2f8] sm:$0xff] }
  0xd6   : > { %849 = vmatmul.mubr.f32.gmra.mrb[14].mxu0 %v583_v0  ;;  %v647_v0 = vld [vmem:[%s2073_s29 + $0x2e0] sm:$0xff] }
  0xd7   : > { %1074 = vmatmul.mubr.f32.gmra.mrb[14].mxu1 %v585_v1  ;;  %853 = vmatprep.mubr.f32.mxu0 %v588_v2  ;;  %v649_v1 = vld [vmem:[%s2073_s29 + $0x2f0] sm:$0xff]  ;;  %v652_v2 = vld [vmem:[%s2073_s29 + $0x308] sm:$0xff] }
  0xd8   : > { %1078 = vmatprep.mubr.f32.mxu1 %v590_v4  ;;  %v654_v4 = vld [vmem:[%s2073_s29 + $0x318] sm:$0xff] }
  0xda   : > { %854 = vmatmul.mubr.f32.gmra.mrb[16].mxu0 %v587_v5  ;;  %v651_v5 = vld [vmem:[%s2073_s29 + $0x300] sm:$0xff] }
  0xdb   : > { %1079 = vmatmul.mubr.f32.gmra.mrb[16].mxu1 %v589_v6  ;;  %858 = vmatprep.mubr.f32.mxu0 %v592_v7  ;;  %v653_v6 = vld [vmem:[%s2073_s29 + $0x310] sm:$0xff]  ;;  %v656_v7 = vld [vmem:[%s2073_s29 + $0x328] sm:$0xff] }
  0xdc   : > { %1083 = vmatprep.mubr.f32.mxu1 %v594_v8  ;;  %v658_v8 = vld [vmem:[%s2073_s29 + $0x338] sm:$0xff] }
  0xde   : > { %859 = vmatmul.mubr.f32.gmra.mrb[18].mxu0 %v591_v9  ;;  %v655_v9 = vld [vmem:[%s2073_s29 + $0x320] sm:$0xff] }
  0xdf   : > { %1084 = vmatmul.mubr.f32.gmra.mrb[18].mxu1 %v593_v10  ;;  %863 = vmatprep.mubr.f32.mxu0 %v596_v11  ;;  %v657_v10 = vld [vmem:[%s2073_s29 + $0x330] sm:$0xff]  ;;  %v660_v11 = vld [vmem:[%s2073_s29 + $0x348] sm:$0xff] }
  0xe0   : > { %1088 = vmatprep.mubr.f32.mxu1 %v598_v12  ;;  %v662_v12 = vld [vmem:[%s2073_s29 + $0x358] sm:$0xff] }
  0xe2   : > { %864 = vmatmul.mubr.f32.gmra.mrb[20].mxu0 %v595_v13  ;;  %v659_v13 = vld [vmem:[%s2073_s29 + $0x340] sm:$0xff] }
  0xe3   : > { %1089 = vmatmul.mubr.f32.gmra.mrb[20].mxu1 %v597_v14  ;;  %868 = vmatprep.mubr.f32.mxu0 %v600_v15  ;;  %v661_v14 = vld [vmem:[%s2073_s29 + $0x350] sm:$0xff]  ;;  %v664_v15 = vld [vmem:[%s2073_s29 + $0x368] sm:$0xff] }
  0xe4   : > { %1093 = vmatprep.mubr.f32.mxu1 %v602_v16  ;;  %v666_v16 = vld [vmem:[%s2073_s29 + $0x378] sm:$0xff] }
  0xe6   : > { %869 = vmatmul.mubr.f32.gmra.mrb[22].mxu0 %v599_v17  ;;  %v663_v17 = vld [vmem:[%s2073_s29 + $0x360] sm:$0xff] }
  0xe7   : > { %1094 = vmatmul.mubr.f32.gmra.mrb[22].mxu1 %v601_v18  ;;  %873 = vmatprep.mubr.f32.mxu0 %v604_v19  ;;  %v665_v18 = vld [vmem:[%s2073_s29 + $0x370] sm:$0xff]  ;;  %v668_v19 = vld [vmem:[%s2073_s29 + $0x388] sm:$0xff] }
  0xe8   : > { %1098 = vmatprep.mubr.f32.mxu1 %v606_v20  ;;  %v670_v20 = vld [vmem:[%s2073_s29 + $0x398] sm:$0xff] }
  0xea   : > { %874 = vmatmul.mubr.f32.gmra.mrb[24].mxu0 %v603_v21  ;;  %v667_v21 = vld [vmem:[%s2073_s29 + $0x380] sm:$0xff] }
  0xeb   : > { %1099 = vmatmul.mubr.f32.gmra.mrb[24].mxu1 %v605_v22  ;;  %878 = vmatprep.mubr.f32.mxu0 %v608_v23  ;;  %v669_v22 = vld [vmem:[%s2073_s29 + $0x390] sm:$0xff]  ;;  %v672_v23 = vld [vmem:[%s2073_s29 + $0x3a8] sm:$0xff] }
  0xec   : > { %1103 = vmatprep.mubr.f32.mxu1 %v610_v24  ;;  %v674_v24 = vld [vmem:[%s2073_s29 + $0x3b8] sm:$0xff] }
  0xee   : > { %879 = vmatmul.mubr.f32.gmra.mrb[26].mxu0 %v607_v25  ;;  %v671_v25 = vld [vmem:[%s2073_s29 + $0x3a0] sm:$0xff] }
  0xef   : > { %1104 = vmatmul.mubr.f32.gmra.mrb[26].mxu1 %v609_v26  ;;  %883 = vmatprep.mubr.f32.mxu0 %v612_v27  ;;  %v673_v26 = vld [vmem:[%s2073_s29 + $0x3b0] sm:$0xff]  ;;  %v676_v27 = vld [vmem:[%s2073_s29 + $0x3c8] sm:$0xff] }
  0xf0   : > { %1108 = vmatprep.mubr.f32.mxu1 %v614_v28  ;;  %v678_v28 = vld [vmem:[%s2073_s29 + $0x3d8] sm:$0xff] }
  0xf2   : > { %884 = vmatmul.mubr.f32.gmra.mrb[28].mxu0 %v611_v29  ;;  %v675_v29 = vld [vmem:[%s2073_s29 + $0x3c0] sm:$0xff] }
  0xf3   : > { %1109 = vmatmul.mubr.f32.gmra.mrb[28].mxu1 %v613_v30  ;;  %888 = vmatprep.mubr.f32.mxu0 %v616_v31  ;;  %v677_v30 = vld [vmem:[%s2073_s29 + $0x3d0] sm:$0xff]  ;;  %v680_v31 = vld [vmem:[%s2073_s29 + $0x3e8] sm:$0xff] }
  0xf4   : > { %1113 = vmatprep.mubr.f32.mxu1 %v618_v32  ;;  %v682_v32 = vld [vmem:[%s2073_s29 + $0x3f8] sm:$0xff] }
  0xf6   : > { %889 = vmatmul.mubr.f32.gmra.mrb[30].mxu0 %v615_v33  ;;  %v679_v33 = vld [vmem:[%s2073_s29 + $0x3e0] sm:$0xff] }
  0xf7   : > { %1114 = vmatmul.mubr.f32.gmra.mrb[30].mxu1 %v617_v34  ;;  %893 = vmatprep.mubr.f32.mxu0 %v620_v35  ;;  %v681_v34 = vld [vmem:[%s2073_s29 + $0x3f0] sm:$0xff] }
  0xf8   : > { %1118 = vmatprep.mubr.f32.mxu1 %v622_v36  ;;  %v523_v36 = vld [vmem:[#allocation2] sm:$0xff] }
  0xfa   : > { %894 = vmatmul.mubr.f32.gmra.mrb[32].mxu0 %v619_v37 }
  0xfb   : > { %1119 = vmatmul.mubr.f32.gmra.mrb[32].mxu1 %v621_v38  ;;  %898 = vmatprep.mubr.f32.mxu0 %v624_v39 }
  0xfc   : > { %1123 = vmatprep.mubr.f32.mxu1 %v626_v40 }
  0xfe   : > { %899 = vmatmul.mubr.f32.gmra.mrb[34].mxu0 %v623_v41 }
  0xff   : > { %1124 = vmatmul.mubr.f32.gmra.mrb[34].mxu1 %v625_v42  ;;  %903 = vmatprep.mubr.f32.mxu0 %v628_v43  ;;  %v524_v43 = vld [vmem:[#allocation2 + $0x8] sm:$0xff] }
 0x100   : > { %1128 = vmatprep.mubr.f32.mxu1 %v630_v3 }
 0x102   : > { %904 = vmatmul.mubr.f32.gmra.mrb[36].mxu0 %v627_v44 }
 0x103   : > { %1129 = vmatmul.mubr.f32.gmra.mrb[36].mxu1 %v629_v45  ;;  %908 = vmatprep.mubr.f32.mxu0 %v632_v46 }
 0x104   : > { %1133 = vmatprep.mubr.f32.mxu1 %v634_v47 }
 0x106   : > { %909 = vmatmul.mubr.f32.gmra.mrb[38].mxu0 %v631_v48 }
 0x107   : > { %1134 = vmatmul.mubr.f32.gmra.mrb[38].mxu1 %v633_v49  ;;  %913 = vmatprep.mubr.f32.mxu0 %v636_v50  ;;  %v525_v49 = vld [vmem:[#allocation2 + $0x10] sm:$0xff] }
 0x108   : > { %1138 = vmatprep.mubr.f32.mxu1 %v638_v51 }
 0x10a   : > { %914 = vmatmul.mubr.f32.gmra.mrb[40].mxu0 %v635_v52 }
 0x10b   : > { %1139 = vmatmul.mubr.f32.gmra.mrb[40].mxu1 %v637_v53  ;;  %918 = vmatprep.mubr.f32.mxu0 %v640_v54 }
 0x10c   : > { %1143 = vmatprep.mubr.f32.mxu1 %v642_v55 }
 0x10e   : > { %919 = vmatmul.mubr.f32.gmra.mrb[42].mxu0 %v639_v56  ;;  %v526_v56 = vld [vmem:[#allocation2 + $0x18] sm:$0xff] }
 0x10f   : > { %1144 = vmatmul.mubr.f32.gmra.mrb[42].mxu1 %v641_v57  ;;  %923 = vmatprep.mubr.f32.mxu0 %v644_v58 }
 0x110   : > { %1148 = vmatprep.mubr.f32.mxu1 %v646_v59 }
 0x112   : > { %924 = vmatmul.mubr.f32.gmra.mrb[44].mxu0 %v643_v60 }
 0x113   : > { %1149 = vmatmul.mubr.f32.gmra.mrb[44].mxu1 %v645_v61  ;;  %928 = vmatprep.mubr.f32.mxu0 %v648_v62 }
 0x114   : > { %1153 = vmatprep.mubr.f32.mxu1 %v650_v63  ;;  %v527_v63 = vld [vmem:[#allocation2 + $0x20] sm:$0xff] }
 0x116   : > { %929 = vmatmul.mubr.f32.gmra.mrb[46].mxu0 %v647_v0 }
 0x117   : > { %1154 = vmatmul.mubr.f32.gmra.mrb[46].mxu1 %v649_v1  ;;  %933 = vmatprep.mubr.f32.mxu0 %v652_v2 }
 0x118   : > { %1158 = vmatprep.mubr.f32.mxu1 %v654_v4 }
 0x11a   : > { %934 = vmatmul.mubr.f32.gmra.mrb[48].mxu0 %v651_v5 }
 0x11b   : > { %1159 = vmatmul.mubr.f32.gmra.mrb[48].mxu1 %v653_v6  ;;  %938 = vmatprep.mubr.f32.mxu0 %v656_v7  ;;  %v528_v7 = vld [vmem:[#allocation2 + $0x28] sm:$0xff] }
 0x11c   : > { %1163 = vmatprep.mubr.f32.mxu1 %v658_v8 }
 0x11e   : > { %939 = vmatmul.mubr.f32.gmra.mrb[50].mxu0 %v655_v9 }
 0x11f   : > { %1164 = vmatmul.mubr.f32.gmra.mrb[50].mxu1 %v657_v10  ;;  %943 = vmatprep.mubr.f32.mxu0 %v660_v11 }
 0x120   : > { %1168 = vmatprep.mubr.f32.mxu1 %v662_v12 }
 0x122   : > { %944 = vmatmul.mubr.f32.gmra.mrb[52].mxu0 %v659_v13 }
 0x123   : > { %1169 = vmatmul.mubr.f32.gmra.mrb[52].mxu1 %v661_v14  ;;  %948 = vmatprep.mubr.f32.mxu0 %v664_v15  ;;  %v529_v14 = vld [vmem:[#allocation2 + $0x30] sm:$0xff] }
 0x124   : > { %1173 = vmatprep.mubr.f32.mxu1 %v666_v16 }
 0x126   : > { %949 = vmatmul.mubr.f32.gmra.mrb[54].mxu0 %v663_v17 }
 0x127   : > { %1174 = vmatmul.mubr.f32.gmra.mrb[54].mxu1 %v665_v18  ;;  %953 = vmatprep.mubr.f32.mxu0 %v668_v19 }
 0x128   : > { %1178 = vmatprep.mubr.f32.mxu1 %v670_v20 }
 0x12a   : > { %954 = vmatmul.mubr.f32.gmra.mrb[56].mxu0 %v667_v21  ;;  %v530_v21 = vld [vmem:[#allocation2 + $0x38] sm:$0xff] }
 0x12b   : > { %1179 = vmatmul.mubr.f32.gmra.mrb[56].mxu1 %v669_v22  ;;  %958 = vmatprep.mubr.f32.mxu0 %v672_v23 }
 0x12c   : > { %1183 = vmatprep.mubr.f32.mxu1 %v674_v24 }
 0x12e   : > { %959 = vmatmul.mubr.f32.gmra.mrb[58].mxu0 %v671_v25 }
 0x12f   : > { %1184 = vmatmul.mubr.f32.gmra.mrb[58].mxu1 %v673_v26  ;;  %963 = vmatprep.mubr.f32.mxu0 %v676_v27 }
 0x130   : > { %1188 = vmatprep.mubr.f32.mxu1 %v678_v28  ;;  %v531_v28 = vld [vmem:[#allocation2 + $0x40] sm:$0xff] }
 0x132   : > { %964 = vmatmul.mubr.f32.gmra.mrb[60].mxu0 %v675_v29 }
 0x133   : > { %1189 = vmatmul.mubr.f32.gmra.mrb[60].mxu1 %v677_v30  ;;  %968 = vmatprep.mubr.f32.mxu0 %v680_v31 }
 0x134   : > { %1193 = vmatprep.mubr.f32.mxu1 %v682_v32 }
 0x136   : > { %969 = vmatmul.mubr.f32.gmra.mrb[62].mxu0 %v679_v33 }
 0x137   : > { %1194 = vmatmul.mubr.f32.gmra.mrb[62].mxu1 %v681_v34 }
 0x18d   : > { %v815_v35 = vpop.f32.mrb[0].mxu0 }
 0x18e   : > { %v1040_v37 = vpop.f32.mrb[0].mxu1  ;;  %v817_v38 = vpop.f32.mrb[1].mxu0 }
 0x18f   : > { %v1041_v39 = vadd.f32 %v1040_v37, %v815_v35  ;;  %v1042_v40 = vpop.f32.mrb[1].mxu1  ;;  %v532_v35 = vld [vmem:[#allocation2 + $0x48] sm:$0xff] }
 0x191   : > { %v1199_v41 = vadd.f32 %v1041_v39, %v523_v36  ;;  %v820_v42 = vpop.f32.mrb[2].mxu0 }
 0x192   : > { %v1045_v3 = vpop.f32.mrb[2].mxu1  ;;  %v822_v44 = vpop.f32.mrb[3].mxu0 }
 0x193   : > { %1231 = vst [vmem:[#allocation2] sm:$0xff] %v1199_v41  ;;  %v1046_v45 = vadd.f32 %v1045_v3, %v820_v42  ;;  %v1047_v46 = vpop.f32.mrb[3].mxu1  ;;  %v533_v42 = vld [vmem:[#allocation2 + $0x50] sm:$0xff] }
 0x195   : > { %v1200_v47 = vadd.f32 %v1046_v45, %v524_v43  ;;  %v825_v48 = vpop.f32.mrb[4].mxu0 }
 0x196   : > { %v1050_v50 = vpop.f32.mrb[4].mxu1  ;;  %v827_v51 = vpop.f32.mrb[5].mxu0 }
 0x197   : > { %1232 = vst [vmem:[#allocation2 + $0x8] sm:$0xff] %v1200_v47  ;;  %v1051_v52 = vadd.f32 %v1050_v50, %v825_v48  ;;  %v1052_v53 = vpop.f32.mrb[5].mxu1  ;;  %v534_v48 = vld [vmem:[#allocation2 + $0x58] sm:$0xff] }
 0x199   : > { %v1201_v54 = vadd.f32 %v1051_v52, %v525_v49  ;;  %v830_v55 = vpop.f32.mrb[6].mxu0 }
 0x19a   : > { %v1055_v57 = vpop.f32.mrb[6].mxu1  ;;  %v832_v58 = vpop.f32.mrb[7].mxu0 }
 0x19b   : > { %1233 = vst [vmem:[#allocation2 + $0x10] sm:$0xff] %v1201_v54  ;;  %v1056_v59 = vadd.f32 %v1055_v57, %v830_v55  ;;  %v1057_v60 = vpop.f32.mrb[7].mxu1  ;;  %v535_v55 = vld [vmem:[#allocation2 + $0x60] sm:$0xff] }
 0x19d   : > { %v1202_v61 = vadd.f32 %v1056_v59, %v526_v56  ;;  %v835_v62 = vpop.f32.mrb[8].mxu0 }
 0x19e   : > { %v1060_v0 = vpop.f32.mrb[8].mxu1  ;;  %v837_v1 = vpop.f32.mrb[9].mxu0 }
 0x19f   : > { %1234 = vst [vmem:[#allocation2 + $0x18] sm:$0xff] %v1202_v61  ;;  %v1061_v2 = vadd.f32 %v1060_v0, %v835_v62  ;;  %v1062_v4 = vpop.f32.mrb[9].mxu1  ;;  %v536_v62 = vld [vmem:[#allocation2 + $0x68] sm:$0xff] }
 0x1a1   : > { %v1203_v5 = vadd.f32 %v1061_v2, %v527_v63  ;;  %v840_v6 = vpop.f32.mrb[10].mxu0 }
 0x1a2   : > { %v1065_v8 = vpop.f32.mrb[10].mxu1  ;;  %v842_v9 = vpop.f32.mrb[11].mxu0 }
 0x1a3   : > { %1235 = vst [vmem:[#allocation2 + $0x20] sm:$0xff] %v1203_v5  ;;  %v1066_v10 = vadd.f32 %v1065_v8, %v840_v6  ;;  %v1067_v11 = vpop.f32.mrb[11].mxu1  ;;  %v537_v6 = vld [vmem:[#allocation2 + $0x70] sm:$0xff] }
 0x1a5   : > { %v1204_v12 = vadd.f32 %v1066_v10, %v528_v7  ;;  %v845_v13 = vpop.f32.mrb[12].mxu0 }
 0x1a6   : > { %v1070_v15 = vpop.f32.mrb[12].mxu1  ;;  %v847_v16 = vpop.f32.mrb[13].mxu0 }
 0x1a7   : > { %1236 = vst [vmem:[#allocation2 + $0x28] sm:$0xff] %v1204_v12  ;;  %v1071_v17 = vadd.f32 %v1070_v15, %v845_v13  ;;  %v1072_v18 = vpop.f32.mrb[13].mxu1  ;;  %v538_v13 = vld [vmem:[#allocation2 + $0x78] sm:$0xff] }
 0x1a9   : > { %v1205_v19 = vadd.f32 %v1071_v17, %v529_v14  ;;  %v850_v20 = vpop.f32.mrb[14].mxu0 }
 0x1aa   : > { %v1075_v22 = vpop.f32.mrb[14].mxu1  ;;  %v852_v23 = vpop.f32.mrb[15].mxu0 }
 0x1ab   : > { %1237 = vst [vmem:[#allocation2 + $0x30] sm:$0xff] %v1205_v19  ;;  %v1076_v24 = vadd.f32 %v1075_v22, %v850_v20  ;;  %v1077_v25 = vpop.f32.mrb[15].mxu1  ;;  %v539_v20 = vld [vmem:[#allocation2 + $0x80] sm:$0xff] }
 0x1ad   : > { %v1206_v26 = vadd.f32 %v1076_v24, %v530_v21  ;;  %v855_v27 = vpop.f32.mrb[16].mxu0 }
 0x1ae   : > { %v1080_v29 = vpop.f32.mrb[16].mxu1  ;;  %v857_v30 = vpop.f32.mrb[17].mxu0 }
 0x1af   : > { %1238 = vst [vmem:[#allocation2 + $0x38] sm:$0xff] %v1206_v26  ;;  %v1081_v31 = vadd.f32 %v1080_v29, %v855_v27  ;;  %v1082_v32 = vpop.f32.mrb[17].mxu1  ;;  %v540_v27 = vld [vmem:[#allocation2 + $0x88] sm:$0xff] }
 0x1b1   : > { %v1207_v33 = vadd.f32 %v1081_v31, %v531_v28  ;;  %v860_v34 = vpop.f32.mrb[18].mxu0 }
 0x1b2   : > { %v1085_v36 = vpop.f32.mrb[18].mxu1  ;;  %v862_v37 = vpop.f32.mrb[19].mxu0 }
 0x1b3   : > { %1239 = vst [vmem:[#allocation2 + $0x40] sm:$0xff] %v1207_v33  ;;  %v1086_v38 = vadd.f32 %v1085_v36, %v860_v34  ;;  %v1087_v39 = vpop.f32.mrb[19].mxu1  ;;  %v541_v34 = vld [vmem:[#allocation2 + $0x90] sm:$0xff] }
 0x1b5   : > { %v1208_v40 = vadd.f32 %v1086_v38, %v532_v35  ;;  %v865_v41 = vpop.f32.mrb[20].mxu0 }
 0x1b6   : > { %v1090_v43 = vpop.f32.mrb[20].mxu1  ;;  %v867_v3 = vpop.f32.mrb[21].mxu0 }
 0x1b7   : > { %1240 = vst [vmem:[#allocation2 + $0x48] sm:$0xff] %v1208_v40  ;;  %v1091_v44 = vadd.f32 %v1090_v43, %v865_v41  ;;  %v1092_v45 = vpop.f32.mrb[21].mxu1  ;;  %v542_v41 = vld [vmem:[#allocation2 + $0x98] sm:$0xff] }
 0x1b9   : > { %v1209_v46 = vadd.f32 %v1091_v44, %v533_v42  ;;  %v870_v47 = vpop.f32.mrb[22].mxu0 }
 0x1ba   : > { %v1095_v49 = vpop.f32.mrb[22].mxu1  ;;  %v872_v50 = vpop.f32.mrb[23].mxu0 }
 0x1bb   : > { %1241 = vst [vmem:[#allocation2 + $0x50] sm:$0xff] %v1209_v46  ;;  %v1096_v51 = vadd.f32 %v1095_v49, %v870_v47  ;;  %v1097_v52 = vpop.f32.mrb[23].mxu1  ;;  %v543_v47 = vld [vmem:[#allocation2 + $0xa0] sm:$0xff] }
 0x1bd   : > { %v1210_v53 = vadd.f32 %v1096_v51, %v534_v48  ;;  %v875_v54 = vpop.f32.mrb[24].mxu0 }
 0x1be   : > { %v1100_v56 = vpop.f32.mrb[24].mxu1  ;;  %v877_v57 = vpop.f32.mrb[25].mxu0 }
 0x1bf   : > { %1242 = vst [vmem:[#allocation2 + $0x58] sm:$0xff] %v1210_v53  ;;  %v1101_v58 = vadd.f32 %v1100_v56, %v875_v54  ;;  %v1102_v59 = vpop.f32.mrb[25].mxu1  ;;  %v544_v54 = vld [vmem:[#allocation2 + $0xa8] sm:$0xff] }
 0x1c1   : > { %v1211_v60 = vadd.f32 %v1101_v58, %v535_v55  ;;  %v880_v61 = vpop.f32.mrb[26].mxu0 }
 0x1c2   : > { %v1105_v63 = vpop.f32.mrb[26].mxu1  ;;  %v882_v0 = vpop.f32.mrb[27].mxu0 }
 0x1c3   : > { %1243 = vst [vmem:[#allocation2 + $0x60] sm:$0xff] %v1211_v60  ;;  %v1106_v1 = vadd.f32 %v1105_v63, %v880_v61  ;;  %v1107_v2 = vpop.f32.mrb[27].mxu1  ;;  %v545_v61 = vld [vmem:[#allocation2 + $0xb0] sm:$0xff] }
 0x1c5   : > { %v1212_v4 = vadd.f32 %v1106_v1, %v536_v62  ;;  %v885_v5 = vpop.f32.mrb[28].mxu0 }
 0x1c6   : > { %v1110_v7 = vpop.f32.mrb[28].mxu1  ;;  %v887_v8 = vpop.f32.mrb[29].mxu0 }
 0x1c7   : > { %1244 = vst [vmem:[#allocation2 + $0x68] sm:$0xff] %v1212_v4  ;;  %v1111_v9 = vadd.f32 %v1110_v7, %v885_v5  ;;  %v1112_v10 = vpop.f32.mrb[29].mxu1  ;;  %v546_v5 = vld [vmem:[#allocation2 + $0xb8] sm:$0xff] }
 0x1c9   : > { %v1213_v11 = vadd.f32 %v1111_v9, %v537_v6  ;;  %v890_v12 = vpop.f32.mrb[30].mxu0 }
 0x1ca   : > { %v1115_v14 = vpop.f32.mrb[30].mxu1  ;;  %v892_v15 = vpop.f32.mrb[31].mxu0 }
 0x1cb   : > { %1245 = vst [vmem:[#allocation2 + $0x70] sm:$0xff] %v1213_v11  ;;  %v1116_v16 = vadd.f32 %v1115_v14, %v890_v12  ;;  %v1117_v17 = vpop.f32.mrb[31].mxu1  ;;  %v547_v12 = vld [vmem:[#allocation2 + $0xc0] sm:$0xff] }
 0x1cd   : > { %v1214_v18 = vadd.f32 %v1116_v16, %v538_v13  ;;  %v895_v19 = vpop.f32.mrb[32].mxu0 }
 0x1ce   : > { %v1120_v21 = vpop.f32.mrb[32].mxu1  ;;  %v897_v22 = vpop.f32.mrb[33].mxu0 }
 0x1cf   : > { %1246 = vst [vmem:[#allocation2 + $0x78] sm:$0xff] %v1214_v18  ;;  %v1121_v23 = vadd.f32 %v1120_v21, %v895_v19  ;;  %v1122_v24 = vpop.f32.mrb[33].mxu1  ;;  %v548_v19 = vld [vmem:[#allocation2 + $0xc8] sm:$0xff] }
 0x1d1   : > { %v1215_v25 = vadd.f32 %v1121_v23, %v539_v20  ;;  %v900_v26 = vpop.f32.mrb[34].mxu0 }
 0x1d2   : > { %v1125_v28 = vpop.f32.mrb[34].mxu1  ;;  %v902_v29 = vpop.f32.mrb[35].mxu0 }
 0x1d3   : > { %1247 = vst [vmem:[#allocation2 + $0x80] sm:$0xff] %v1215_v25  ;;  %v1126_v30 = vadd.f32 %v1125_v28, %v900_v26  ;;  %v1127_v31 = vpop.f32.mrb[35].mxu1  ;;  %v549_v26 = vld [vmem:[#allocation2 + $0xd0] sm:$0xff] }
 0x1d5   : > { %v1216_v32 = vadd.f32 %v1126_v30, %v540_v27  ;;  %v905_v33 = vpop.f32.mrb[36].mxu0 }
 0x1d6   : > { %v1130_v35 = vpop.f32.mrb[36].mxu1  ;;  %v907_v36 = vpop.f32.mrb[37].mxu0 }
 0x1d7   : > { %1248 = vst [vmem:[#allocation2 + $0x88] sm:$0xff] %v1216_v32  ;;  %v1131_v37 = vadd.f32 %v1130_v35, %v905_v33  ;;  %v1132_v38 = vpop.f32.mrb[37].mxu1  ;;  %v550_v33 = vld [vmem:[#allocation2 + $0xd8] sm:$0xff] }
 0x1d9   : > { %v1217_v39 = vadd.f32 %v1131_v37, %v541_v34  ;;  %v910_v40 = vpop.f32.mrb[38].mxu0 }
 0x1da   : > { %v1135_v42 = vpop.f32.mrb[38].mxu1  ;;  %v912_v43 = vpop.f32.mrb[39].mxu0 }
 0x1db   : > { %1249 = vst [vmem:[#allocation2 + $0x90] sm:$0xff] %v1217_v39  ;;  %v1136_v3 = vadd.f32 %v1135_v42, %v910_v40  ;;  %v1137_v44 = vpop.f32.mrb[39].mxu1  ;;  %v551_v40 = vld [vmem:[#allocation2 + $0xe0] sm:$0xff] }
 0x1dd   : > { %v1218_v45 = vadd.f32 %v1136_v3, %v542_v41  ;;  %v915_v46 = vpop.f32.mrb[40].mxu0 }
 0x1de   : > { %v1140_v48 = vpop.f32.mrb[40].mxu1  ;;  %v917_v49 = vpop.f32.mrb[41].mxu0 }
 0x1df   : > { %1250 = vst [vmem:[#allocation2 + $0x98] sm:$0xff] %v1218_v45  ;;  %v1141_v50 = vadd.f32 %v1140_v48, %v915_v46  ;;  %v1142_v51 = vpop.f32.mrb[41].mxu1  ;;  %v552_v46 = vld [vmem:[#allocation2 + $0xe8] sm:$0xff] }
 0x1e1   : > { %v1219_v52 = vadd.f32 %v1141_v50, %v543_v47  ;;  %v920_v53 = vpop.f32.mrb[42].mxu0 }
 0x1e2   : > { %v1145_v55 = vpop.f32.mrb[42].mxu1  ;;  %v922_v56 = vpop.f32.mrb[43].mxu0 }
 0x1e3   : > { %1251 = vst [vmem:[#allocation2 + $0xa0] sm:$0xff] %v1219_v52  ;;  %v1146_v57 = vadd.f32 %v1145_v55, %v920_v53  ;;  %v1147_v58 = vpop.f32.mrb[43].mxu1  ;;  %v553_v53 = vld [vmem:[#allocation2 + $0xf0] sm:$0xff] }
 0x1e5   : > { %v1220_v59 = vadd.f32 %v1146_v57, %v544_v54  ;;  %v925_v60 = vpop.f32.mrb[44].mxu0 }
 0x1e6   : > { %v1150_v62 = vpop.f32.mrb[44].mxu1  ;;  %v927_v63 = vpop.f32.mrb[45].mxu0 }
 0x1e7   : > { %1252 = vst [vmem:[#allocation2 + $0xa8] sm:$0xff] %v1220_v59  ;;  %v1151_v0 = vadd.f32 %v1150_v62, %v925_v60  ;;  %v1152_v1 = vpop.f32.mrb[45].mxu1  ;;  %v554_v60 = vld [vmem:[#allocation2 + $0xf8] sm:$0xff] }
 0x1e9   : > { %v1221_v2 = vadd.f32 %v1151_v0, %v545_v61  ;;  %v930_v4 = vpop.f32.mrb[46].mxu0 }
 0x1ea   : > { %v1155_v6 = vpop.f32.mrb[46].mxu1  ;;  %v932_v7 = vpop.f32.mrb[47].mxu0 }
 0x1eb   : > { %1253 = vst [vmem:[#allocation2 + $0xb0] sm:$0xff] %v1221_v2  ;;  %v1156_v8 = vadd.f32 %v1155_v6, %v930_v4  ;;  %v1157_v9 = vpop.f32.mrb[47].mxu1  ;;  %v1267_v2 = vld [vmem:[#allocation2] sm:$0xff] (!%p1503_p12)  ;;  %v1300_v7 = vld [vmem:[%s2066_s24 + $0x8] sm:$0xff] (!%p1503_p12) }
 0x1ec   : > { %v1299_v4 = vld [vmem:[%s2066_s24] sm:$0xff] (!%p1503_p12)  ;;  %v1301_v9 = vld [vmem:[%s2066_s24 + $0x10] sm:$0xff] (!%p1503_p12) }
 0x1ed   : > { %v1222_v10 = vadd.f32 %v1156_v8, %v546_v5  ;;  %v935_v11 = vpop.f32.mrb[48].mxu0  ;;  %v1268_v5 = vld [vmem:[#allocation2 + $0x8] sm:$0xff] (!%p1503_p12)  ;;  %v1331_v6 = vadd.f32 (!%p1503_p12), %v1299_v4, %v1267_v2  ;;  %v1269_v8 = vld [vmem:[#allocation2 + $0x10] sm:$0xff] (!%p1503_p12) }
 0x1ee   : > { %v1160_v13 = vpop.f32.mrb[48].mxu1  ;;  %v937_v14 = vpop.f32.mrb[49].mxu0  ;;  %v1320_v2 = vld [vmem:[%s2066_s24 + $0xa8] sm:$0xff] (!%p1503_p12) }
 0x1ef   : > { %1254 = vst [vmem:[#allocation2 + $0xb8] sm:$0xff] %v1222_v10  ;;  %v1161_v15 = vadd.f32 %v1160_v13, %v935_v11  ;;  %v1162_v16 = vpop.f32.mrb[49].mxu1  ;;  %v1332_v10 = vadd.f32 (!%p1503_p12), %v1300_v7, %v1268_v5  ;;  %v1333_v11 = vadd.f32 (!%p1503_p12), %v1301_v9, %v1269_v8  ;;  %v1302_v13 = vld [vmem:[%s2066_s24 + $0x18] sm:$0xff] (!%p1503_p12)  ;;  %v1271_v14 = vld [vmem:[#allocation2 + $0x20] sm:$0xff] (!%p1503_p12)  ;;  %1363 = vst [vmem:[%s2071_s28] sm:$0xff] (!%p1503_p12), %v1331_v6 }
 0x1f0   : > { %v1303_v16 = vld [vmem:[%s2066_s24 + $0x20] sm:$0xff] (!%p1503_p12)  ;;  %v1321_v6 = vld [vmem:[%s2066_s24 + $0xb0] sm:$0xff] (!%p1503_p12)  ;;  %v1322_v8 = vld [vmem:[%s2066_s24 + $0xb8] sm:$0xff] (!%p1503_p12) }
 0x1f1   : > { %v1223_v17 = vadd.f32 %v1161_v15, %v547_v12  ;;  %v940_v18 = vpop.f32.mrb[50].mxu0  ;;  %v1270_v12 = vld [vmem:[#allocation2 + $0x18] sm:$0xff] (!%p1503_p12)  ;;  %1364 = vst [vmem:[%s2071_s28 + $0x8] sm:$0xff] (!%p1503_p12), %v1332_v10  ;;  %1365 = vst [vmem:[%s2071_s28 + $0x10] sm:$0xff] (!%p1503_p12), %v1333_v11 }
 0x1f2   : > { %v1165_v20 = vpop.f32.mrb[50].mxu1  ;;  %v942_v21 = vpop.f32.mrb[51].mxu0  ;;  %v1334_v15 = vadd.f32 (!%p1503_p12), %v1302_v13, %v1270_v12  ;;  %v1289_v4 = vld [vmem:[#allocation2 + $0xb0] sm:$0xff] (!%p1503_p12)  ;;  %v1323_v12 = vld [vmem:[%s2066_s24 + $0xc0] sm:$0xff] (!%p1503_p12) }
 0x1f3   : > { %1255 = vst [vmem:[#allocation2 + $0xc0] sm:$0xff] %v1223_v17  ;;  %v1166_v22 = vadd.f32 %v1165_v20, %v940_v18  ;;  %v1167_v23 = vpop.f32.mrb[51].mxu1  ;;  %v1272_v17 = vld [vmem:[#allocation2 + $0x28] sm:$0xff] (!%p1503_p12)  ;;  %v1273_v21 = vld [vmem:[#allocation2 + $0x30] sm:$0xff] (!%p1503_p12)  ;;  %v1353_v9 = vadd.f32 (!%p1503_p12), %v1321_v6, %v1289_v4 }
 0x1f4   : > { %v1304_v18 = vld [vmem:[%s2066_s24 + $0x28] sm:$0xff] (!%p1503_p12)  ;;  %v1274_v23 = vld [vmem:[#allocation2 + $0x38] sm:$0xff] (!%p1503_p12)  ;;  %1366 = vst [vmem:[%s2071_s28 + $0x18] sm:$0xff] (!%p1503_p12), %v1334_v15 }
 0x1f5   : > { %v1224_v24 = vadd.f32 %v1166_v22, %v548_v19  ;;  %v945_v25 = vpop.f32.mrb[52].mxu0  ;;  %v1335_v19 = vadd.f32 (!%p1503_p12), %v1303_v16, %v1271_v14  ;;  %v1336_v20 = vadd.f32 (!%p1503_p12), %v1304_v18, %v1272_v17  ;;  %v1305_v22 = vld [vmem:[%s2066_s24 + $0x30] sm:$0xff] (!%p1503_p12)  ;;  %v1324_v15 = vld [vmem:[%s2066_s24 + $0xc8] sm:$0xff] (!%p1503_p12)  ;;  %1385 = vst [vmem:[%s2071_s28 + $0xb0] sm:$0xff] (!%p1503_p12), %v1353_v9 }
 0x1f6   : > { %v1170_v27 = vpop.f32.mrb[52].mxu1  ;;  %v947_v28 = vpop.f32.mrb[53].mxu0  ;;  %v1290_v7 = vld [vmem:[#allocation2 + $0xb8] sm:$0xff] (!%p1503_p12)  ;;  %v1325_v17 = vld [vmem:[%s2066_s24 + $0xd0] sm:$0xff] (!%p1503_p12) }
 0x1f7   : > { %1256 = vst [vmem:[#allocation2 + $0xc8] sm:$0xff] %v1224_v24  ;;  %v1171_v29 = vadd.f32 %v1170_v27, %v945_v25  ;;  %v1172_v30 = vpop.f32.mrb[53].mxu1  ;;  %v1337_v24 = vadd.f32 (!%p1503_p12), %v1305_v22, %v1273_v21  ;;  %v1306_v25 = vld [vmem:[%s2066_s24 + $0x38] sm:$0xff] (!%p1503_p12)  ;;  %v1307_v27 = vld [vmem:[%s2066_s24 + $0x40] sm:$0xff] (!%p1503_p12)  ;;  %1367 = vst [vmem:[%s2071_s28 + $0x20] sm:$0xff] (!%p1503_p12), %v1335_v19  ;;  %v1354_v10 = vadd.f32 (!%p1503_p12), %v1322_v8, %v1290_v7 }
 0x1f8   : > { %1368 = vst [vmem:[%s2071_s28 + $0x28] sm:$0xff] (!%p1503_p12), %v1336_v20  ;;  %v1338_v28 = vadd.f32 (!%p1503_p12), %v1306_v25, %v1274_v23  ;;  %v1276_v30 = vld [vmem:[#allocation2 + $0x48] sm:$0xff] (!%p1503_p12)  ;;  %v1326_v21 = vld [vmem:[%s2066_s24 + $0xd8] sm:$0xff] (!%p1503_p12) }
 0x1f9   : > { %v1225_v31 = vadd.f32 %v1171_v29, %v549_v26  ;;  %v950_v32 = vpop.f32.mrb[54].mxu0  ;;  %v1275_v26 = vld [vmem:[#allocation2 + $0x40] sm:$0xff] (!%p1503_p12)  ;;  %1369 = vst [vmem:[%s2071_s28 + $0x30] sm:$0xff] (!%p1503_p12), %v1337_v24  ;;  %1386 = vst [vmem:[%s2071_s28 + $0xb8] sm:$0xff] (!%p1503_p12), %v1354_v10 }
 0x1fa   : > { %v1175_v34 = vpop.f32.mrb[54].mxu1  ;;  %v952_v35 = vpop.f32.mrb[55].mxu0  ;;  %v1339_v29 = vadd.f32 (!%p1503_p12), %v1307_v27, %v1275_v26  ;;  %1370 = vst [vmem:[%s2071_s28 + $0x38] sm:$0xff] (!%p1503_p12), %v1338_v28  ;;  %v1291_v11 = vld [vmem:[#allocation2 + $0xc0] sm:$0xff] (!%p1503_p12)  ;;  %v1328_v26 = vld [vmem:[%s2066_s24 + $0xe8] sm:$0xff] (!%p1503_p12) }
 0x1fb   : > { %1257 = vst [vmem:[#allocation2 + $0xd0] sm:$0xff] %v1225_v31  ;;  %v1176_v36 = vadd.f32 %v1175_v34, %v950_v32  ;;  %v1177_v37 = vpop.f32.mrb[55].mxu1  ;;  %v1308_v31 = vld [vmem:[%s2066_s24 + $0x48] sm:$0xff] (!%p1503_p12)  ;;  %v1277_v32 = vld [vmem:[#allocation2 + $0x50] sm:$0xff] (!%p1503_p12)  ;;  %v1278_v35 = vld [vmem:[#allocation2 + $0x58] sm:$0xff] (!%p1503_p12)  ;;  %v1355_v14 = vadd.f32 (!%p1503_p12), %v1323_v12, %v1291_v11 }
 0x1fc   : > { %v1309_v34 = vld [vmem:[%s2066_s24 + $0x50] sm:$0xff] (!%p1503_p12)  ;;  %1371 = vst [vmem:[%s2071_s28 + $0x40] sm:$0xff] (!%p1503_p12), %v1339_v29  ;;  %v1327_v24 = vld [vmem:[%s2066_s24 + $0xe0] sm:$0xff] (!%p1503_p12) }
 0x1fd   : > { %v1226_v38 = vadd.f32 %v1176_v36, %v550_v33  ;;  %v955_v39 = vpop.f32.mrb[56].mxu0  ;;  %v1340_v33 = vadd.f32 (!%p1503_p12), %v1308_v31, %v1276_v30  ;;  %v1310_v36 = vld [vmem:[%s2066_s24 + $0x58] sm:$0xff] (!%p1503_p12)  ;;  %v1341_v37 = vadd.f32 (!%p1503_p12), %v1309_v34, %v1277_v32  ;;  %1387 = vst [vmem:[%s2071_s28 + $0xc0] sm:$0xff] (!%p1503_p12), %v1355_v14  ;;  %v1329_v30 = vld [vmem:[%s2066_s24 + $0xf0] sm:$0xff] (!%p1503_p12) }
 0x1fe   : > { %v1180_v41 = vpop.f32.mrb[56].mxu1  ;;  %v957_v42 = vpop.f32.mrb[57].mxu0  ;;  %v1292_v13 = vld [vmem:[#allocation2 + $0xc8] sm:$0xff] (!%p1503_p12) }
 0x1ff   : > { %1258 = vst [vmem:[#allocation2 + $0xd8] sm:$0xff] %v1226_v38  ;;  %v1181_v43 = vadd.f32 %v1180_v41, %v955_v39  ;;  %v1182_v3 = vpop.f32.mrb[57].mxu1  ;;  %v1342_v38 = vadd.f32 (!%p1503_p12), %v1310_v36, %v1278_v35  ;;  %v1279_v39 = vld [vmem:[#allocation2 + $0x60] sm:$0xff] (!%p1503_p12)  ;;  %v1280_v41 = vld [vmem:[#allocation2 + $0x68] sm:$0xff] (!%p1503_p12)  ;;  %1372 = vst [vmem:[%s2071_s28 + $0x48] sm:$0xff] (!%p1503_p12), %v1340_v33  ;;  %v1356_v18 = vadd.f32 (!%p1503_p12), %v1324_v15, %v1292_v13 }
 0x200   : > { %v1281_v3 = vld [vmem:[#allocation2 + $0x70] sm:$0xff] (!%p1503_p12)  ;;  %1373 = vst [vmem:[%s2071_s28 + $0x50] sm:$0xff] (!%p1503_p12), %v1341_v37  ;;  %v1330_v33 = vld [vmem:[%s2066_s24 + $0xf8] sm:$0xff] (!%p1503_p12) }
 0x201   : > { %v1227_v44 = vadd.f32 %v1181_v43, %v551_v40  ;;  %v960_v45 = vpop.f32.mrb[58].mxu0  ;;  %v1311_v40 = vld [vmem:[%s2066_s24 + $0x60] sm:$0xff] (!%p1503_p12)  ;;  %v1312_v43 = vld [vmem:[%s2066_s24 + $0x68] sm:$0xff] (!%p1503_p12)  ;;  %1374 = vst [vmem:[%s2071_s28 + $0x58] sm:$0xff] (!%p1503_p12), %v1342_v38  ;;  %1388 = vst [vmem:[%s2071_s28 + $0xc8] sm:$0xff] (!%p1503_p12), %v1356_v18 }
 0x202   : > { %v1185_v47 = vpop.f32.mrb[58].mxu1  ;;  %v962_v48 = vpop.f32.mrb[59].mxu0  ;;  %v1343_v42 = vadd.f32 (!%p1503_p12), %v1311_v40, %v1279_v39  ;;  %v1293_v16 = vld [vmem:[#allocation2 + $0xd0] sm:$0xff] (!%p1503_p12) }
 0x203   : > { %1259 = vst [vmem:[#allocation2 + $0xe0] sm:$0xff] %v1227_v44  ;;  %v1186_v49 = vadd.f32 %v1185_v47, %v960_v45  ;;  %v1187_v50 = vpop.f32.mrb[59].mxu1  ;;  %v1313_v44 = vld [vmem:[%s2066_s24 + $0x70] sm:$0xff] (!%p1503_p12)  ;;  %v1344_v45 = vadd.f32 (!%p1503_p12), %v1312_v43, %v1280_v41  ;;  %v1282_v47 = vld [vmem:[#allocation2 + $0x78] sm:$0xff] (!%p1503_p12)  ;;  %v1357_v19 = vadd.f32 (!%p1503_p12), %v1325_v17, %v1293_v16 }
 0x204   : > { %v1314_v48 = vld [vmem:[%s2066_s24 + $0x78] sm:$0xff] (!%p1503_p12)  ;;  %1375 = vst [vmem:[%s2071_s28 + $0x60] sm:$0xff] (!%p1503_p12), %v1343_v42 }
 0x205   : > { %v1228_v51 = vadd.f32 %v1186_v49, %v552_v46  ;;  %v965_v52 = vpop.f32.mrb[60].mxu0  ;;  %v1345_v46 = vadd.f32 (!%p1503_p12), %v1313_v44, %v1281_v3  ;;  %v1283_v49 = vld [vmem:[#allocation2 + $0x80] sm:$0xff] (!%p1503_p12)  ;;  %v1346_v50 = vadd.f32 (!%p1503_p12), %v1314_v48, %v1282_v47  ;;  %1376 = vst [vmem:[%s2071_s28 + $0x68] sm:$0xff] (!%p1503_p12), %v1344_v45  ;;  %1389 = vst [vmem:[%s2071_s28 + $0xd0] sm:$0xff] (!%p1503_p12), %v1357_v19 }
 0x206   : > { %v1190_v54 = vpop.f32.mrb[60].mxu1  ;;  %v967_v55 = vpop.f32.mrb[61].mxu0  ;;  %v1294_v20 = vld [vmem:[#allocation2 + $0xd8] sm:$0xff] (!%p1503_p12) }
 0x207   : > { %1260 = vst [vmem:[#allocation2 + $0xe8] sm:$0xff] %v1228_v51  ;;  %v1191_v56 = vadd.f32 %v1190_v54, %v965_v52  ;;  %v1192_v57 = vpop.f32.mrb[61].mxu1  ;;  %v1315_v51 = vld [vmem:[%s2066_s24 + $0x80] sm:$0xff] (!%p1503_p12)  ;;  %v1284_v52 = vld [vmem:[#allocation2 + $0x88] sm:$0xff] (!%p1503_p12)  ;;  %1377 = vst [vmem:[%s2071_s28 + $0x70] sm:$0xff] (!%p1503_p12), %v1345_v46  ;;  %v1358_v23 = vadd.f32 (!%p1503_p12), %v1326_v21, %v1294_v20 }
 0x208   : > { %v1347_v54 = vadd.f32 (!%p1503_p12), %v1315_v51, %v1283_v49  ;;  %v1317_v57 = vld [vmem:[%s2066_s24 + $0x90] sm:$0xff] (!%p1503_p12)  ;;  %1378 = vst [vmem:[%s2071_s28 + $0x78] sm:$0xff] (!%p1503_p12), %v1346_v50 }
 0x209   : > { %v1229_v58 = vadd.f32 %v1191_v56, %v553_v53  ;;  %v970_v59 = vpop.f32.mrb[62].mxu0  ;;  %1266 = sbr.rel (%p1503_p12) target bundleno = 538 (0x21a), region = 63  ;;  %v1316_v53 = vld [vmem:[%s2066_s24 + $0x88] sm:$0xff] (!%p1503_p12)  ;;  %v1285_v56 = vld [vmem:[#allocation2 + $0x90] sm:$0xff] (!%p1503_p12)  ;;  %1390 = vst [vmem:[%s2071_s28 + $0xd8] sm:$0xff] (!%p1503_p12), %v1358_v23 }
 0x20a   : > { %v1195_v61 = vpop.f32.mrb[62].mxu1  ;;  %v972_v62 = vpop.f32.mrb[63].mxu0  ;;  %v1348_v55 = vadd.f32 (!%p1503_p12), %v1316_v53, %v1284_v52  ;;  %1379 = vst [vmem:[%s2071_s28 + $0x80] sm:$0xff] (!%p1503_p12), %v1347_v54  ;;  %v1295_v22 = vld [vmem:[#allocation2 + $0xe0] sm:$0xff] (!%p1503_p12) }
 0x20b   : > { %1261 = vst [vmem:[#allocation2 + $0xf0] sm:$0xff] %v1229_v58  ;;  %v1196_v63 = vadd.f32 %v1195_v61, %v970_v59  ;;  %v1197_v0 = vpop.f32.mrb[63].mxu1  ;;  %v1286_v58 = vld [vmem:[#allocation2 + $0x98] sm:$0xff] (!%p1503_p12)  ;;  %v1349_v59 = vadd.f32 (!%p1503_p12), %v1317_v57, %v1285_v56  ;;  %v1287_v61 = vld [vmem:[#allocation2 + $0xa0] sm:$0xff] (!%p1503_p12)  ;;  %v1359_v27 = vadd.f32 (!%p1503_p12), %v1327_v24, %v1295_v22 }
 0x20c   : > { %v1319_v62 = vld [vmem:[%s2066_s24 + $0xa0] sm:$0xff] (!%p1503_p12)  ;;  %1380 = vst [vmem:[%s2071_s28 + $0x88] sm:$0xff] (!%p1503_p12), %v1348_v55 }
 0x20d   : > { %v1230_v1 = vadd.f32 %v1196_v63, %v554_v60  ;;  %v1318_v60 = vld [vmem:[%s2066_s24 + $0x98] sm:$0xff] (!%p1503_p12)  ;;  %v1351_v0 = vadd.f32 (!%p1503_p12), %v1319_v62, %v1287_v61  ;;  %1381 = vst [vmem:[%s2071_s28 + $0x90] sm:$0xff] (!%p1503_p12), %v1349_v59  ;;  %1391 = vst [vmem:[%s2071_s28 + $0xe0] sm:$0xff] (!%p1503_p12), %v1359_v27 }
 0x20e   : > { %v1350_v63 = vadd.f32 (!%p1503_p12), %v1318_v60, %v1286_v58  ;;  %v1296_v25 = vld [vmem:[#allocation2 + $0xe8] sm:$0xff] (!%p1503_p12) }
 0x20f   : > { %1262 = vst [vmem:[#allocation2 + $0xf8] sm:$0xff] %v1230_v1  ;;  %v1288_v1 = vld [vmem:[#allocation2 + $0xa8] sm:$0xff] (!%p1503_p12)  ;;  %1383 = vst [vmem:[%s2071_s28 + $0xa0] sm:$0xff] (!%p1503_p12), %v1351_v0  ;;  %v1360_v28 = vadd.f32 (!%p1503_p12), %v1328_v26, %v1296_v25 }
 0x210   : > { %v1352_v5 = vadd.f32 %v1320_v2, %v1288_v1  ;;  %1382 = vst [vmem:[%s2071_s28 + $0x98] sm:$0xff] %v1350_v63 }
 0x211   : > { %1392 = vst [vmem:[%s2071_s28 + $0xe8] sm:$0xff] %v1360_v28 }
 0x212   : > { %1384 = vst [vmem:[%s2071_s28 + $0xa8] sm:$0xff] %v1352_v5  ;;  %v1297_v29 = vld [vmem:[#allocation2 + $0xf0] sm:$0xff] }
 0x213   : > { %v1361_v32 = vadd.f32 %v1329_v30, %v1297_v29 }
 0x215   : > { %1393 = vst [vmem:[%s2071_s28 + $0xf0] sm:$0xff] %v1361_v32 }
 0x216   : > { %v1298_v31 = vld [vmem:[#allocation2 + $0xf8] sm:$0xff] }
 0x217   : > { %v1362_v34 = vadd.f32 %v1330_v33, %v1298_v31 }
 0x219   : > { %1394 = vst [vmem:[%s2071_s28 + $0xf8] sm:$0xff] %v1362_v34 }
 0x21a PF: > { %s13_s18 = sadd.s32 1, %s1715_s18   ;;  %s2396_s12 = smov %s1695_s13 }
 0x21b   : > { %p10_p13 = scmp.ge.s32.totalorder %s13_s18, 10   ;;  %s2397_s13 = smov %s1790_s25 }
 0x21c   : > { %s2398_s14 = smov %s1707_s16  ;;  %s2399_s15 = smov %s1711_s17 }
 0x21d   : > { %s2400_s16 = smov %s2403_s19  ;;  %s2401_s17 = smov %s2407_s20 }
 0x21e   :  { %12 = sbr.rel (!%p10_p13) target bundleno = 4 (0x4), region = 102 }

</bundles_post_ra>
